<compile_context>
chip_gen: v7x
topology: tpu7x:2x2x1
jax: 0.10.0
libtpu: 0.0.40
codegen_flags: <defaults>
</compile_context>

<pallas_src>
import functools
import math

import jax
import jax.numpy as jnp
from jax import lax
from jax.experimental import pallas as pl
from jax.experimental.pallas import tpu as pltpu


# ----------------------------------------------------------------------------
# Fused attention block kernel:  out = LN(x + Wo @ MHA(x, kv) + bo)
# ----------------------------------------------------------------------------
def _attn_block_kernel(x_ref, kv_ref, wq_ref, bq_ref, wk_ref, bk_ref,
                       wv_ref, bv_ref, wo_ref, bo_ref, g_ref, beta_ref, o_ref,
                       *, num_heads, scale, causal, eps):
    x = x_ref[0].astype(jnp.float32)      # (Sq, D)
    kv = kv_ref[0].astype(jnp.float32)    # (Sk, D)
    D = x.shape[-1]
    Dh = D // num_heads

    # Fused-in QKV projections (full D-wide, lane-dense matmuls on the MXU).
    q = jnp.dot(x, wq_ref[...], preferred_element_type=jnp.float32) + bq_ref[...]
    k = jnp.dot(kv, wk_ref[...], preferred_element_type=jnp.float32) + bk_ref[...]
    v = jnp.dot(kv, wv_ref[...], preferred_element_type=jnp.float32) + bv_ref[...]
    # Fold 1/sqrt(Dh) into Q (cheaper than scaling the (Sq, Sk) score matrix).
    q = q * jnp.float32(scale)

    head_outs = []
    for h in range(num_heads):            # static, small head count
        lo, hi = h * Dh, (h + 1) * Dh
        qh = q[:, lo:hi]                   # (Sq, Dh)
        kh = k[:, lo:hi]                   # (Sk, Dh)
        vh = v[:, lo:hi]                   # (Sk, Dh)
        # Contract over Dh directly — no materialized k.T / XLU transpose.
        s = lax.dot_general(qh, kh, (((1,), (1,)), ((), ())),
                            preferred_element_type=jnp.float32)   # (Sq, Sk)
        if causal:
            row = lax.broadcasted_iota(jnp.int32, s.shape, 0)
            col = lax.broadcasted_iota(jnp.int32, s.shape, 1)
            s = jnp.where(col <= row, s, jnp.float32(-1e30))
        m = jnp.max(s, axis=-1, keepdims=True)
        p = jnp.exp(s - m)
        denom = jnp.sum(p, axis=-1, keepdims=True)
        attn = p * pl.reciprocal(denom, approx=True)   # EUP slot, ~free
        head_outs.append(jnp.dot(attn, vh, preferred_element_type=jnp.float32))
    ctx = jnp.concatenate(head_outs, axis=-1)          # (Sq, D) lane-dense

    proj = jnp.dot(ctx, wo_ref[...], preferred_element_type=jnp.float32) + bo_ref[...]

    # Residual add + LayerNorm (f32 math), fused epilogue.
    y = x + proj
    mu = jnp.mean(y, axis=-1, keepdims=True)
    var = jnp.mean(jnp.square(y - mu), axis=-1, keepdims=True)
    yn = (y - mu) * lax.rsqrt(var + eps)
    o_ref[0] = (yn * g_ref[...] + beta_ref[...]).astype(o_ref.dtype)


def attention_block(x, kv, p, gamma, beta, num_heads, causal, eps=1e-5):
    """x: (B, Sq, D) queries; kv: (B, Sk, D) keys/values source.  Returns (B, Sq, D)."""
    B, Sq, D = x.shape
    Sk = kv.shape[1]
    scale = 1.0 / math.sqrt(D // num_heads)

    flops = 2 * B * D * D * (2 * Sq + 2 * Sk) + 4 * B * Sq * Sk * D
    bytes_accessed = 4 * (2 * B * Sq * D + B * Sk * D + 4 * D * D + 6 * D)
    transcendentals = B * num_heads * Sq * Sk + B * Sq

    kernel = functools.partial(_attn_block_kernel, num_heads=num_heads,
                               scale=scale, causal=causal, eps=eps)
    wspec = pl.BlockSpec((D, D), lambda b: (0, 0))   # weights resident across grid
    vspec = pl.BlockSpec((1, D), lambda b: (0, 0))   # biases / LN params resident

    return pl.pallas_call(
        kernel,
        out_shape=jax.ShapeDtypeStruct((B, Sq, D), x.dtype),
        grid_spec=pltpu.PrefetchScalarGridSpec(
            num_scalar_prefetch=0,
            grid=(B,),
            in_specs=[
                pl.BlockSpec((1, Sq, D), lambda b: (b, 0, 0)),
                pl.BlockSpec((1, Sk, D), lambda b: (b, 0, 0)),
                wspec, vspec,   # wq, bq
                wspec, vspec,   # wk, bk
                wspec, vspec,   # wv, bv
                wspec, vspec,   # wo, bo
                vspec, vspec,   # gamma, beta
            ],
            out_specs=pl.BlockSpec((1, Sq, D), lambda b: (b, 0, 0)),
        ),
        compiler_params=pltpu.CompilerParams(dimension_semantics=("parallel",)),
        cost_estimate=pl.CostEstimate(flops=flops,
                                      transcendentals=transcendentals,
                                      bytes_accessed=bytes_accessed),
    )(x, kv,
      p["wq"], p["bq"].reshape(1, D),
      p["wk"], p["bk"].reshape(1, D),
      p["wv"], p["bv"].reshape(1, D),
      p["wo"], p["bo"].reshape(1, D),
      gamma.reshape(1, D), beta.reshape(1, D))


# ----------------------------------------------------------------------------
# Fused FFN block kernel:  out = LN(x + W2 @ relu(W1 @ x + b1) + b2)
# ----------------------------------------------------------------------------
def _ffn_block_kernel(x_ref, w1_ref, b1_ref, w2_ref, b2_ref, g_ref, beta_ref,
                      o_ref, *, eps):
    x = x_ref[...].astype(jnp.float32)                              # (tm, D)
    h = jnp.dot(x, w1_ref[...], preferred_element_type=jnp.float32) + b1_ref[...]
    h = jnp.maximum(h, 0.0)                                          # (tm, Dff) stays in VMEM
    f = jnp.dot(h, w2_ref[...], preferred_element_type=jnp.float32) + b2_ref[...]
    y = x + f
    mu = jnp.mean(y, axis=-1, keepdims=True)
    var = jnp.mean(jnp.square(y - mu), axis=-1, keepdims=True)
    yn = (y - mu) * lax.rsqrt(var + eps)
    o_ref[...] = (yn * g_ref[...] + beta_ref[...]).astype(o_ref.dtype)


def ffn_block(x, p, gamma, beta, eps=1e-5, tm_cap=256):
    """x: (B, S, D) -> (B, S, D). Large row tiles over the flattened (B*S, D) slab."""
    B, S, D = x.shape
    M = B * S
    Dff = p["w1"].shape[1]
    x2 = x.reshape(M, D)
    # Whole slab if small; otherwise big (multiple-of-8) row tiles — partial final
    # block is handled by Pallas bounds masking (LN is row-wise so it stays correct).
    tm = M if M <= tm_cap else tm_cap

    flops = 4 * M * D * Dff
    bytes_accessed = 4 * (2 * M * D + 2 * D * Dff + Dff + 3 * D)

    out = pl.pallas_call(
        functools.partial(_ffn_block_kernel, eps=eps),
        out_shape=jax.ShapeDtypeStruct((M, D), x.dtype),
        grid_spec=pltpu.PrefetchScalarGridSpec(
            num_scalar_prefetch=0,
            grid=(pl.cdiv(M, tm),),
            in_specs=[
                pl.BlockSpec((tm, D), lambda i: (i, 0)),
                pl.BlockSpec((D, Dff), lambda i: (0, 0)),
                pl.BlockSpec((1, Dff), lambda i: (0, 0)),
                pl.BlockSpec((Dff, D), lambda i: (0, 0)),
                pl.BlockSpec((1, D), lambda i: (0, 0)),
                pl.BlockSpec((1, D), lambda i: (0, 0)),
                pl.BlockSpec((1, D), lambda i: (0, 0)),
            ],
            out_specs=pl.BlockSpec((tm, D), lambda i: (i, 0)),
        ),
        compiler_params=pltpu.CompilerParams(dimension_semantics=("parallel",)),
        cost_estimate=pl.CostEstimate(flops=flops, transcendentals=M,
                                      bytes_accessed=bytes_accessed),
    )(x2, p["w1"], p["b1"].reshape(1, Dff),
      p["w2"], p["b2"].reshape(1, D),
      gamma.reshape(1, D), beta.reshape(1, D))
    return out.reshape(B, S, D)


# ----------------------------------------------------------------------------
# Transformer layers built from the two fused kernels
# ----------------------------------------------------------------------------
def encoder_layer(x, p, num_heads):
    x = attention_block(x, x, p["attn"], p["ln1_g"], p["ln1_b"],
                        num_heads, causal=False)
    x = ffn_block(x, p["ffn"], p["ln2_g"], p["ln2_b"])
    return x


def decoder_layer(x, memory, p, num_heads):
    x = attention_block(x, x, p["self_attn"], p["ln1_g"], p["ln1_b"],
                        num_heads, causal=True)
    x = attention_block(x, memory, p["cross_attn"], p["ln2_g"], p["ln2_b"],
                        num_heads, causal=False)
    x = ffn_block(x, p["ffn"], p["ln3_g"], p["ln3_b"])
    return x


def transformer_forward(src, tgt, params, num_encoder_heads, num_decoder_heads):
    memory = src
    for p in params["encoder"]:
        memory = encoder_layer(memory, p, num_encoder_heads)
    out = tgt
    for p in params["decoder"]:
        out = decoder_layer(out, memory, p, num_decoder_heads)
    return out


# ----------------------------------------------------------------------------
# Deterministic parameter init
# ----------------------------------------------------------------------------
def _init_attn(key, d):
    ks = jax.random.split(key, 4)
    std = 0.02
    f32 = jnp.float32
    return {
        "wq": jax.random.normal(ks[0], (d, d), f32) * std, "bq": jnp.zeros((d,), f32),
        "wk": jax.random.normal(ks[1], (d, d), f32) * std, "bk": jnp.zeros((d,), f32),
        "wv": jax.random.normal(ks[2], (d, d), f32) * std, "bv": jnp.zeros((d,), f32),
        "wo": jax.random.normal(ks[3], (d, d), f32) * std, "bo": jnp.zeros((d,), f32),
    }


def _init_ffn(key, d, d_ff):
    k1, k2 = jax.random.split(key)
    std = 0.02
    f32 = jnp.float32
    return {
        "w1": jax.random.normal(k1, (d, d_ff), f32) * std, "b1": jnp.zeros((d_ff,), f32),
        "w2": jax.random.normal(k2, (d_ff, d), f32) * std, "b2": jnp.zeros((d,), f32),
    }


def init_params(key, num_encoders, num_decoders, d, d_ff):
    f32 = jnp.float32
    enc, dec = [], []
    for _ in range(num_encoders):
        k_attn, k_ffn, key = jax.random.split(key, 3)
        enc.append({
            "attn": _init_attn(k_attn, d),
            "ffn": _init_ffn(k_ffn, d, d_ff),
            "ln1_g": jnp.ones((d,), f32), "ln1_b": jnp.zeros((d,), f32),
            "ln2_g": jnp.ones((d,), f32), "ln2_b": jnp.zeros((d,), f32),
        })
    for _ in range(num_decoders):
        k_sa, k_ca, k_ffn, key = jax.random.split(key, 4)
        dec.append({
            "self_attn": _init_attn(k_sa, d),
            "cross_attn": _init_attn(k_ca, d),
            "ffn": _init_ffn(k_ffn, d, d_ff),
            "ln1_g": jnp.ones((d,), f32), "ln1_b": jnp.zeros((d,), f32),
            "ln2_g": jnp.ones((d,), f32), "ln2_b": jnp.zeros((d,), f32),
            "ln3_g": jnp.ones((d,), f32), "ln3_b": jnp.zeros((d,), f32),
        })
    return {"encoder": enc, "decoder": dec}


# ----------------------------------------------------------------------------
if __name__ == "__main__":
    # Small config consistent with the module (scaled down from 6/6 layers, 512 dim, 8 heads).
    num_encoders, num_decoders = 2, 2
    token_vec_dim = 128
    num_encoder_heads = num_decoder_heads = 4
    d_ff = 4 * token_vec_dim
    B, S_src, S_tgt = 2, 16, 16

    key = jax.random.PRNGKey(0)
    k_src, k_tgt, k_params = jax.random.split(key, 3)
    src = jax.random.normal(k_src, (B, S_src, token_vec_dim), jnp.float32)
    tgt = jax.random.normal(k_tgt, (B, S_tgt, token_vec_dim), jnp.float32)
    params = init_params(k_params, num_encoders, num_decoders, token_vec_dim, d_ff)

    fwd = jax.jit(
        functools.partial(
            transformer_forward,
            num_encoder_heads=num_encoder_heads,
            num_decoder_heads=num_decoder_heads,
        )
    )
    out = fwd(src, tgt, params)
    jax.block_until_ready(out)
    assert out.shape == (B, S_tgt, token_vec_dim)
    assert bool(jnp.all(jnp.isfinite(out)))
    print("KERNEL_OK")
</pallas_src>

<mosaic_0001>
module attributes {stable_mosaic.version = 11 : i64} {
  func.func @_ffn_block_kernel(%arg0: i32, %arg1: memref<32x128xf32, #tpu.memory_space<vmem>>, %arg2: memref<128x512xf32, #tpu.memory_space<vmem>>, %arg3: memref<1x512xf32, #tpu.memory_space<vmem>>, %arg4: memref<512x128xf32, #tpu.memory_space<vmem>>, %arg5: memref<1x128xf32, #tpu.memory_space<vmem>>, %arg6: memref<1x128xf32, #tpu.memory_space<vmem>>, %arg7: memref<1x128xf32, #tpu.memory_space<vmem>>, %arg8: memref<32x128xf32, #tpu.memory_space<vmem>>) attributes {dimension_semantics = [#tpu.dimension_semantics<parallel>], iteration_bounds = array<i64: 1>, scalar_prefetch = 0 : i64, scratch_operands = 0 : i64, tpu.core_type = #tpu.core_type<tc>, window_params = [{transform_indices = @transform_0, window_bounds = array<i64: 32, 128>}, {pipeline_mode = #tpu.pipeline_mode<synchronous>, transform_indices = @transform_1, window_bounds = array<i64: 128, 512>}, {pipeline_mode = #tpu.pipeline_mode<synchronous>, transform_indices = @transform_2, window_bounds = array<i64: 1, 512>}, {pipeline_mode = #tpu.pipeline_mode<synchronous>, transform_indices = @transform_3, window_bounds = array<i64: 512, 128>}, {pipeline_mode = #tpu.pipeline_mode<synchronous>, transform_indices = @transform_4, window_bounds = array<i64: 1, 128>}, {pipeline_mode = #tpu.pipeline_mode<synchronous>, transform_indices = @transform_5, window_bounds = array<i64: 1, 128>}, {pipeline_mode = #tpu.pipeline_mode<synchronous>, transform_indices = @transform_6, window_bounds = array<i64: 1, 128>}, {transform_indices = @transform_7, window_bounds = array<i64: 32, 128>}]} {
    %c0 = arith.constant 0 : index
    %c0_0 = arith.constant 0 : index
    %0 = vector.load %arg1[%c0, %c0_0] : memref<32x128xf32, #tpu.memory_space<vmem>>, vector<32x128xf32>
    %c0_1 = arith.constant 0 : index
    %c0_2 = arith.constant 0 : index
    %1 = vector.load %arg2[%c0_1, %c0_2] : memref<128x512xf32, #tpu.memory_space<vmem>>, vector<128x512xf32>
    %cst = arith.constant dense<0.000000e+00> : vector<32x512xf32>
    %2 = tpu.matmul %0, %1, %cst {dimension_numbers = #tpu.dot_dimension_numbers<[1], [0], [0], [1], [0, 0, 1, 1], [], []>} : vector<32x128xf32>, vector<128x512xf32>, vector<32x512xf32> -> vector<32x512xf32>
    %c0_3 = arith.constant 0 : index
    %c0_4 = arith.constant 0 : index
    %3 = vector.load %arg3[%c0_3, %c0_4] : memref<1x512xf32, #tpu.memory_space<vmem>>, vector<1x512xf32>
    %4 = vector.broadcast %3 : vector<1x512xf32> to vector<32x512xf32>
    %5 = arith.addf %2, %4 : vector<32x512xf32>
    %cst_5 = arith.constant 0.000000e+00 : f32
    %6 = vector.broadcast %cst_5 : f32 to vector<32x512xf32>
    %7 = arith.maximumf %5, %6 : vector<32x512xf32>
    %c0_6 = arith.constant 0 : index
    %c0_7 = arith.constant 0 : index
    %8 = vector.load %arg4[%c0_6, %c0_7] : memref<512x128xf32, #tpu.memory_space<vmem>>, vector<512x128xf32>
    %cst_8 = arith.constant dense<0.000000e+00> : vector<32x128xf32>
    %9 = tpu.matmul %7, %8, %cst_8 {dimension_numbers = #tpu.dot_dimension_numbers<[1], [0], [0], [1], [0, 0, 1, 1], [], []>} : vector<32x512xf32>, vector<512x128xf32>, vector<32x128xf32> -> vector<32x128xf32>
    %c0_9 = arith.constant 0 : index
    %c0_10 = arith.constant 0 : index
    %10 = vector.load %arg5[%c0_9, %c0_10] : memref<1x128xf32, #tpu.memory_space<vmem>>, vector<1x128xf32>
    %11 = vector.broadcast %10 : vector<1x128xf32> to vector<32x128xf32>
    %12 = arith.addf %9, %11 : vector<32x128xf32>
    %13 = arith.addf %0, %12 : vector<32x128xf32>
    %cst_11 = arith.constant dense<0.000000e+00> : vector<32xf32>
    %14 = vector.multi_reduction <add>, %13, %cst_11 [1] : vector<32x128xf32> to vector<32xf32>
    %15 = vector.shape_cast %14 : vector<32xf32> to vector<32x1xf32>
    %cst_12 = arith.constant 1.280000e+02 : f32
    %16 = vector.broadcast %cst_12 : f32 to vector<32x1xf32>
    %17 = arith.divf %15, %16 : vector<32x1xf32>
    %18 = vector.broadcast %17 : vector<32x1xf32> to vector<32x128xf32>
    %19 = arith.subf %13, %18 : vector<32x128xf32>
    %20 = arith.mulf %19, %19 : vector<32x128xf32>
    %cst_13 = arith.constant dense<0.000000e+00> : vector<32xf32>
    %21 = vector.multi_reduction <add>, %20, %cst_13 [1] : vector<32x128xf32> to vector<32xf32>
    %22 = vector.shape_cast %21 : vector<32xf32> to vector<32x1xf32>
    %cst_14 = arith.constant 1.280000e+02 : f32
    %23 = vector.broadcast %cst_14 : f32 to vector<32x1xf32>
    %24 = arith.divf %22, %23 : vector<32x1xf32>
    %25 = vector.broadcast %17 : vector<32x1xf32> to vector<32x128xf32>
    %26 = arith.subf %13, %25 : vector<32x128xf32>
    %cst_15 = arith.constant 9.99999974E-6 : f32
    %27 = vector.broadcast %cst_15 : f32 to vector<32x1xf32>
    %28 = arith.addf %24, %27 : vector<32x1xf32>
    %29 = math.rsqrt %28 : vector<32x1xf32>
    %30 = vector.broadcast %29 : vector<32x1xf32> to vector<32x128xf32>
    %31 = arith.mulf %26, %30 : vector<32x128xf32>
    %c0_16 = arith.constant 0 : index
    %c0_17 = arith.constant 0 : index
    %32 = vector.load %arg6[%c0_16, %c0_17] : memref<1x128xf32, #tpu.memory_space<vmem>>, vector<1x128xf32>
    %33 = vector.broadcast %32 : vector<1x128xf32> to vector<32x128xf32>
    %34 = arith.mulf %31, %33 : vector<32x128xf32>
    %c0_18 = arith.constant 0 : index
    %c0_19 = arith.constant 0 : index
    %35 = vector.load %arg7[%c0_18, %c0_19] : memref<1x128xf32, #tpu.memory_space<vmem>>, vector<1x128xf32>
    %36 = vector.broadcast %35 : vector<1x128xf32> to vector<32x128xf32>
    %37 = arith.addf %34, %36 : vector<32x128xf32>
    %c0_20 = arith.constant 0 : index
    %c0_21 = arith.constant 0 : index
    %38 = vector.load %arg8[%c0_20, %c0_21] : memref<32x128xf32, #tpu.memory_space<vmem>>, vector<32x128xf32>
    tpu.vector_store %arg8[%c0_20, %c0_21], %37 {strides = array<i32>} : memref<32x128xf32, #tpu.memory_space<vmem>>, vector<32x128xf32>,
    return
  }
  func.func @transform_0(%arg0: i32) -> (i32, i32) {
    %c0_i32 = arith.constant 0 : i32
    %c0_i32_0 = arith.constant 0 : i32
    return %arg0, %c0_i32 : i32, i32
  }
  func.func @transform_1(%arg0: i32) -> (i32, i32) {
    %c0_i32 = arith.constant 0 : i32
    %c0_i32_0 = arith.constant 0 : i32
    %c0_i32_1 = arith.constant 0 : i32
    return %c0_i32, %c0_i32_0 : i32, i32
  }
  func.func @transform_2(%arg0: i32) -> (i32, i32) {
    %c0_i32 = arith.constant 0 : i32
    %c0_i32_0 = arith.constant 0 : i32
    %c0_i32_1 = arith.constant 0 : i32
    return %c0_i32, %c0_i32_0 : i32, i32
  }
  func.func @transform_3(%arg0: i32) -> (i32, i32) {
    %c0_i32 = arith.constant 0 : i32
    %c0_i32_0 = arith.constant 0 : i32
    %c0_i32_1 = arith.constant 0 : i32
    return %c0_i32, %c0_i32_0 : i32, i32
  }
  func.func @transform_4(%arg0: i32) -> (i32, i32) {
    %c0_i32 = arith.constant 0 : i32
    %c0_i32_0 = arith.constant 0 : i32
    %c0_i32_1 = arith.constant 0 : i32
    return %c0_i32, %c0_i32_0 : i32, i32
  }
  func.func @transform_5(%arg0: i32) -> (i32, i32) {
    %c0_i32 = arith.constant 0 : i32
    %c0_i32_0 = arith.constant 0 : i32
    %c0_i32_1 = arith.constant 0 : i32
    return %c0_i32, %c0_i32_0 : i32, i32
  }
  func.func @transform_6(%arg0: i32) -> (i32, i32) {
    %c0_i32 = arith.constant 0 : i32
    %c0_i32_0 = arith.constant 0 : i32
    %c0_i32_1 = arith.constant 0 : i32
    return %c0_i32, %c0_i32_0 : i32, i32
  }
  func.func @transform_7(%arg0: i32) -> (i32, i32) {
    %c0_i32 = arith.constant 0 : i32
    %c0_i32_0 = arith.constant 0 : i32
    return %arg0, %c0_i32 : i32, i32
  }
}

module attributes {stable_mosaic.version = 11 : i64} {
  func.func @_attn_block_kernel(%arg0: i32, %arg1: memref<1x16x128xf32, #tpu.memory_space<vmem>>, %arg2: memref<1x16x128xf32, #tpu.memory_space<vmem>>, %arg3: memref<128x128xf32, #tpu.memory_space<vmem>>, %arg4: memref<1x128xf32, #tpu.memory_space<vmem>>, %arg5: memref<128x128xf32, #tpu.memory_space<vmem>>, %arg6: memref<1x128xf32, #tpu.memory_space<vmem>>, %arg7: memref<128x128xf32, #tpu.memory_space<vmem>>, %arg8: memref<1x128xf32, #tpu.memory_space<vmem>>, %arg9: memref<128x128xf32, #tpu.memory_space<vmem>>, %arg10: memref<1x128xf32, #tpu.memory_space<vmem>>, %arg11: memref<1x128xf32, #tpu.memory_space<vmem>>, %arg12: memref<1x128xf32, #tpu.memory_space<vmem>>, %arg13: memref<1x16x128xf32, #tpu.memory_space<vmem>>) attributes {dimension_semantics = [#tpu.dimension_semantics<parallel>], iteration_bounds = array<i64: 2>, scalar_prefetch = 0 : i64, scratch_operands = 0 : i64, tpu.core_type = #tpu.core_type<tc>, window_params = [{transform_indices = @transform_0, window_bounds = array<i64: 1, 16, 128>}, {transform_indices = @transform_1, window_bounds = array<i64: 1, 16, 128>}, {pipeline_mode = #tpu.pipeline_mode<synchronous>, transform_indices = @transform_2, window_bounds = array<i64: 128, 128>}, {pipeline_mode = #tpu.pipeline_mode<synchronous>, transform_indices = @transform_3, window_bounds = array<i64: 1, 128>}, {pipeline_mode = #tpu.pipeline_mode<synchronous>, transform_indices = @transform_4, window_bounds = array<i64: 128, 128>}, {pipeline_mode = #tpu.pipeline_mode<synchronous>, transform_indices = @transform_5, window_bounds = array<i64: 1, 128>}, {pipeline_mode = #tpu.pipeline_mode<synchronous>, transform_indices = @transform_6, window_bounds = array<i64: 128, 128>}, {pipeline_mode = #tpu.pipeline_mode<synchronous>, transform_indices = @transform_7, window_bounds = array<i64: 1, 128>}, {pipeline_mode = #tpu.pipeline_mode<synchronous>, transform_indices = @transform_8, window_bounds = array<i64: 128, 128>}, {pipeline_mode = #tpu.pipeline_mode<synchronous>, transform_indices = @transform_9, window_bounds = array<i64: 1, 128>}, {pipeline_mode = #tpu.pipeline_mode<synchronous>, transform_indices = @transform_10, window_bounds = array<i64: 1, 128>}, {pipeline_mode = #tpu.pipeline_mode<synchronous>, transform_indices = @transform_11, window_bounds = array<i64: 1, 128>}, {transform_indices = @transform_12, window_bounds = array<i64: 1, 16, 128>}]} {
    %c0 = arith.constant 0 : index
    %c0_0 = arith.constant 0 : index
    %c0_1 = arith.constant 0 : index
    %0 = vector.load %arg1[%c0, %c0_0, %c0_1] : memref<1x16x128xf32, #tpu.memory_space<vmem>>, vector<1x16x128xf32>
    %1 = vector.shape_cast %0 : vector<1x16x128xf32> to vector<16x128xf32>
    %c0_2 = arith.constant 0 : index
    %c0_3 = arith.constant 0 : index
    %c0_4 = arith.constant 0 : index
    %2 = vector.load %arg2[%c0_2, %c0_3, %c0_4] : memref<1x16x128xf32, #tpu.memory_space<vmem>>, vector<1x16x128xf32>
    %3 = vector.shape_cast %2 : vector<1x16x128xf32> to vector<16x128xf32>
    %c0_5 = arith.constant 0 : index
    %c0_6 = arith.constant 0 : index
    %4 = vector.load %arg3[%c0_5, %c0_6] : memref<128x128xf32, #tpu.memory_space<vmem>>, vector<128x128xf32>
    %cst = arith.constant dense<0.000000e+00> : vector<16x128xf32>
    %5 = tpu.matmul %1, %4, %cst {dimension_numbers = #tpu.dot_dimension_numbers<[1], [0], [0], [1], [0, 0, 1, 1], [], []>} : vector<16x128xf32>, vector<128x128xf32>, vector<16x128xf32> -> vector<16x128xf32>
    %c0_7 = arith.constant 0 : index
    %c0_8 = arith.constant 0 : index
    %6 = vector.load %arg4[%c0_7, %c0_8] : memref<1x128xf32, #tpu.memory_space<vmem>>, vector<1x128xf32>
    %7 = vector.broadcast %6 : vector<1x128xf32> to vector<16x128xf32>
    %8 = arith.addf %5, %7 : vector<16x128xf32>
    %c0_9 = arith.constant 0 : index
    %c0_10 = arith.constant 0 : index
    %9 = vector.load %arg5[%c0_9, %c0_10] : memref<128x128xf32, #tpu.memory_space<vmem>>, vector<128x128xf32>
    %cst_11 = arith.constant dense<0.000000e+00> : vector<16x128xf32>
    %10 = tpu.matmul %3, %9, %cst_11 {dimension_numbers = #tpu.dot_dimension_numbers<[1], [0], [0], [1], [0, 0, 1, 1], [], []>} : vector<16x128xf32>, vector<128x128xf32>, vector<16x128xf32> -> vector<16x128xf32>
    %c0_12 = arith.constant 0 : index
    %c0_13 = arith.constant 0 : index
    %11 = vector.load %arg6[%c0_12, %c0_13] : memref<1x128xf32, #tpu.memory_space<vmem>>, vector<1x128xf32>
    %12 = vector.broadcast %11 : vector<1x128xf32> to vector<16x128xf32>
    %13 = arith.addf %10, %12 : vector<16x128xf32>
    %c0_14 = arith.constant 0 : index
    %c0_15 = arith.constant 0 : index
    %14 = vector.load %arg7[%c0_14, %c0_15] : memref<128x128xf32, #tpu.memory_space<vmem>>, vector<128x128xf32>
    %cst_16 = arith.constant dense<0.000000e+00> : vector<16x128xf32>
    %15 = tpu.matmul %3, %14, %cst_16 {dimension_numbers = #tpu.dot_dimension_numbers<[1], [0], [0], [1], [0, 0, 1, 1], [], []>} : vector<16x128xf32>, vector<128x128xf32>, vector<16x128xf32> -> vector<16x128xf32>
    %c0_17 = arith.constant 0 : index
    %c0_18 = arith.constant 0 : index
    %16 = vector.load %arg8[%c0_17, %c0_18] : memref<1x128xf32, #tpu.memory_space<vmem>>, vector<1x128xf32>
    %17 = vector.broadcast %16 : vector<1x128xf32> to vector<16x128xf32>
    %18 = arith.addf %15, %17 : vector<16x128xf32>
    %cst_19 = arith.constant 0.176776692 : f32
    %19 = vector.broadcast %cst_19 : f32 to vector<16x128xf32>
    %20 = arith.mulf %8, %19 : vector<16x128xf32>
    %21 = vector.extract_strided_slice %20 {offsets = [0, 0], sizes = [16, 32], strides = [1, 1]} : vector<16x128xf32> to vector<16x32xf32>
    %22 = vector.extract_strided_slice %13 {offsets = [0, 0], sizes = [16, 32], strides = [1, 1]} : vector<16x128xf32> to vector<16x32xf32>
    %23 = vector.extract_strided_slice %18 {offsets = [0, 0], sizes = [16, 32], strides = [1, 1]} : vector<16x128xf32> to vector<16x32xf32>
    %cst_20 = arith.constant dense<0.000000e+00> : vector<16x16xf32>
    %24 = tpu.matmul %21, %22, %cst_20 {dimension_numbers = #tpu.dot_dimension_numbers<[1], [1], [0], [0], [0, 0, 1, 0], [], []>} : vector<16x32xf32>, vector<16x32xf32>, vector<16x16xf32> -> vector<16x16xf32>
    %cst_21 = arith.constant dense<0xFF800000> : vector<16xf32>
    %25 = vector.multi_reduction <maximumf>, %24, %cst_21 [1] : vector<16x16xf32> to vector<16xf32>
    %26 = vector.shape_cast %25 : vector<16xf32> to vector<16x1xf32>
    %27 = vector.broadcast %26 : vector<16x1xf32> to vector<16x16xf32>
    %28 = arith.subf %24, %27 : vector<16x16xf32>
    %29 = math.exp %28 : vector<16x16xf32>
    %cst_22 = arith.constant dense<0.000000e+00> : vector<16xf32>
    %30 = vector.multi_reduction <add>, %29, %cst_22 [1] : vector<16x16xf32> to vector<16xf32>
    %31 = vector.shape_cast %30 : vector<16xf32> to vector<16x1xf32>
    %32 = tpu.reciprocal %31 {approx = true} : vector<16x1xf32> -> vector<16x1xf32>
    %33 = vector.broadcast %32 : vector<16x1xf32> to vector<16x16xf32>
    %34 = arith.mulf %29, %33 : vector<16x16xf32>
    %cst_23 = arith.constant dense<0.000000e+00> : vector<16x32xf32>
    %35 = tpu.matmul %34, %23, %cst_23 {dimension_numbers = #tpu.dot_dimension_numbers<[1], [0], [0], [1], [0, 0, 1, 1], [], []>} : vector<16x16xf32>, vector<16x32xf32>, vector<16x32xf32> -> vector<16x32xf32>
    %36 = vector.extract_strided_slice %20 {offsets = [0, 32], sizes = [16, 32], strides = [1, 1]} : vector<16x128xf32> to vector<16x32xf32>
    %37 = vector.extract_strided_slice %13 {offsets = [0, 32], sizes = [16, 32], strides = [1, 1]} : vector<16x128xf32> to vector<16x32xf32>
    %38 = vector.extract_strided_slice %18 {offsets = [0, 32], sizes = [16, 32], strides = [1, 1]} : vector<16x128xf32> to vector<16x32xf32>
    %cst_24 = arith.constant dense<0.000000e+00> : vector<16x16xf32>
    %39 = tpu.matmul %36, %37, %cst_24 {dimension_numbers = #tpu.dot_dimension_numbers<[1], [1], [0], [0], [0, 0, 1, 0], [], []>} : vector<16x32xf32>, vector<16x32xf32>, vector<16x16xf32> -> vector<16x16xf32>
    %cst_25 = arith.constant dense<0xFF800000> : vector<16xf32>
    %40 = vector.multi_reduction <maximumf>, %39, %cst_25 [1] : vector<16x16xf32> to vector<16xf32>
    %41 = vector.shape_cast %40 : vector<16xf32> to vector<16x1xf32>
    %42 = vector.broadcast %41 : vector<16x1xf32> to vector<16x16xf32>
    %43 = arith.subf %39, %42 : vector<16x16xf32>
    %44 = math.exp %43 : vector<16x16xf32>
    %cst_26 = arith.constant dense<0.000000e+00> : vector<16xf32>
    %45 = vector.multi_reduction <add>, %44, %cst_26 [1] : vector<16x16xf32> to vector<16xf32>
    %46 = vector.shape_cast %45 : vector<16xf32> to vector<16x1xf32>
    %47 = tpu.reciprocal %46 {approx = true} : vector<16x1xf32> -> vector<16x1xf32>
    %48 = vector.broadcast %47 : vector<16x1xf32> to vector<16x16xf32>
    %49 = arith.mulf %44, %48 : vector<16x16xf32>
    %cst_27 = arith.constant dense<0.000000e+00> : vector<16x32xf32>
    %50 = tpu.matmul %49, %38, %cst_27 {dimension_numbers = #tpu.dot_dimension_numbers<[1], [0], [0], [1], [0, 0, 1, 1], [], []>} : vector<16x16xf32>, vector<16x32xf32>, vector<16x32xf32> -> vector<16x32xf32>
    %51 = vector.extract_strided_slice %20 {offsets = [0, 64], sizes = [16, 32], strides = [1, 1]} : vector<16x128xf32> to vector<16x32xf32>
    %52 = vector.extract_strided_slice %13 {offsets = [0, 64], sizes = [16, 32], strides = [1, 1]} : vector<16x128xf32> to vector<16x32xf32>
    %53 = vector.extract_strided_slice %18 {offsets = [0, 64], sizes = [16, 32], strides = [1, 1]} : vector<16x128xf32> to vector<16x32xf32>
    %cst_28 = arith.constant dense<0.000000e+00> : vector<16x16xf32>
    %54 = tpu.matmul %51, %52, %cst_28 {dimension_numbers = #tpu.dot_dimension_numbers<[1], [1], [0], [0], [0, 0, 1, 0], [], []>} : vector<16x32xf32>, vector<16x32xf32>, vector<16x16xf32> -> vector<16x16xf32>
    %cst_29 = arith.constant dense<0xFF800000> : vector<16xf32>
    %55 = vector.multi_reduction <maximumf>, %54, %cst_29 [1] : vector<16x16xf32> to vector<16xf32>
    %56 = vector.shape_cast %55 : vector<16xf32> to vector<16x1xf32>
    %57 = vector.broadcast %56 : vector<16x1xf32> to vector<16x16xf32>
    %58 = arith.subf %54, %57 : vector<16x16xf32>
    %59 = math.exp %58 : vector<16x16xf32>
    %cst_30 = arith.constant dense<0.000000e+00> : vector<16xf32>
    %60 = vector.multi_reduction <add>, %59, %cst_30 [1] : vector<16x16xf32> to vector<16xf32>
    %61 = vector.shape_cast %60 : vector<16xf32> to vector<16x1xf32>
    %62 = tpu.reciprocal %61 {approx = true} : vector<16x1xf32> -> vector<16x1xf32>
    %63 = vector.broadcast %62 : vector<16x1xf32> to vector<16x16xf32>
    %64 = arith.mulf %59, %63 : vector<16x16xf32>
    %cst_31 = arith.constant dense<0.000000e+00> : vector<16x32xf32>
    %65 = tpu.matmul %64, %53, %cst_31 {dimension_numbers = #tpu.dot_dimension_numbers<[1], [0], [0], [1], [0, 0, 1, 1], [], []>} : vector<16x16xf32>, vector<16x32xf32>, vector<16x32xf32> -> vector<16x32xf32>
    %66 = vector.extract_strided_slice %20 {offsets = [0, 96], sizes = [16, 32], strides = [1, 1]} : vector<16x128xf32> to vector<16x32xf32>
    %67 = vector.extract_strided_slice %13 {offsets = [0, 96], sizes = [16, 32], strides = [1, 1]} : vector<16x128xf32> to vector<16x32xf32>
    %68 = vector.extract_strided_slice %18 {offsets = [0, 96], sizes = [16, 32], strides = [1, 1]} : vector<16x128xf32> to vector<16x32xf32>
    %cst_32 = arith.constant dense<0.000000e+00> : vector<16x16xf32>
    %69 = tpu.matmul %66, %67, %cst_32 {dimension_numbers = #tpu.dot_dimension_numbers<[1], [1], [0], [0], [0, 0, 1, 0], [], []>} : vector<16x32xf32>, vector<16x32xf32>, vector<16x16xf32> -> vector<16x16xf32>
    %cst_33 = arith.constant dense<0xFF800000> : vector<16xf32>
    %70 = vector.multi_reduction <maximumf>, %69, %cst_33 [1] : vector<16x16xf32> to vector<16xf32>
    %71 = vector.shape_cast %70 : vector<16xf32> to vector<16x1xf32>
    %72 = vector.broadcast %71 : vector<16x1xf32> to vector<16x16xf32>
    %73 = arith.subf %69, %72 : vector<16x16xf32>
    %74 = math.exp %73 : vector<16x16xf32>
    %cst_34 = arith.constant dense<0.000000e+00> : vector<16xf32>
    %75 = vector.multi_reduction <add>, %74, %cst_34 [1] : vector<16x16xf32> to vector<16xf32>
    %76 = vector.shape_cast %75 : vector<16xf32> to vector<16x1xf32>
    %77 = tpu.reciprocal %76 {approx = true} : vector<16x1xf32> -> vector<16x1xf32>
    %78 = vector.broadcast %77 : vector<16x1xf32> to vector<16x16xf32>
    %79 = arith.mulf %74, %78 : vector<16x16xf32>
    %cst_35 = arith.constant dense<0.000000e+00> : vector<16x32xf32>
    %80 = tpu.matmul %79, %68, %cst_35 {dimension_numbers = #tpu.dot_dimension_numbers<[1], [0], [0], [1], [0, 0, 1, 1], [], []>} : vector<16x16xf32>, vector<16x32xf32>, vector<16x32xf32> -> vector<16x32xf32>
    %81 = tpu.concatenate %35, %50, %65, %80 in 1 : vector<16x32xf32>, vector<16x32xf32>, vector<16x32xf32>, vector<16x32xf32> -> vector<16x128xf32>
    %c0_36 = arith.constant 0 : index
    %c0_37 = arith.constant 0 : index
    %82 = vector.load %arg9[%c0_36, %c0_37] : memref<128x128xf32, #tpu.memory_space<vmem>>, vector<128x128xf32>
    %cst_38 = arith.constant dense<0.000000e+00> : vector<16x128xf32>
    %83 = tpu.matmul %81, %82, %cst_38 {dimension_numbers = #tpu.dot_dimension_numbers<[1], [0], [0], [1], [0, 0, 1, 1], [], []>} : vector<16x128xf32>, vector<128x128xf32>, vector<16x128xf32> -> vector<16x128xf32>
    %c0_39 = arith.constant 0 : index
    %c0_40 = arith.constant 0 : index
    %84 = vector.load %arg10[%c0_39, %c0_40] : memref<1x128xf32, #tpu.memory_space<vmem>>, vector<1x128xf32>
    %85 = vector.broadcast %84 : vector<1x128xf32> to vector<16x128xf32>
    %86 = arith.addf %83, %85 : vector<16x128xf32>
    %87 = arith.addf %1, %86 : vector<16x128xf32>
    %cst_41 = arith.constant dense<0.000000e+00> : vector<16xf32>
    %88 = vector.multi_reduction <add>, %87, %cst_41 [1] : vector<16x128xf32> to vector<16xf32>
    %89 = vector.shape_cast %88 : vector<16xf32> to vector<16x1xf32>
    %cst_42 = arith.constant 1.280000e+02 : f32
    %90 = vector.broadcast %cst_42 : f32 to vector<16x1xf32>
    %91 = arith.divf %89, %90 : vector<16x1xf32>
    %92 = vector.broadcast %91 : vector<16x1xf32> to vector<16x128xf32>
    %93 = arith.subf %87, %92 : vector<16x128xf32>
    %94 = arith.mulf %93, %93 : vector<16x128xf32>
    %cst_43 = arith.constant dense<0.000000e+00> : vector<16xf32>
    %95 = vector.multi_reduction <add>, %94, %cst_43 [1] : vector<16x128xf32> to vector<16xf32>
    %96 = vector.shape_cast %95 : vector<16xf32> to vector<16x1xf32>
    %cst_44 = arith.constant 1.280000e+02 : f32
    %97 = vector.broadcast %cst_44 : f32 to vector<16x1xf32>
    %98 = arith.divf %96, %97 : vector<16x1xf32>
    %99 = vector.broadcast %91 : vector<16x1xf32> to vector<16x128xf32>
    %100 = arith.subf %87, %99 : vector<16x128xf32>
    %cst_45 = arith.constant 9.99999974E-6 : f32
    %101 = vector.broadcast %cst_45 : f32 to vector<16x1xf32>
    %102 = arith.addf %98, %101 : vector<16x1xf32>
    %103 = math.rsqrt %102 : vector<16x1xf32>
    %104 = vector.broadcast %103 : vector<16x1xf32> to vector<16x128xf32>
    %105 = arith.mulf %100, %104 : vector<16x128xf32>
    %c0_46 = arith.constant 0 : index
    %c0_47 = arith.constant 0 : index
    %106 = vector.load %arg11[%c0_46, %c0_47] : memref<1x128xf32, #tpu.memory_space<vmem>>, vector<1x128xf32>
    %107 = vector.broadcast %106 : vector<1x128xf32> to vector<16x128xf32>
    %108 = arith.mulf %105, %107 : vector<16x128xf32>
    %c0_48 = arith.constant 0 : index
    %c0_49 = arith.constant 0 : index
    %109 = vector.load %arg12[%c0_48, %c0_49] : memref<1x128xf32, #tpu.memory_space<vmem>>, vector<1x128xf32>
    %110 = vector.broadcast %109 : vector<1x128xf32> to vector<16x128xf32>
    %111 = arith.addf %108, %110 : vector<16x128xf32>
    %c0_50 = arith.constant 0 : index
    %c0_51 = arith.constant 0 : index
    %c0_52 = arith.constant 0 : index
    %112 = vector.load %arg13[%c0_50, %c0_51, %c0_52] : memref<1x16x128xf32, #tpu.memory_space<vmem>>, vector<1x16x128xf32>
    %113 = vector.shape_cast %112 : vector<1x16x128xf32> to vector<16x128xf32>
    %114 = vector.shape_cast %111 : vector<16x128xf32> to vector<1x16x128xf32>
    tpu.vector_store %arg13[%c0_50, %c0_51, %c0_52], %114 {strides = array<i32>} : memref<1x16x128xf32, #tpu.memory_space<vmem>>, vector<1x16x128xf32>,
    return
  }
  func.func @transform_0(%arg0: i32) -> (i32, i32, i32) {
    %c0_i32 = arith.constant 0 : i32
    %c0_i32_0 = arith.constant 0 : i32
    %c0_i32_1 = arith.constant 0 : i32
    return %arg0, %c0_i32, %c0_i32_0 : i32, i32, i32
  }
  func.func @transform_1(%arg0: i32) -> (i32, i32, i32) {
    %c0_i32 = arith.constant 0 : i32
    %c0_i32_0 = arith.constant 0 : i32
    %c0_i32_1 = arith.constant 0 : i32
    return %arg0, %c0_i32, %c0_i32_0 : i32, i32, i32
  }
  func.func @transform_2(%arg0: i32) -> (i32, i32) {
    %c0_i32 = arith.constant 0 : i32
    %c0_i32_0 = arith.constant 0 : i32
    %c0_i32_1 = arith.constant 0 : i32
    return %c0_i32, %c0_i32_0 : i32, i32
  }
  func.func @transform_3(%arg0: i32) -> (i32, i32) {
    %c0_i32 = arith.constant 0 : i32
    %c0_i32_0 = arith.constant 0 : i32
    %c0_i32_1 = arith.constant 0 : i32
    return %c0_i32, %c0_i32_0 : i32, i32
  }
  func.func @transform_4(%arg0: i32) -> (i32, i32) {
    %c0_i32 = arith.constant 0 : i32
    %c0_i32_0 = arith.constant 0 : i32
    %c0_i32_1 = arith.constant 0 : i32
    return %c0_i32, %c0_i32_0 : i32, i32
  }
  func.func @transform_5(%arg0: i32) -> (i32, i32) {
    %c0_i32 = arith.constant 0 : i32
    %c0_i32_0 = arith.constant 0 : i32
    %c0_i32_1 = arith.constant 0 : i32
    return %c0_i32, %c0_i32_0 : i32, i32
  }
  func.func @transform_6(%arg0: i32) -> (i32, i32) {
    %c0_i32 = arith.constant 0 : i32
    %c0_i32_0 = arith.constant 0 : i32
    %c0_i32_1 = arith.constant 0 : i32
    return %c0_i32, %c0_i32_0 : i32, i32
  }
  func.func @transform_7(%arg0: i32) -> (i32, i32) {
    %c0_i32 = arith.constant 0 : i32
    %c0_i32_0 = arith.constant 0 : i32
    %c0_i32_1 = arith.constant 0 : i32
    return %c0_i32, %c0_i32_0 : i32, i32
  }
  func.func @transform_8(%arg0: i32) -> (i32, i32) {
    %c0_i32 = arith.constant 0 : i32
    %c0_i32_0 = arith.constant 0 : i32
    %c0_i32_1 = arith.constant 0 : i32
    return %c0_i32, %c0_i32_0 : i32, i32
  }
  func.func @transform_9(%arg0: i32) -> (i32, i32) {
    %c0_i32 = arith.constant 0 : i32
    %c0_i32_0 = arith.constant 0 : i32
    %c0_i32_1 = arith.constant 0 : i32
    return %c0_i32, %c0_i32_0 : i32, i32
  }
  func.func @transform_10(%arg0: i32) -> (i32, i32) {
    %c0_i32 = arith.constant 0 : i32
    %c0_i32_0 = arith.constant 0 : i32
    %c0_i32_1 = arith.constant 0 : i32
    return %c0_i32, %c0_i32_0 : i32, i32
  }
  func.func @transform_11(%arg0: i32) -> (i32, i32) {
    %c0_i32 = arith.constant 0 : i32
    %c0_i32_0 = arith.constant 0 : i32
    %c0_i32_1 = arith.constant 0 : i32
    return %c0_i32, %c0_i32_0 : i32, i32
  }
  func.func @transform_12(%arg0: i32) -> (i32, i32, i32) {
    %c0_i32 = arith.constant 0 : i32
    %c0_i32_0 = arith.constant 0 : i32
    %c0_i32_1 = arith.constant 0 : i32
    return %arg0, %c0_i32, %c0_i32_0 : i32, i32, i32
  }
}

module attributes {stable_mosaic.version = 11 : i64} {
  func.func @_attn_block_kernel(%arg0: i32, %arg1: memref<1x16x128xf32, #tpu.memory_space<vmem>>, %arg2: memref<1x16x128xf32, #tpu.memory_space<vmem>>, %arg3: memref<128x128xf32, #tpu.memory_space<vmem>>, %arg4: memref<1x128xf32, #tpu.memory_space<vmem>>, %arg5: memref<128x128xf32, #tpu.memory_space<vmem>>, %arg6: memref<1x128xf32, #tpu.memory_space<vmem>>, %arg7: memref<128x128xf32, #tpu.memory_space<vmem>>, %arg8: memref<1x128xf32, #tpu.memory_space<vmem>>, %arg9: memref<128x128xf32, #tpu.memory_space<vmem>>, %arg10: memref<1x128xf32, #tpu.memory_space<vmem>>, %arg11: memref<1x128xf32, #tpu.memory_space<vmem>>, %arg12: memref<1x128xf32, #tpu.memory_space<vmem>>, %arg13: memref<1x16x128xf32, #tpu.memory_space<vmem>>) attributes {dimension_semantics = [#tpu.dimension_semantics<parallel>], iteration_bounds = array<i64: 2>, scalar_prefetch = 0 : i64, scratch_operands = 0 : i64, tpu.core_type = #tpu.core_type<tc>, window_params = [{transform_indices = @transform_0, window_bounds = array<i64: 1, 16, 128>}, {transform_indices = @transform_1, window_bounds = array<i64: 1, 16, 128>}, {pipeline_mode = #tpu.pipeline_mode<synchronous>, transform_indices = @transform_2, window_bounds = array<i64: 128, 128>}, {pipeline_mode = #tpu.pipeline_mode<synchronous>, transform_indices = @transform_3, window_bounds = array<i64: 1, 128>}, {pipeline_mode = #tpu.pipeline_mode<synchronous>, transform_indices = @transform_4, window_bounds = array<i64: 128, 128>}, {pipeline_mode = #tpu.pipeline_mode<synchronous>, transform_indices = @transform_5, window_bounds = array<i64: 1, 128>}, {pipeline_mode = #tpu.pipeline_mode<synchronous>, transform_indices = @transform_6, window_bounds = array<i64: 128, 128>}, {pipeline_mode = #tpu.pipeline_mode<synchronous>, transform_indices = @transform_7, window_bounds = array<i64: 1, 128>}, {pipeline_mode = #tpu.pipeline_mode<synchronous>, transform_indices = @transform_8, window_bounds = array<i64: 128, 128>}, {pipeline_mode = #tpu.pipeline_mode<synchronous>, transform_indices = @transform_9, window_bounds = array<i64: 1, 128>}, {pipeline_mode = #tpu.pipeline_mode<synchronous>, transform_indices = @transform_10, window_bounds = array<i64: 1, 128>}, {pipeline_mode = #tpu.pipeline_mode<synchronous>, transform_indices = @transform_11, window_bounds = array<i64: 1, 128>}, {transform_indices = @transform_12, window_bounds = array<i64: 1, 16, 128>}]} {
    %c0 = arith.constant 0 : index
    %c0_0 = arith.constant 0 : index
    %c0_1 = arith.constant 0 : index
    %0 = vector.load %arg1[%c0, %c0_0, %c0_1] : memref<1x16x128xf32, #tpu.memory_space<vmem>>, vector<1x16x128xf32>
    %1 = vector.shape_cast %0 : vector<1x16x128xf32> to vector<16x128xf32>
    %c0_2 = arith.constant 0 : index
    %c0_3 = arith.constant 0 : index
    %c0_4 = arith.constant 0 : index
    %2 = vector.load %arg2[%c0_2, %c0_3, %c0_4] : memref<1x16x128xf32, #tpu.memory_space<vmem>>, vector<1x16x128xf32>
    %3 = vector.shape_cast %2 : vector<1x16x128xf32> to vector<16x128xf32>
    %c0_5 = arith.constant 0 : index
    %c0_6 = arith.constant 0 : index
    %4 = vector.load %arg3[%c0_5, %c0_6] : memref<128x128xf32, #tpu.memory_space<vmem>>, vector<128x128xf32>
    %cst = arith.constant dense<0.000000e+00> : vector<16x128xf32>
    %5 = tpu.matmul %1, %4, %cst {dimension_numbers = #tpu.dot_dimension_numbers<[1], [0], [0], [1], [0, 0, 1, 1], [], []>} : vector<16x128xf32>, vector<128x128xf32>, vector<16x128xf32> -> vector<16x128xf32>
    %c0_7 = arith.constant 0 : index
    %c0_8 = arith.constant 0 : index
    %6 = vector.load %arg4[%c0_7, %c0_8] : memref<1x128xf32, #tpu.memory_space<vmem>>, vector<1x128xf32>
    %7 = vector.broadcast %6 : vector<1x128xf32> to vector<16x128xf32>
    %8 = arith.addf %5, %7 : vector<16x128xf32>
    %c0_9 = arith.constant 0 : index
    %c0_10 = arith.constant 0 : index
    %9 = vector.load %arg5[%c0_9, %c0_10] : memref<128x128xf32, #tpu.memory_space<vmem>>, vector<128x128xf32>
    %cst_11 = arith.constant dense<0.000000e+00> : vector<16x128xf32>
    %10 = tpu.matmul %3, %9, %cst_11 {dimension_numbers = #tpu.dot_dimension_numbers<[1], [0], [0], [1], [0, 0, 1, 1], [], []>} : vector<16x128xf32>, vector<128x128xf32>, vector<16x128xf32> -> vector<16x128xf32>
    %c0_12 = arith.constant 0 : index
    %c0_13 = arith.constant 0 : index
    %11 = vector.load %arg6[%c0_12, %c0_13] : memref<1x128xf32, #tpu.memory_space<vmem>>, vector<1x128xf32>
    %12 = vector.broadcast %11 : vector<1x128xf32> to vector<16x128xf32>
    %13 = arith.addf %10, %12 : vector<16x128xf32>
    %c0_14 = arith.constant 0 : index
    %c0_15 = arith.constant 0 : index
    %14 = vector.load %arg7[%c0_14, %c0_15] : memref<128x128xf32, #tpu.memory_space<vmem>>, vector<128x128xf32>
    %cst_16 = arith.constant dense<0.000000e+00> : vector<16x128xf32>
    %15 = tpu.matmul %3, %14, %cst_16 {dimension_numbers = #tpu.dot_dimension_numbers<[1], [0], [0], [1], [0, 0, 1, 1], [], []>} : vector<16x128xf32>, vector<128x128xf32>, vector<16x128xf32> -> vector<16x128xf32>
    %c0_17 = arith.constant 0 : index
    %c0_18 = arith.constant 0 : index
    %16 = vector.load %arg8[%c0_17, %c0_18] : memref<1x128xf32, #tpu.memory_space<vmem>>, vector<1x128xf32>
    %17 = vector.broadcast %16 : vector<1x128xf32> to vector<16x128xf32>
    %18 = arith.addf %15, %17 : vector<16x128xf32>
    %cst_19 = arith.constant 0.176776692 : f32
    %19 = vector.broadcast %cst_19 : f32 to vector<16x128xf32>
    %20 = arith.mulf %8, %19 : vector<16x128xf32>
    %21 = vector.extract_strided_slice %20 {offsets = [0, 0], sizes = [16, 32], strides = [1, 1]} : vector<16x128xf32> to vector<16x32xf32>
    %22 = vector.extract_strided_slice %13 {offsets = [0, 0], sizes = [16, 32], strides = [1, 1]} : vector<16x128xf32> to vector<16x32xf32>
    %23 = vector.extract_strided_slice %18 {offsets = [0, 0], sizes = [16, 32], strides = [1, 1]} : vector<16x128xf32> to vector<16x32xf32>
    %cst_20 = arith.constant dense<0.000000e+00> : vector<16x16xf32>
    %24 = tpu.matmul %21, %22, %cst_20 {dimension_numbers = #tpu.dot_dimension_numbers<[1], [1], [0], [0], [0, 0, 1, 0], [], []>} : vector<16x32xf32>, vector<16x32xf32>, vector<16x16xf32> -> vector<16x16xf32>
    %cst_21 = arith.constant dense<0xFF800000> : vector<16xf32>
    %25 = vector.multi_reduction <maximumf>, %24, %cst_21 [1] : vector<16x16xf32> to vector<16xf32>
    %26 = vector.shape_cast %25 : vector<16xf32> to vector<16x1xf32>
    %27 = vector.broadcast %26 : vector<16x1xf32> to vector<16x16xf32>
    %28 = arith.subf %24, %27 : vector<16x16xf32>
    %29 = math.exp %28 : vector<16x16xf32>
    %cst_22 = arith.constant dense<0.000000e+00> : vector<16xf32>
    %30 = vector.multi_reduction <add>, %29, %cst_22 [1] : vector<16x16xf32> to vector<16xf32>
    %31 = vector.shape_cast %30 : vector<16xf32> to vector<16x1xf32>
    %32 = tpu.reciprocal %31 {approx = true} : vector<16x1xf32> -> vector<16x1xf32>
    %33 = vector.broadcast %32 : vector<16x1xf32> to vector<16x16xf32>
    %34 = arith.mulf %29, %33 : vector<16x16xf32>
    %cst_23 = arith.constant dense<0.000000e+00> : vector<16x32xf32>
    %35 = tpu.matmul %34, %23, %cst_23 {dimension_numbers = #tpu.dot_dimension_numbers<[1], [0], [0], [1], [0, 0, 1, 1], [], []>} : vector<16x16xf32>, vector<16x32xf32>, vector<16x32xf32> -> vector<16x32xf32>
    %36 = vector.extract_strided_slice %20 {offsets = [0, 32], sizes = [16, 32], strides = [1, 1]} : vector<16x128xf32> to vector<16x32xf32>
    %37 = vector.extract_strided_slice %13 {offsets = [0, 32], sizes = [16, 32], strides = [1, 1]} : vector<16x128xf32> to vector<16x32xf32>
    %38 = vector.extract_strided_slice %18 {offsets = [0, 32], sizes = [16, 32], strides = [1, 1]} : vector<16x128xf32> to vector<16x32xf32>
    %cst_24 = arith.constant dense<0.000000e+00> : vector<16x16xf32>
    %39 = tpu.matmul %36, %37, %cst_24 {dimension_numbers = #tpu.dot_dimension_numbers<[1], [1], [0], [0], [0, 0, 1, 0], [], []>} : vector<16x32xf32>, vector<16x32xf32>, vector<16x16xf32> -> vector<16x16xf32>
    %cst_25 = arith.constant dense<0xFF800000> : vector<16xf32>
    %40 = vector.multi_reduction <maximumf>, %39, %cst_25 [1] : vector<16x16xf32> to vector<16xf32>
    %41 = vector.shape_cast %40 : vector<16xf32> to vector<16x1xf32>
    %42 = vector.broadcast %41 : vector<16x1xf32> to vector<16x16xf32>
    %43 = arith.subf %39, %42 : vector<16x16xf32>
    %44 = math.exp %43 : vector<16x16xf32>
    %cst_26 = arith.constant dense<0.000000e+00> : vector<16xf32>
    %45 = vector.multi_reduction <add>, %44, %cst_26 [1] : vector<16x16xf32> to vector<16xf32>
    %46 = vector.shape_cast %45 : vector<16xf32> to vector<16x1xf32>
    %47 = tpu.reciprocal %46 {approx = true} : vector<16x1xf32> -> vector<16x1xf32>
    %48 = vector.broadcast %47 : vector<16x1xf32> to vector<16x16xf32>
    %49 = arith.mulf %44, %48 : vector<16x16xf32>
    %cst_27 = arith.constant dense<0.000000e+00> : vector<16x32xf32>
    %50 = tpu.matmul %49, %38, %cst_27 {dimension_numbers = #tpu.dot_dimension_numbers<[1], [0], [0], [1], [0, 0, 1, 1], [], []>} : vector<16x16xf32>, vector<16x32xf32>, vector<16x32xf32> -> vector<16x32xf32>
    %51 = vector.extract_strided_slice %20 {offsets = [0, 64], sizes = [16, 32], strides = [1, 1]} : vector<16x128xf32> to vector<16x32xf32>
    %52 = vector.extract_strided_slice %13 {offsets = [0, 64], sizes = [16, 32], strides = [1, 1]} : vector<16x128xf32> to vector<16x32xf32>
    %53 = vector.extract_strided_slice %18 {offsets = [0, 64], sizes = [16, 32], strides = [1, 1]} : vector<16x128xf32> to vector<16x32xf32>
    %cst_28 = arith.constant dense<0.000000e+00> : vector<16x16xf32>
    %54 = tpu.matmul %51, %52, %cst_28 {dimension_numbers = #tpu.dot_dimension_numbers<[1], [1], [0], [0], [0, 0, 1, 0], [], []>} : vector<16x32xf32>, vector<16x32xf32>, vector<16x16xf32> -> vector<16x16xf32>
    %cst_29 = arith.constant dense<0xFF800000> : vector<16xf32>
    %55 = vector.multi_reduction <maximumf>, %54, %cst_29 [1] : vector<16x16xf32> to vector<16xf32>
    %56 = vector.shape_cast %55 : vector<16xf32> to vector<16x1xf32>
    %57 = vector.broadcast %56 : vector<16x1xf32> to vector<16x16xf32>
    %58 = arith.subf %54, %57 : vector<16x16xf32>
    %59 = math.exp %58 : vector<16x16xf32>
    %cst_30 = arith.constant dense<0.000000e+00> : vector<16xf32>
    %60 = vector.multi_reduction <add>, %59, %cst_30 [1] : vector<16x16xf32> to vector<16xf32>
    %61 = vector.shape_cast %60 : vector<16xf32> to vector<16x1xf32>
    %62 = tpu.reciprocal %61 {approx = true} : vector<16x1xf32> -> vector<16x1xf32>
    %63 = vector.broadcast %62 : vector<16x1xf32> to vector<16x16xf32>
    %64 = arith.mulf %59, %63 : vector<16x16xf32>
    %cst_31 = arith.constant dense<0.000000e+00> : vector<16x32xf32>
    %65 = tpu.matmul %64, %53, %cst_31 {dimension_numbers = #tpu.dot_dimension_numbers<[1], [0], [0], [1], [0, 0, 1, 1], [], []>} : vector<16x16xf32>, vector<16x32xf32>, vector<16x32xf32> -> vector<16x32xf32>
    %66 = vector.extract_strided_slice %20 {offsets = [0, 96], sizes = [16, 32], strides = [1, 1]} : vector<16x128xf32> to vector<16x32xf32>
    %67 = vector.extract_strided_slice %13 {offsets = [0, 96], sizes = [16, 32], strides = [1, 1]} : vector<16x128xf32> to vector<16x32xf32>
    %68 = vector.extract_strided_slice %18 {offsets = [0, 96], sizes = [16, 32], strides = [1, 1]} : vector<16x128xf32> to vector<16x32xf32>
    %cst_32 = arith.constant dense<0.000000e+00> : vector<16x16xf32>
    %69 = tpu.matmul %66, %67, %cst_32 {dimension_numbers = #tpu.dot_dimension_numbers<[1], [1], [0], [0], [0, 0, 1, 0], [], []>} : vector<16x32xf32>, vector<16x32xf32>, vector<16x16xf32> -> vector<16x16xf32>
    %cst_33 = arith.constant dense<0xFF800000> : vector<16xf32>
    %70 = vector.multi_reduction <maximumf>, %69, %cst_33 [1] : vector<16x16xf32> to vector<16xf32>
    %71 = vector.shape_cast %70 : vector<16xf32> to vector<16x1xf32>
    %72 = vector.broadcast %71 : vector<16x1xf32> to vector<16x16xf32>
    %73 = arith.subf %69, %72 : vector<16x16xf32>
    %74 = math.exp %73 : vector<16x16xf32>
    %cst_34 = arith.constant dense<0.000000e+00> : vector<16xf32>
    %75 = vector.multi_reduction <add>, %74, %cst_34 [1] : vector<16x16xf32> to vector<16xf32>
    %76 = vector.shape_cast %75 : vector<16xf32> to vector<16x1xf32>
    %77 = tpu.reciprocal %76 {approx = true} : vector<16x1xf32> -> vector<16x1xf32>
    %78 = vector.broadcast %77 : vector<16x1xf32> to vector<16x16xf32>
    %79 = arith.mulf %74, %78 : vector<16x16xf32>
    %cst_35 = arith.constant dense<0.000000e+00> : vector<16x32xf32>
    %80 = tpu.matmul %79, %68, %cst_35 {dimension_numbers = #tpu.dot_dimension_numbers<[1], [0], [0], [1], [0, 0, 1, 1], [], []>} : vector<16x16xf32>, vector<16x32xf32>, vector<16x32xf32> -> vector<16x32xf32>
    %81 = tpu.concatenate %35, %50, %65, %80 in 1 : vector<16x32xf32>, vector<16x32xf32>, vector<16x32xf32>, vector<16x32xf32> -> vector<16x128xf32>
    %c0_36 = arith.constant 0 : index
    %c0_37 = arith.constant 0 : index
    %82 = vector.load %arg9[%c0_36, %c0_37] : memref<128x128xf32, #tpu.memory_space<vmem>>, vector<128x128xf32>
    %cst_38 = arith.constant dense<0.000000e+00> : vector<16x128xf32>
    %83 = tpu.matmul %81, %82, %cst_38 {dimension_numbers = #tpu.dot_dimension_numbers<[1], [0], [0], [1], [0, 0, 1, 1], [], []>} : vector<16x128xf32>, vector<128x128xf32>, vector<16x128xf32> -> vector<16x128xf32>
    %c0_39 = arith.constant 0 : index
    %c0_40 = arith.constant 0 : index
    %84 = vector.load %arg10[%c0_39, %c0_40] : memref<1x128xf32, #tpu.memory_space<vmem>>, vector<1x128xf32>
    %85 = vector.broadcast %84 : vector<1x128xf32> to vector<16x128xf32>
    %86 = arith.addf %83, %85 : vector<16x128xf32>
    %87 = arith.addf %1, %86 : vector<16x128xf32>
    %cst_41 = arith.constant dense<0.000000e+00> : vector<16xf32>
    %88 = vector.multi_reduction <add>, %87, %cst_41 [1] : vector<16x128xf32> to vector<16xf32>
    %89 = vector.shape_cast %88 : vector<16xf32> to vector<16x1xf32>
    %cst_42 = arith.constant 1.280000e+02 : f32
    %90 = vector.broadcast %cst_42 : f32 to vector<16x1xf32>
    %91 = arith.divf %89, %90 : vector<16x1xf32>
    %92 = vector.broadcast %91 : vector<16x1xf32> to vector<16x128xf32>
    %93 = arith.subf %87, %92 : vector<16x128xf32>
    %94 = arith.mulf %93, %93 : vector<16x128xf32>
    %cst_43 = arith.constant dense<0.000000e+00> : vector<16xf32>
    %95 = vector.multi_reduction <add>, %94, %cst_43 [1] : vector<16x128xf32> to vector<16xf32>
    %96 = vector.shape_cast %95 : vector<16xf32> to vector<16x1xf32>
    %cst_44 = arith.constant 1.280000e+02 : f32
    %97 = vector.broadcast %cst_44 : f32 to vector<16x1xf32>
    %98 = arith.divf %96, %97 : vector<16x1xf32>
    %99 = vector.broadcast %91 : vector<16x1xf32> to vector<16x128xf32>
    %100 = arith.subf %87, %99 : vector<16x128xf32>
    %cst_45 = arith.constant 9.99999974E-6 : f32
    %101 = vector.broadcast %cst_45 : f32 to vector<16x1xf32>
    %102 = arith.addf %98, %101 : vector<16x1xf32>
    %103 = math.rsqrt %102 : vector<16x1xf32>
    %104 = vector.broadcast %103 : vector<16x1xf32> to vector<16x128xf32>
    %105 = arith.mulf %100, %104 : vector<16x128xf32>
    %c0_46 = arith.constant 0 : index
    %c0_47 = arith.constant 0 : index
    %106 = vector.load %arg11[%c0_46, %c0_47] : memref<1x128xf32, #tpu.memory_space<vmem>>, vector<1x128xf32>
    %107 = vector.broadcast %106 : vector<1x128xf32> to vector<16x128xf32>
    %108 = arith.mulf %105, %107 : vector<16x128xf32>
    %c0_48 = arith.constant 0 : index
    %c0_49 = arith.constant 0 : index
    %109 = vector.load %arg12[%c0_48, %c0_49] : memref<1x128xf32, #tpu.memory_space<vmem>>, vector<1x128xf32>
    %110 = vector.broadcast %109 : vector<1x128xf32> to vector<16x128xf32>
    %111 = arith.addf %108, %110 : vector<16x128xf32>
    %c0_50 = arith.constant 0 : index
    %c0_51 = arith.constant 0 : index
    %c0_52 = arith.constant 0 : index
    %112 = vector.load %arg13[%c0_50, %c0_51, %c0_52] : memref<1x16x128xf32, #tpu.memory_space<vmem>>, vector<1x16x128xf32>
    %113 = vector.shape_cast %112 : vector<1x16x128xf32> to vector<16x128xf32>
    %114 = vector.shape_cast %111 : vector<16x128xf32> to vector<1x16x128xf32>
    tpu.vector_store %arg13[%c0_50, %c0_51, %c0_52], %114 {strides = array<i32>} : memref<1x16x128xf32, #tpu.memory_space<vmem>>, vector<1x16x128xf32>,
    return
  }
  func.func @transform_0(%arg0: i32) -> (i32, i32, i32) {
    %c0_i32 = arith.constant 0 : i32
    %c0_i32_0 = arith.constant 0 : i32
    %c0_i32_1 = arith.constant 0 : i32
    return %arg0, %c0_i32, %c0_i32_0 : i32, i32, i32
  }
  func.func @transform_1(%arg0: i32) -> (i32, i32, i32) {
    %c0_i32 = arith.constant 0 : i32
    %c0_i32_0 = arith.constant 0 : i32
    %c0_i32_1 = arith.constant 0 : i32
    return %arg0, %c0_i32, %c0_i32_0 : i32, i32, i32
  }
  func.func @transform_2(%arg0: i32) -> (i32, i32) {
    %c0_i32 = arith.constant 0 : i32
    %c0_i32_0 = arith.constant 0 : i32
    %c0_i32_1 = arith.constant 0 : i32
    return %c0_i32, %c0_i32_0 : i32, i32
  }
  func.func @transform_3(%arg0: i32) -> (i32, i32) {
    %c0_i32 = arith.constant 0 : i32
    %c0_i32_0 = arith.constant 0 : i32
    %c0_i32_1 = arith.constant 0 : i32
    return %c0_i32, %c0_i32_0 : i32, i32
  }
  func.func @transform_4(%arg0: i32) -> (i32, i32) {
    %c0_i32 = arith.constant 0 : i32
    %c0_i32_0 = arith.constant 0 : i32
    %c0_i32_1 = arith.constant 0 : i32
    return %c0_i32, %c0_i32_0 : i32, i32
  }
  func.func @transform_5(%arg0: i32) -> (i32, i32) {
    %c0_i32 = arith.constant 0 : i32
    %c0_i32_0 = arith.constant 0 : i32
    %c0_i32_1 = arith.constant 0 : i32
    return %c0_i32, %c0_i32_0 : i32, i32
  }
  func.func @transform_6(%arg0: i32) -> (i32, i32) {
    %c0_i32 = arith.constant 0 : i32
    %c0_i32_0 = arith.constant 0 : i32
    %c0_i32_1 = arith.constant 0 : i32
    return %c0_i32, %c0_i32_0 : i32, i32
  }
  func.func @transform_7(%arg0: i32) -> (i32, i32) {
    %c0_i32 = arith.constant 0 : i32
    %c0_i32_0 = arith.constant 0 : i32
    %c0_i32_1 = arith.constant 0 : i32
    return %c0_i32, %c0_i32_0 : i32, i32
  }
  func.func @transform_8(%arg0: i32) -> (i32, i32) {
    %c0_i32 = arith.constant 0 : i32
    %c0_i32_0 = arith.constant 0 : i32
    %c0_i32_1 = arith.constant 0 : i32
    return %c0_i32, %c0_i32_0 : i32, i32
  }
  func.func @transform_9(%arg0: i32) -> (i32, i32) {
    %c0_i32 = arith.constant 0 : i32
    %c0_i32_0 = arith.constant 0 : i32
    %c0_i32_1 = arith.constant 0 : i32
    return %c0_i32, %c0_i32_0 : i32, i32
  }
  func.func @transform_10(%arg0: i32) -> (i32, i32) {
    %c0_i32 = arith.constant 0 : i32
    %c0_i32_0 = arith.constant 0 : i32
    %c0_i32_1 = arith.constant 0 : i32
    return %c0_i32, %c0_i32_0 : i32, i32
  }
  func.func @transform_11(%arg0: i32) -> (i32, i32) {
    %c0_i32 = arith.constant 0 : i32
    %c0_i32_0 = arith.constant 0 : i32
    %c0_i32_1 = arith.constant 0 : i32
    return %c0_i32, %c0_i32_0 : i32, i32
  }
  func.func @transform_12(%arg0: i32) -> (i32, i32, i32) {
    %c0_i32 = arith.constant 0 : i32
    %c0_i32_0 = arith.constant 0 : i32
    %c0_i32_1 = arith.constant 0 : i32
    return %arg0, %c0_i32, %c0_i32_0 : i32, i32, i32
  }
}

module attributes {stable_mosaic.version = 11 : i64} {
  func.func @_attn_block_kernel(%arg0: i32, %arg1: memref<1x16x128xf32, #tpu.memory_space<vmem>>, %arg2: memref<1x16x128xf32, #tpu.memory_space<vmem>>, %arg3: memref<128x128xf32, #tpu.memory_space<vmem>>, %arg4: memref<1x128xf32, #tpu.memory_space<vmem>>, %arg5: memref<128x128xf32, #tpu.memory_space<vmem>>, %arg6: memref<1x128xf32, #tpu.memory_space<vmem>>, %arg7: memref<128x128xf32, #tpu.memory_space<vmem>>, %arg8: memref<1x128xf32, #tpu.memory_space<vmem>>, %arg9: memref<128x128xf32, #tpu.memory_space<vmem>>, %arg10: memref<1x128xf32, #tpu.memory_space<vmem>>, %arg11: memref<1x128xf32, #tpu.memory_space<vmem>>, %arg12: memref<1x128xf32, #tpu.memory_space<vmem>>, %arg13: memref<1x16x128xf32, #tpu.memory_space<vmem>>) attributes {dimension_semantics = [#tpu.dimension_semantics<parallel>], iteration_bounds = array<i64: 2>, scalar_prefetch = 0 : i64, scratch_operands = 0 : i64, tpu.core_type = #tpu.core_type<tc>, window_params = [{transform_indices = @transform_0, window_bounds = array<i64: 1, 16, 128>}, {transform_indices = @transform_1, window_bounds = array<i64: 1, 16, 128>}, {pipeline_mode = #tpu.pipeline_mode<synchronous>, transform_indices = @transform_2, window_bounds = array<i64: 128, 128>}, {pipeline_mode = #tpu.pipeline_mode<synchronous>, transform_indices = @transform_3, window_bounds = array<i64: 1, 128>}, {pipeline_mode = #tpu.pipeline_mode<synchronous>, transform_indices = @transform_4, window_bounds = array<i64: 128, 128>}, {pipeline_mode = #tpu.pipeline_mode<synchronous>, transform_indices = @transform_5, window_bounds = array<i64: 1, 128>}, {pipeline_mode = #tpu.pipeline_mode<synchronous>, transform_indices = @transform_6, window_bounds = array<i64: 128, 128>}, {pipeline_mode = #tpu.pipeline_mode<synchronous>, transform_indices = @transform_7, window_bounds = array<i64: 1, 128>}, {pipeline_mode = #tpu.pipeline_mode<synchronous>, transform_indices = @transform_8, window_bounds = array<i64: 128, 128>}, {pipeline_mode = #tpu.pipeline_mode<synchronous>, transform_indices = @transform_9, window_bounds = array<i64: 1, 128>}, {pipeline_mode = #tpu.pipeline_mode<synchronous>, transform_indices = @transform_10, window_bounds = array<i64: 1, 128>}, {pipeline_mode = #tpu.pipeline_mode<synchronous>, transform_indices = @transform_11, window_bounds = array<i64: 1, 128>}, {transform_indices = @transform_12, window_bounds = array<i64: 1, 16, 128>}]} {
    %c0 = arith.constant 0 : index
    %c0_0 = arith.constant 0 : index
    %c0_1 = arith.constant 0 : index
    %0 = vector.load %arg1[%c0, %c0_0, %c0_1] : memref<1x16x128xf32, #tpu.memory_space<vmem>>, vector<1x16x128xf32>
    %1 = vector.shape_cast %0 : vector<1x16x128xf32> to vector<16x128xf32>
    %c0_2 = arith.constant 0 : index
    %c0_3 = arith.constant 0 : index
    %c0_4 = arith.constant 0 : index
    %2 = vector.load %arg2[%c0_2, %c0_3, %c0_4] : memref<1x16x128xf32, #tpu.memory_space<vmem>>, vector<1x16x128xf32>
    %3 = vector.shape_cast %2 : vector<1x16x128xf32> to vector<16x128xf32>
    %c0_5 = arith.constant 0 : index
    %c0_6 = arith.constant 0 : index
    %4 = vector.load %arg3[%c0_5, %c0_6] : memref<128x128xf32, #tpu.memory_space<vmem>>, vector<128x128xf32>
    %cst = arith.constant dense<0.000000e+00> : vector<16x128xf32>
    %5 = tpu.matmul %1, %4, %cst {dimension_numbers = #tpu.dot_dimension_numbers<[1], [0], [0], [1], [0, 0, 1, 1], [], []>} : vector<16x128xf32>, vector<128x128xf32>, vector<16x128xf32> -> vector<16x128xf32>
    %c0_7 = arith.constant 0 : index
    %c0_8 = arith.constant 0 : index
    %6 = vector.load %arg4[%c0_7, %c0_8] : memref<1x128xf32, #tpu.memory_space<vmem>>, vector<1x128xf32>
    %7 = vector.broadcast %6 : vector<1x128xf32> to vector<16x128xf32>
    %8 = arith.addf %5, %7 : vector<16x128xf32>
    %c0_9 = arith.constant 0 : index
    %c0_10 = arith.constant 0 : index
    %9 = vector.load %arg5[%c0_9, %c0_10] : memref<128x128xf32, #tpu.memory_space<vmem>>, vector<128x128xf32>
    %cst_11 = arith.constant dense<0.000000e+00> : vector<16x128xf32>
    %10 = tpu.matmul %3, %9, %cst_11 {dimension_numbers = #tpu.dot_dimension_numbers<[1], [0], [0], [1], [0, 0, 1, 1], [], []>} : vector<16x128xf32>, vector<128x128xf32>, vector<16x128xf32> -> vector<16x128xf32>
    %c0_12 = arith.constant 0 : index
    %c0_13 = arith.constant 0 : index
    %11 = vector.load %arg6[%c0_12, %c0_13] : memref<1x128xf32, #tpu.memory_space<vmem>>, vector<1x128xf32>
    %12 = vector.broadcast %11 : vector<1x128xf32> to vector<16x128xf32>
    %13 = arith.addf %10, %12 : vector<16x128xf32>
    %c0_14 = arith.constant 0 : index
    %c0_15 = arith.constant 0 : index
    %14 = vector.load %arg7[%c0_14, %c0_15] : memref<128x128xf32, #tpu.memory_space<vmem>>, vector<128x128xf32>
    %cst_16 = arith.constant dense<0.000000e+00> : vector<16x128xf32>
    %15 = tpu.matmul %3, %14, %cst_16 {dimension_numbers = #tpu.dot_dimension_numbers<[1], [0], [0], [1], [0, 0, 1, 1], [], []>} : vector<16x128xf32>, vector<128x128xf32>, vector<16x128xf32> -> vector<16x128xf32>
    %c0_17 = arith.constant 0 : index
    %c0_18 = arith.constant 0 : index
    %16 = vector.load %arg8[%c0_17, %c0_18] : memref<1x128xf32, #tpu.memory_space<vmem>>, vector<1x128xf32>
    %17 = vector.broadcast %16 : vector<1x128xf32> to vector<16x128xf32>
    %18 = arith.addf %15, %17 : vector<16x128xf32>
    %cst_19 = arith.constant 0.176776692 : f32
    %19 = vector.broadcast %cst_19 : f32 to vector<16x128xf32>
    %20 = arith.mulf %8, %19 : vector<16x128xf32>
    %21 = vector.extract_strided_slice %20 {offsets = [0, 0], sizes = [16, 32], strides = [1, 1]} : vector<16x128xf32> to vector<16x32xf32>
    %22 = vector.extract_strided_slice %13 {offsets = [0, 0], sizes = [16, 32], strides = [1, 1]} : vector<16x128xf32> to vector<16x32xf32>
    %23 = vector.extract_strided_slice %18 {offsets = [0, 0], sizes = [16, 32], strides = [1, 1]} : vector<16x128xf32> to vector<16x32xf32>
    %cst_20 = arith.constant dense<0.000000e+00> : vector<16x16xf32>
    %24 = tpu.matmul %21, %22, %cst_20 {dimension_numbers = #tpu.dot_dimension_numbers<[1], [1], [0], [0], [0, 0, 1, 0], [], []>} : vector<16x32xf32>, vector<16x32xf32>, vector<16x16xf32> -> vector<16x16xf32>
    %25 = tpu.iota {dimensions = array<i32: 0>} : vector<16x16xi32>
    %26 = tpu.iota {dimensions = array<i32: 1>} : vector<16x16xi32>
    %27 = arith.cmpi sle, %26, %25 : vector<16x16xi32>
    %cst_21 = arith.constant -1.000000e+30 : f32
    %28 = vector.broadcast %cst_21 : f32 to vector<16x16xf32>
    %29 = arith.select %27, %24, %28 : vector<16x16xi1>, vector<16x16xf32>
    %cst_22 = arith.constant dense<0xFF800000> : vector<16xf32>
    %30 = vector.multi_reduction <maximumf>, %29, %cst_22 [1] : vector<16x16xf32> to vector<16xf32>
    %31 = vector.shape_cast %30 : vector<16xf32> to vector<16x1xf32>
    %32 = vector.broadcast %31 : vector<16x1xf32> to vector<16x16xf32>
    %33 = arith.subf %29, %32 : vector<16x16xf32>
    %34 = math.exp %33 : vector<16x16xf32>
    %cst_23 = arith.constant dense<0.000000e+00> : vector<16xf32>
    %35 = vector.multi_reduction <add>, %34, %cst_23 [1] : vector<16x16xf32> to vector<16xf32>
    %36 = vector.shape_cast %35 : vector<16xf32> to vector<16x1xf32>
    %37 = tpu.reciprocal %36 {approx = true} : vector<16x1xf32> -> vector<16x1xf32>
    %38 = vector.broadcast %37 : vector<16x1xf32> to vector<16x16xf32>
    %39 = arith.mulf %34, %38 : vector<16x16xf32>
    %cst_24 = arith.constant dense<0.000000e+00> : vector<16x32xf32>
    %40 = tpu.matmul %39, %23, %cst_24 {dimension_numbers = #tpu.dot_dimension_numbers<[1], [0], [0], [1], [0, 0, 1, 1], [], []>} : vector<16x16xf32>, vector<16x32xf32>, vector<16x32xf32> -> vector<16x32xf32>
    %41 = vector.extract_strided_slice %20 {offsets = [0, 32], sizes = [16, 32], strides = [1, 1]} : vector<16x128xf32> to vector<16x32xf32>
    %42 = vector.extract_strided_slice %13 {offsets = [0, 32], sizes = [16, 32], strides = [1, 1]} : vector<16x128xf32> to vector<16x32xf32>
    %43 = vector.extract_strided_slice %18 {offsets = [0, 32], sizes = [16, 32], strides = [1, 1]} : vector<16x128xf32> to vector<16x32xf32>
    %cst_25 = arith.constant dense<0.000000e+00> : vector<16x16xf32>
    %44 = tpu.matmul %41, %42, %cst_25 {dimension_numbers = #tpu.dot_dimension_numbers<[1], [1], [0], [0], [0, 0, 1, 0], [], []>} : vector<16x32xf32>, vector<16x32xf32>, vector<16x16xf32> -> vector<16x16xf32>
    %45 = tpu.iota {dimensions = array<i32: 0>} : vector<16x16xi32>
    %46 = tpu.iota {dimensions = array<i32: 1>} : vector<16x16xi32>
    %47 = arith.cmpi sle, %46, %45 : vector<16x16xi32>
    %cst_26 = arith.constant -1.000000e+30 : f32
    %48 = vector.broadcast %cst_26 : f32 to vector<16x16xf32>
    %49 = arith.select %47, %44, %48 : vector<16x16xi1>, vector<16x16xf32>
    %cst_27 = arith.constant dense<0xFF800000> : vector<16xf32>
    %50 = vector.multi_reduction <maximumf>, %49, %cst_27 [1] : vector<16x16xf32> to vector<16xf32>
    %51 = vector.shape_cast %50 : vector<16xf32> to vector<16x1xf32>
    %52 = vector.broadcast %51 : vector<16x1xf32> to vector<16x16xf32>
    %53 = arith.subf %49, %52 : vector<16x16xf32>
    %54 = math.exp %53 : vector<16x16xf32>
    %cst_28 = arith.constant dense<0.000000e+00> : vector<16xf32>
    %55 = vector.multi_reduction <add>, %54, %cst_28 [1] : vector<16x16xf32> to vector<16xf32>
    %56 = vector.shape_cast %55 : vector<16xf32> to vector<16x1xf32>
    %57 = tpu.reciprocal %56 {approx = true} : vector<16x1xf32> -> vector<16x1xf32>
    %58 = vector.broadcast %57 : vector<16x1xf32> to vector<16x16xf32>
    %59 = arith.mulf %54, %58 : vector<16x16xf32>
    %cst_29 = arith.constant dense<0.000000e+00> : vector<16x32xf32>
    %60 = tpu.matmul %59, %43, %cst_29 {dimension_numbers = #tpu.dot_dimension_numbers<[1], [0], [0], [1], [0, 0, 1, 1], [], []>} : vector<16x16xf32>, vector<16x32xf32>, vector<16x32xf32> -> vector<16x32xf32>
    %61 = vector.extract_strided_slice %20 {offsets = [0, 64], sizes = [16, 32], strides = [1, 1]} : vector<16x128xf32> to vector<16x32xf32>
    %62 = vector.extract_strided_slice %13 {offsets = [0, 64], sizes = [16, 32], strides = [1, 1]} : vector<16x128xf32> to vector<16x32xf32>
    %63 = vector.extract_strided_slice %18 {offsets = [0, 64], sizes = [16, 32], strides = [1, 1]} : vector<16x128xf32> to vector<16x32xf32>
    %cst_30 = arith.constant dense<0.000000e+00> : vector<16x16xf32>
    %64 = tpu.matmul %61, %62, %cst_30 {dimension_numbers = #tpu.dot_dimension_numbers<[1], [1], [0], [0], [0, 0, 1, 0], [], []>} : vector<16x32xf32>, vector<16x32xf32>, vector<16x16xf32> -> vector<16x16xf32>
    %65 = tpu.iota {dimensions = array<i32: 0>} : vector<16x16xi32>
    %66 = tpu.iota {dimensions = array<i32: 1>} : vector<16x16xi32>
    %67 = arith.cmpi sle, %66, %65 : vector<16x16xi32>
    %cst_31 = arith.constant -1.000000e+30 : f32
    %68 = vector.broadcast %cst_31 : f32 to vector<16x16xf32>
    %69 = arith.select %67, %64, %68 : vector<16x16xi1>, vector<16x16xf32>
    %cst_32 = arith.constant dense<0xFF800000> : vector<16xf32>
    %70 = vector.multi_reduction <maximumf>, %69, %cst_32 [1] : vector<16x16xf32> to vector<16xf32>
    %71 = vector.shape_cast %70 : vector<16xf32> to vector<16x1xf32>
    %72 = vector.broadcast %71 : vector<16x1xf32> to vector<16x16xf32>
    %73 = arith.subf %69, %72 : vector<16x16xf32>
    %74 = math.exp %73 : vector<16x16xf32>
    %cst_33 = arith.constant dense<0.000000e+00> : vector<16xf32>
    %75 = vector.multi_reduction <add>, %74, %cst_33 [1] : vector<16x16xf32> to vector<16xf32>
    %76 = vector.shape_cast %75 : vector<16xf32> to vector<16x1xf32>
    %77 = tpu.reciprocal %76 {approx = true} : vector<16x1xf32> -> vector<16x1xf32>
    %78 = vector.broadcast %77 : vector<16x1xf32> to vector<16x16xf32>
    %79 = arith.mulf %74, %78 : vector<16x16xf32>
    %cst_34 = arith.constant dense<0.000000e+00> : vector<16x32xf32>
    %80 = tpu.matmul %79, %63, %cst_34 {dimension_numbers = #tpu.dot_dimension_numbers<[1], [0], [0], [1], [0, 0, 1, 1], [], []>} : vector<16x16xf32>, vector<16x32xf32>, vector<16x32xf32> -> vector<16x32xf32>
    %81 = vector.extract_strided_slice %20 {offsets = [0, 96], sizes = [16, 32], strides = [1, 1]} : vector<16x128xf32> to vector<16x32xf32>
    %82 = vector.extract_strided_slice %13 {offsets = [0, 96], sizes = [16, 32], strides = [1, 1]} : vector<16x128xf32> to vector<16x32xf32>
    %83 = vector.extract_strided_slice %18 {offsets = [0, 96], sizes = [16, 32], strides = [1, 1]} : vector<16x128xf32> to vector<16x32xf32>
    %cst_35 = arith.constant dense<0.000000e+00> : vector<16x16xf32>
    %84 = tpu.matmul %81, %82, %cst_35 {dimension_numbers = #tpu.dot_dimension_numbers<[1], [1], [0], [0], [0, 0, 1, 0], [], []>} : vector<16x32xf32>, vector<16x32xf32>, vector<16x16xf32> -> vector<16x16xf32>
    %85 = tpu.iota {dimensions = array<i32: 0>} : vector<16x16xi32>
    %86 = tpu.iota {dimensions = array<i32: 1>} : vector<16x16xi32>
    %87 = arith.cmpi sle, %86, %85 : vector<16x16xi32>
    %cst_36 = arith.constant -1.000000e+30 : f32
    %88 = vector.broadcast %cst_36 : f32 to vector<16x16xf32>
    %89 = arith.select %87, %84, %88 : vector<16x16xi1>, vector<16x16xf32>
    %cst_37 = arith.constant dense<0xFF800000> : vector<16xf32>
    %90 = vector.multi_reduction <maximumf>, %89, %cst_37 [1] : vector<16x16xf32> to vector<16xf32>
    %91 = vector.shape_cast %90 : vector<16xf32> to vector<16x1xf32>
    %92 = vector.broadcast %91 : vector<16x1xf32> to vector<16x16xf32>
    %93 = arith.subf %89, %92 : vector<16x16xf32>
    %94 = math.exp %93 : vector<16x16xf32>
    %cst_38 = arith.constant dense<0.000000e+00> : vector<16xf32>
    %95 = vector.multi_reduction <add>, %94, %cst_38 [1] : vector<16x16xf32> to vector<16xf32>
    %96 = vector.shape_cast %95 : vector<16xf32> to vector<16x1xf32>
    %97 = tpu.reciprocal %96 {approx = true} : vector<16x1xf32> -> vector<16x1xf32>
    %98 = vector.broadcast %97 : vector<16x1xf32> to vector<16x16xf32>
    %99 = arith.mulf %94, %98 : vector<16x16xf32>
    %cst_39 = arith.constant dense<0.000000e+00> : vector<16x32xf32>
    %100 = tpu.matmul %99, %83, %cst_39 {dimension_numbers = #tpu.dot_dimension_numbers<[1], [0], [0], [1], [0, 0, 1, 1], [], []>} : vector<16x16xf32>, vector<16x32xf32>, vector<16x32xf32> -> vector<16x32xf32>
    %101 = tpu.concatenate %40, %60, %80, %100 in 1 : vector<16x32xf32>, vector<16x32xf32>, vector<16x32xf32>, vector<16x32xf32> -> vector<16x128xf32>
    %c0_40 = arith.constant 0 : index
    %c0_41 = arith.constant 0 : index
    %102 = vector.load %arg9[%c0_40, %c0_41] : memref<128x128xf32, #tpu.memory_space<vmem>>, vector<128x128xf32>
    %cst_42 = arith.constant dense<0.000000e+00> : vector<16x128xf32>
    %103 = tpu.matmul %101, %102, %cst_42 {dimension_numbers = #tpu.dot_dimension_numbers<[1], [0], [0], [1], [0, 0, 1, 1], [], []>} : vector<16x128xf32>, vector<128x128xf32>, vector<16x128xf32> -> vector<16x128xf32>
    %c0_43 = arith.constant 0 : index
    %c0_44 = arith.constant 0 : index
    %104 = vector.load %arg10[%c0_43, %c0_44] : memref<1x128xf32, #tpu.memory_space<vmem>>, vector<1x128xf32>
    %105 = vector.broadcast %104 : vector<1x128xf32> to vector<16x128xf32>
    %106 = arith.addf %103, %105 : vector<16x128xf32>
    %107 = arith.addf %1, %106 : vector<16x128xf32>
    %cst_45 = arith.constant dense<0.000000e+00> : vector<16xf32>
    %108 = vector.multi_reduction <add>, %107, %cst_45 [1] : vector<16x128xf32> to vector<16xf32>
    %109 = vector.shape_cast %108 : vector<16xf32> to vector<16x1xf32>
    %cst_46 = arith.constant 1.280000e+02 : f32
    %110 = vector.broadcast %cst_46 : f32 to vector<16x1xf32>
    %111 = arith.divf %109, %110 : vector<16x1xf32>
    %112 = vector.broadcast %111 : vector<16x1xf32> to vector<16x128xf32>
    %113 = arith.subf %107, %112 : vector<16x128xf32>
    %114 = arith.mulf %113, %113 : vector<16x128xf32>
    %cst_47 = arith.constant dense<0.000000e+00> : vector<16xf32>
    %115 = vector.multi_reduction <add>, %114, %cst_47 [1] : vector<16x128xf32> to vector<16xf32>
    %116 = vector.shape_cast %115 : vector<16xf32> to vector<16x1xf32>
    %cst_48 = arith.constant 1.280000e+02 : f32
    %117 = vector.broadcast %cst_48 : f32 to vector<16x1xf32>
    %118 = arith.divf %116, %117 : vector<16x1xf32>
    %119 = vector.broadcast %111 : vector<16x1xf32> to vector<16x128xf32>
    %120 = arith.subf %107, %119 : vector<16x128xf32>
    %cst_49 = arith.constant 9.99999974E-6 : f32
    %121 = vector.broadcast %cst_49 : f32 to vector<16x1xf32>
    %122 = arith.addf %118, %121 : vector<16x1xf32>
    %123 = math.rsqrt %122 : vector<16x1xf32>
    %124 = vector.broadcast %123 : vector<16x1xf32> to vector<16x128xf32>
    %125 = arith.mulf %120, %124 : vector<16x128xf32>
    %c0_50 = arith.constant 0 : index
    %c0_51 = arith.constant 0 : index
    %126 = vector.load %arg11[%c0_50, %c0_51] : memref<1x128xf32, #tpu.memory_space<vmem>>, vector<1x128xf32>
    %127 = vector.broadcast %126 : vector<1x128xf32> to vector<16x128xf32>
    %128 = arith.mulf %125, %127 : vector<16x128xf32>
    %c0_52 = arith.constant 0 : index
    %c0_53 = arith.constant 0 : index
    %129 = vector.load %arg12[%c0_52, %c0_53] : memref<1x128xf32, #tpu.memory_space<vmem>>, vector<1x128xf32>
    %130 = vector.broadcast %129 : vector<1x128xf32> to vector<16x128xf32>
    %131 = arith.addf %128, %130 : vector<16x128xf32>
    %c0_54 = arith.constant 0 : index
    %c0_55 = arith.constant 0 : index
    %c0_56 = arith.constant 0 : index
    %132 = vector.load %arg13[%c0_54, %c0_55, %c0_56] : memref<1x16x128xf32, #tpu.memory_space<vmem>>, vector<1x16x128xf32>
    %133 = vector.shape_cast %132 : vector<1x16x128xf32> to vector<16x128xf32>
    %134 = vector.shape_cast %131 : vector<16x128xf32> to vector<1x16x128xf32>
    tpu.vector_store %arg13[%c0_54, %c0_55, %c0_56], %134 {strides = array<i32>} : memref<1x16x128xf32, #tpu.memory_space<vmem>>, vector<1x16x128xf32>,
    return
  }
  func.func @transform_0(%arg0: i32) -> (i32, i32, i32) {
    %c0_i32 = arith.constant 0 : i32
    %c0_i32_0 = arith.constant 0 : i32
    %c0_i32_1 = arith.constant 0 : i32
    return %arg0, %c0_i32, %c0_i32_0 : i32, i32, i32
  }
  func.func @transform_1(%arg0: i32) -> (i32, i32, i32) {
    %c0_i32 = arith.constant 0 : i32
    %c0_i32_0 = arith.constant 0 : i32
    %c0_i32_1 = arith.constant 0 : i32
    return %arg0, %c0_i32, %c0_i32_0 : i32, i32, i32
  }
  func.func @transform_2(%arg0: i32) -> (i32, i32) {
    %c0_i32 = arith.constant 0 : i32
    %c0_i32_0 = arith.constant 0 : i32
    %c0_i32_1 = arith.constant 0 : i32
    return %c0_i32, %c0_i32_0 : i32, i32
  }
  func.func @transform_3(%arg0: i32) -> (i32, i32) {
    %c0_i32 = arith.constant 0 : i32
    %c0_i32_0 = arith.constant 0 : i32
    %c0_i32_1 = arith.constant 0 : i32
    return %c0_i32, %c0_i32_0 : i32, i32
  }
  func.func @transform_4(%arg0: i32) -> (i32, i32) {
    %c0_i32 = arith.constant 0 : i32
    %c0_i32_0 = arith.constant 0 : i32
    %c0_i32_1 = arith.constant 0 : i32
    return %c0_i32, %c0_i32_0 : i32, i32
  }
  func.func @transform_5(%arg0: i32) -> (i32, i32) {
    %c0_i32 = arith.constant 0 : i32
    %c0_i32_0 = arith.constant 0 : i32
    %c0_i32_1 = arith.constant 0 : i32
    return %c0_i32, %c0_i32_0 : i32, i32
  }
  func.func @transform_6(%arg0: i32) -> (i32, i32) {
    %c0_i32 = arith.constant 0 : i32
    %c0_i32_0 = arith.constant 0 : i32
    %c0_i32_1 = arith.constant 0 : i32
    return %c0_i32, %c0_i32_0 : i32, i32
  }
  func.func @transform_7(%arg0: i32) -> (i32, i32) {
    %c0_i32 = arith.constant 0 : i32
    %c0_i32_0 = arith.constant 0 : i32
    %c0_i32_1 = arith.constant 0 : i32
    return %c0_i32, %c0_i32_0 : i32, i32
  }
  func.func @transform_8(%arg0: i32) -> (i32, i32) {
    %c0_i32 = arith.constant 0 : i32
    %c0_i32_0 = arith.constant 0 : i32
    %c0_i32_1 = arith.constant 0 : i32
    return %c0_i32, %c0_i32_0 : i32, i32
  }
  func.func @transform_9(%arg0: i32) -> (i32, i32) {
    %c0_i32 = arith.constant 0 : i32
    %c0_i32_0 = arith.constant 0 : i32
    %c0_i32_1 = arith.constant 0 : i32
    return %c0_i32, %c0_i32_0 : i32, i32
  }
  func.func @transform_10(%arg0: i32) -> (i32, i32) {
    %c0_i32 = arith.constant 0 : i32
    %c0_i32_0 = arith.constant 0 : i32
    %c0_i32_1 = arith.constant 0 : i32
    return %c0_i32, %c0_i32_0 : i32, i32
  }
  func.func @transform_11(%arg0: i32) -> (i32, i32) {
    %c0_i32 = arith.constant 0 : i32
    %c0_i32_0 = arith.constant 0 : i32
    %c0_i32_1 = arith.constant 0 : i32
    return %c0_i32, %c0_i32_0 : i32, i32
  }
  func.func @transform_12(%arg0: i32) -> (i32, i32, i32) {
    %c0_i32 = arith.constant 0 : i32
    %c0_i32_0 = arith.constant 0 : i32
    %c0_i32_1 = arith.constant 0 : i32
    return %arg0, %c0_i32, %c0_i32_0 : i32, i32, i32
  }
}

module attributes {stable_mosaic.version = 11 : i64} {
  func.func @_ffn_block_kernel(%arg0: i32, %arg1: memref<32x128xf32, #tpu.memory_space<vmem>>, %arg2: memref<128x512xf32, #tpu.memory_space<vmem>>, %arg3: memref<1x512xf32, #tpu.memory_space<vmem>>, %arg4: memref<512x128xf32, #tpu.memory_space<vmem>>, %arg5: memref<1x128xf32, #tpu.memory_space<vmem>>, %arg6: memref<1x128xf32, #tpu.memory_space<vmem>>, %arg7: memref<1x128xf32, #tpu.memory_space<vmem>>, %arg8: memref<32x128xf32, #tpu.memory_space<vmem>>) attributes {dimension_semantics = [#tpu.dimension_semantics<parallel>], iteration_bounds = array<i64: 1>, scalar_prefetch = 0 : i64, scratch_operands = 0 : i64, tpu.core_type = #tpu.core_type<tc>, window_params = [{transform_indices = @transform_0, window_bounds = array<i64: 32, 128>}, {pipeline_mode = #tpu.pipeline_mode<synchronous>, transform_indices = @transform_1, window_bounds = array<i64: 128, 512>}, {pipeline_mode = #tpu.pipeline_mode<synchronous>, transform_indices = @transform_2, window_bounds = array<i64: 1, 512>}, {pipeline_mode = #tpu.pipeline_mode<synchronous>, transform_indices = @transform_3, window_bounds = array<i64: 512, 128>}, {pipeline_mode = #tpu.pipeline_mode<synchronous>, transform_indices = @transform_4, window_bounds = array<i64: 1, 128>}, {pipeline_mode = #tpu.pipeline_mode<synchronous>, transform_indices = @transform_5, window_bounds = array<i64: 1, 128>}, {pipeline_mode = #tpu.pipeline_mode<synchronous>, transform_indices = @transform_6, window_bounds = array<i64: 1, 128>}, {transform_indices = @transform_7, window_bounds = array<i64: 32, 128>}]} {
    %c0 = arith.constant 0 : index
    %c0_0 = arith.constant 0 : index
    %0 = vector.load %arg1[%c0, %c0_0] : memref<32x128xf32, #tpu.memory_space<vmem>>, vector<32x128xf32>
    %c0_1 = arith.constant 0 : index
    %c0_2 = arith.constant 0 : index
    %1 = vector.load %arg2[%c0_1, %c0_2] : memref<128x512xf32, #tpu.memory_space<vmem>>, vector<128x512xf32>
    %cst = arith.constant dense<0.000000e+00> : vector<32x512xf32>
    %2 = tpu.matmul %0, %1, %cst {dimension_numbers = #tpu.dot_dimension_numbers<[1], [0], [0], [1], [0, 0, 1, 1], [], []>} : vector<32x128xf32>, vector<128x512xf32>, vector<32x512xf32> -> vector<32x512xf32>
    %c0_3 = arith.constant 0 : index
    %c0_4 = arith.constant 0 : index
    %3 = vector.load %arg3[%c0_3, %c0_4] : memref<1x512xf32, #tpu.memory_space<vmem>>, vector<1x512xf32>
    %4 = vector.broadcast %3 : vector<1x512xf32> to vector<32x512xf32>
    %5 = arith.addf %2, %4 : vector<32x512xf32>
    %cst_5 = arith.constant 0.000000e+00 : f32
    %6 = vector.broadcast %cst_5 : f32 to vector<32x512xf32>
    %7 = arith.maximumf %5, %6 : vector<32x512xf32>
    %c0_6 = arith.constant 0 : index
    %c0_7 = arith.constant 0 : index
    %8 = vector.load %arg4[%c0_6, %c0_7] : memref<512x128xf32, #tpu.memory_space<vmem>>, vector<512x128xf32>
    %cst_8 = arith.constant dense<0.000000e+00> : vector<32x128xf32>
    %9 = tpu.matmul %7, %8, %cst_8 {dimension_numbers = #tpu.dot_dimension_numbers<[1], [0], [0], [1], [0, 0, 1, 1], [], []>} : vector<32x512xf32>, vector<512x128xf32>, vector<32x128xf32> -> vector<32x128xf32>
    %c0_9 = arith.constant 0 : index
    %c0_10 = arith.constant 0 : index
    %10 = vector.load %arg5[%c0_9, %c0_10] : memref<1x128xf32, #tpu.memory_space<vmem>>, vector<1x128xf32>
    %11 = vector.broadcast %10 : vector<1x128xf32> to vector<32x128xf32>
    %12 = arith.addf %9, %11 : vector<32x128xf32>
    %13 = arith.addf %0, %12 : vector<32x128xf32>
    %cst_11 = arith.constant dense<0.000000e+00> : vector<32xf32>
    %14 = vector.multi_reduction <add>, %13, %cst_11 [1] : vector<32x128xf32> to vector<32xf32>
    %15 = vector.shape_cast %14 : vector<32xf32> to vector<32x1xf32>
    %cst_12 = arith.constant 1.280000e+02 : f32
    %16 = vector.broadcast %cst_12 : f32 to vector<32x1xf32>
    %17 = arith.divf %15, %16 : vector<32x1xf32>
    %18 = vector.broadcast %17 : vector<32x1xf32> to vector<32x128xf32>
    %19 = arith.subf %13, %18 : vector<32x128xf32>
    %20 = arith.mulf %19, %19 : vector<32x128xf32>
    %cst_13 = arith.constant dense<0.000000e+00> : vector<32xf32>
    %21 = vector.multi_reduction <add>, %20, %cst_13 [1] : vector<32x128xf32> to vector<32xf32>
    %22 = vector.shape_cast %21 : vector<32xf32> to vector<32x1xf32>
    %cst_14 = arith.constant 1.280000e+02 : f32
    %23 = vector.broadcast %cst_14 : f32 to vector<32x1xf32>
    %24 = arith.divf %22, %23 : vector<32x1xf32>
    %25 = vector.broadcast %17 : vector<32x1xf32> to vector<32x128xf32>
    %26 = arith.subf %13, %25 : vector<32x128xf32>
    %cst_15 = arith.constant 9.99999974E-6 : f32
    %27 = vector.broadcast %cst_15 : f32 to vector<32x1xf32>
    %28 = arith.addf %24, %27 : vector<32x1xf32>
    %29 = math.rsqrt %28 : vector<32x1xf32>
    %30 = vector.broadcast %29 : vector<32x1xf32> to vector<32x128xf32>
    %31 = arith.mulf %26, %30 : vector<32x128xf32>
    %c0_16 = arith.constant 0 : index
    %c0_17 = arith.constant 0 : index
    %32 = vector.load %arg6[%c0_16, %c0_17] : memref<1x128xf32, #tpu.memory_space<vmem>>, vector<1x128xf32>
    %33 = vector.broadcast %32 : vector<1x128xf32> to vector<32x128xf32>
    %34 = arith.mulf %31, %33 : vector<32x128xf32>
    %c0_18 = arith.constant 0 : index
    %c0_19 = arith.constant 0 : index
    %35 = vector.load %arg7[%c0_18, %c0_19] : memref<1x128xf32, #tpu.memory_space<vmem>>, vector<1x128xf32>
    %36 = vector.broadcast %35 : vector<1x128xf32> to vector<32x128xf32>
    %37 = arith.addf %34, %36 : vector<32x128xf32>
    %c0_20 = arith.constant 0 : index
    %c0_21 = arith.constant 0 : index
    %38 = vector.load %arg8[%c0_20, %c0_21] : memref<32x128xf32, #tpu.memory_space<vmem>>, vector<32x128xf32>
    tpu.vector_store %arg8[%c0_20, %c0_21], %37 {strides = array<i32>} : memref<32x128xf32, #tpu.memory_space<vmem>>, vector<32x128xf32>,
    return
  }
  func.func @transform_0(%arg0: i32) -> (i32, i32) {
    %c0_i32 = arith.constant 0 : i32
    %c0_i32_0 = arith.constant 0 : i32
    return %arg0, %c0_i32 : i32, i32
  }
  func.func @transform_1(%arg0: i32) -> (i32, i32) {
    %c0_i32 = arith.constant 0 : i32
    %c0_i32_0 = arith.constant 0 : i32
    %c0_i32_1 = arith.constant 0 : i32
    return %c0_i32, %c0_i32_0 : i32, i32
  }
  func.func @transform_2(%arg0: i32) -> (i32, i32) {
    %c0_i32 = arith.constant 0 : i32
    %c0_i32_0 = arith.constant 0 : i32
    %c0_i32_1 = arith.constant 0 : i32
    return %c0_i32, %c0_i32_0 : i32, i32
  }
  func.func @transform_3(%arg0: i32) -> (i32, i32) {
    %c0_i32 = arith.constant 0 : i32
    %c0_i32_0 = arith.constant 0 : i32
    %c0_i32_1 = arith.constant 0 : i32
    return %c0_i32, %c0_i32_0 : i32, i32
  }
  func.func @transform_4(%arg0: i32) -> (i32, i32) {
    %c0_i32 = arith.constant 0 : i32
    %c0_i32_0 = arith.constant 0 : i32
    %c0_i32_1 = arith.constant 0 : i32
    return %c0_i32, %c0_i32_0 : i32, i32
  }
  func.func @transform_5(%arg0: i32) -> (i32, i32) {
    %c0_i32 = arith.constant 0 : i32
    %c0_i32_0 = arith.constant 0 : i32
    %c0_i32_1 = arith.constant 0 : i32
    return %c0_i32, %c0_i32_0 : i32, i32
  }
  func.func @transform_6(%arg0: i32) -> (i32, i32) {
    %c0_i32 = arith.constant 0 : i32
    %c0_i32_0 = arith.constant 0 : i32
    %c0_i32_1 = arith.constant 0 : i32
    return %c0_i32, %c0_i32_0 : i32, i32
  }
  func.func @transform_7(%arg0: i32) -> (i32, i32) {
    %c0_i32 = arith.constant 0 : i32
    %c0_i32_0 = arith.constant 0 : i32
    return %arg0, %c0_i32 : i32, i32
  }
}

</mosaic_0001>

<bundles_post_ra>
// kernel: transformer_forward.12
= control target key start
LH: loop header
LB: loop body
LE: loop exit
PB: predicated region body
PF: predicated region fallthrough
CT: control target
= control target key end

     0   :  { %s2452_s21 = smov 0   ;;  %s2815_s0 = inlined_call_operand.vmem [shape: f32[2,16,128], index: 0, kind: input, shape index: {}, may-alias: {0,1}]   ;;  %s2816_s1 = inlined_call_operand.vmem [shape: f32[2,16,128], index: 1, kind: input, shape index: {}, may-alias: {0,1}]   ;;  %s2817_s2 = inlined_call_operand.vmem [shape: f32[128,128], index: 2, kind: input, shape index: {}]   ;;  %s2818_s3 = inlined_call_operand.vmem [shape: f32[1,128], index: 3, kind: input, shape index: {}]   ;;  %s2819_s4 = inlined_call_operand.vmem [shape: f32[128,128], index: 4, kind: input, shape index: {}]   ;;  %s2820_s5 = inlined_call_operand.vmem [shape: f32[1,128], index: 5, kind: input, shape index: {}]   ;;  %s2821_s6 = inlined_call_operand.vmem [shape: f32[128,128], index: 6, kind: input, shape index: {}]   ;;  %s2822_s7 = inlined_call_operand.vmem [shape: f32[1,128], index: 7, kind: input, shape index: {}]   ;;  %s2823_s8 = inlined_call_operand.vmem [shape: f32[128,128], index: 8, kind: input, shape index: {}]   ;;  %s2824_s9 = inlined_call_operand.vmem [shape: f32[1,128], index: 9, kind: input, shape index: {}]   ;;  %s2825_s10 = inlined_call_operand.vmem [shape: f32[1,128], index: 10, kind: input, shape index: {}]   ;;  %s2826_s11 = inlined_call_operand.vmem [shape: f32[1,128], index: 11, kind: input, shape index: {}]   ;;  %s2827_s12 = inlined_call_operand.vmem [shape: f32[2,16,128], index: 12, kind: output, shape index: {}]  }
   0x1 LB: > { %s1770_s22 = sadd.s32 4294967295, %s2382_s21   ;;  %p1774_p0 = scmp.ge.s32.totalorder %s2382_s21, 1  ;;  %s2382_s21 = sphi %s2452_s21, %s22_s21  }
   0x2   : > { %p372_p1 = scmp.lt.s32.totalorder %s2382_s21, 3 }
   0x4   : > { %p373_p2 = pnand %p1774_p0, %p372_p1 }
   0x5   : > { %v536_v0 = vld [vmem:[%s2819_s4] sm:$0xff] (!%p373_p2)  ;;  %v537_v1 = vld [vmem:[%s2819_s4 + $0x8] sm:$0xff] (!%p373_p2)  ;;  %v538_v2 = vld [vmem:[%s2819_s4 + $0x10] sm:$0xff] (!%p373_p2)  ;;  %p419_p3 = scmp.lt.s32.totalorder (!%p373_p2), %s1770_s22, 1  ;;  %vm734_vm0 = vcmask (!%p373_p2), 261120   ;;  %s2384_s23 = smov (!%p373_p2), 96  }
   0x6   : > { %376 = sbr.rel (%p373_p2) target bundleno = 3285 (0xcd5), region = 68  ;;  %v2148_v3 = vpack.c.bf16 (!%p373_p2), %v537_v1, %v536_v0  ;;  %v539_v4 = vld [vmem:[%s2819_s4 + $0x18] sm:$0xff] (!%p373_p2)  ;;  %v438_v5 = vld [vmem:[%s2817_s2] sm:$0xff] (!%p373_p2)  ;;  %v439_v6 = vld [vmem:[%s2817_s2 + $0x8] sm:$0xff] (!%p373_p2)  ;;  %vm822_vm2 = vcmask (!%p373_p2), 130048   ;;  %s2386_s24 = smov (!%p373_p2), 32  }
   0x7   : > { %v2152_v7 = vpack.c.bf16 (!%p373_p2), %v539_v4, %v538_v2  ;;  %v2116_v8 = vpack.c.bf16 (!%p373_p2), %v439_v6, %v438_v5  ;;  %v540_v9 = vld [vmem:[%s2819_s4 + $0x20] sm:$0xff] (!%p373_p2)  ;;  %v541_v10 = vld [vmem:[%s2819_s4 + $0x28] sm:$0xff] (!%p373_p2)  ;;  %v440_v11 = vld [vmem:[%s2817_s2 + $0x10] sm:$0xff] (!%p373_p2)  ;;  %vm1554_vm3 = vcmask (!%p373_p2), 523264   ;;  %vm1557_vm4 = vcmask (!%p373_p2), 785408  }
   0x8   : > { %2149 = vmatprep.subr.bf16.mxu1 (!%p373_p2), %v2148_v3  ;;  %v441_v12 = vld [vmem:[%s2817_s2 + $0x18] sm:$0xff] (!%p373_p2)  ;;  %v442_v14 = vld [vmem:[%s2817_s2 + $0x20] sm:$0xff] (!%p373_p2)  ;;  %v443_v15 = vld [vmem:[%s2817_s2 + $0x28] sm:$0xff] (!%p373_p2)  ;;  %v2156_v16 = vpack.c.bf16 (!%p373_p2), %v541_v10, %v540_v9 }
   0x9   : > { %2151 = vmatpush3.bf16.msra.mxu1 (!%p373_p2), %v2148_v3  ;;  %2117 = vmatprep.subr.bf16.mxu0 (!%p373_p2), %v2116_v8  ;;  %v2120_v13 = vpack.c.bf16 (!%p373_p2), %v441_v12, %v440_v11  ;;  %v542_v17 = vld [vmem:[%s2819_s4 + $0x30] sm:$0xff] (!%p373_p2)  ;;  %v543_v18 = vld [vmem:[%s2819_s4 + $0x38] sm:$0xff] (!%p373_p2)  ;;  %v2124_v19 = vpack.c.bf16 (!%p373_p2), %v443_v15, %v442_v14  ;;  %v544_v23 = vld [vmem:[%s2819_s4 + $0x40] sm:$0xff] (!%p373_p2) }
   0xa   : > { %2153 = vmatprep.subr.bf16.mxu1 (!%p373_p2), %v2152_v7  ;;  %2119 = vmatpush3.bf16.msra.mxu0 (!%p373_p2), %v2116_v8  ;;  %v444_v20 = vld [vmem:[%s2817_s2 + $0x30] sm:$0xff] (!%p373_p2)  ;;  %v445_v21 = vld [vmem:[%s2817_s2 + $0x38] sm:$0xff] (!%p373_p2)  ;;  %v2160_v22 = vpack.c.bf16 (!%p373_p2), %v543_v18, %v542_v17  ;;  %v545_v24 = vld [vmem:[%s2819_s4 + $0x48] sm:$0xff] (!%p373_p2) }
   0xb   : > { %2121 = vmatprep.subr.bf16.mxu0 (!%p373_p2), %v2120_v13  ;;  %v2128_v25 = vpack.c.bf16 (!%p373_p2), %v445_v21, %v444_v20  ;;  %v446_v27 = vld [vmem:[%s2817_s2 + $0x40] sm:$0xff] (!%p373_p2)  ;;  %v447_v28 = vld [vmem:[%s2817_s2 + $0x48] sm:$0xff] (!%p373_p2)  ;;  %v2164_v30 = vpack.c.bf16 (!%p373_p2), %v545_v24, %v544_v23  ;;  %v546_v31 = vld [vmem:[%s2819_s4 + $0x50] sm:$0xff] (!%p373_p2) }
   0xc   : > { %v547_v32 = vld [vmem:[%s2819_s4 + $0x58] sm:$0xff] (!%p373_p2)  ;;  %v2132_v33 = vpack.c.bf16 (!%p373_p2), %v447_v28, %v446_v27  ;;  %v448_v34 = vld [vmem:[%s2817_s2 + $0x50] sm:$0xff] (!%p373_p2)  ;;  %v548_v37 = vld [vmem:[%s2819_s4 + $0x60] sm:$0xff] (!%p373_p2) }
   0xd   : > { %s2831_s22 = smov (!%p419_p3, %s1770_s22), 1  ;;  %2155 = vmatpush3.bf16.msra.mxu1 %v2152_v7  ;;  %v449_v35 = vld [vmem:[%s2817_s2 + $0x58] sm:$0xff]  ;;  %v2168_v36 = vpack.c.bf16 %v547_v32, %v546_v31  ;;  %v549_v38 = vld [vmem:[%s2819_s4 + $0x68] sm:$0xff]  ;;  %v450_v40 = vld [vmem:[%s2817_s2 + $0x60] sm:$0xff] }
   0xe   : > { %s2496_s13 = sshll.u32 %s2831_s22, 4  ;;  %2157 = vmatprep.subr.bf16.mxu1 %v2156_v16  ;;  %2123 = vmatpush3.bf16.msra.mxu0 %v2120_v13  ;;  %v2136_v39 = vpack.c.bf16 %v449_v35, %v448_v34  ;;  %v451_v41 = vld [vmem:[%s2817_s2 + $0x68] sm:$0xff]  ;;  %v2172_v42 = vpack.c.bf16 %v549_v38, %v548_v37  ;;  %v550_v43 = vld [vmem:[%s2819_s4 + $0x70] sm:$0xff]  ;;  %v551_v44 = vld [vmem:[%s2819_s4 + $0x78] sm:$0xff] }
   0xf   : > { %s2514_s25 = scalar_lea.vmem %s2816_s1, %s2496_s13  ;;  %s2520_s28 = scalar_lea.vmem %s2815_s0, %s2496_s13  ;;  %2125 = vmatprep.subr.bf16.mxu0 %v2124_v19  ;;  %v2140_v45 = vpack.c.bf16 %v451_v41, %v450_v40  ;;  %v452_v46 = vld [vmem:[%s2817_s2 + $0x70] sm:$0xff]  ;;  %v453_v47 = vld [vmem:[%s2817_s2 + $0x78] sm:$0xff]  ;;  %v2176_v48 = vpack.c.bf16 %v551_v44, %v550_v43  ;;  %v634_v52 = vld [vmem:[%s2821_s6] sm:$0xff] }
  0x10   : > { %v436_v26 = vld [vmem:[%s2514_s25] sm:$0xff]  ;;  %v2144_v49 = vpack.c.bf16 %v453_v47, %v452_v46  ;;  %v2576_v50 = vld [vmem:[%s2514_s25 + $0x8] sm:$0xff]  ;;  %v636_v54 = vld [vmem:[%s2821_s6 + $0x10] sm:$0xff]  ;;  %s433_s19 = scalar_lea.vmem %s2827_s12, %s2496_s13 }
  0x11   : > { %1987 = vmatprep.mubr.f32.mxu1 %v436_v26  ;;  %v2536_v29 = vld [vmem:[%s2520_s28] sm:$0xff]  ;;  %2159 = vmatpush3.bf16.msra.mxu1 %v2156_v16  ;;  %v2579_v51 = vld [vmem:[%s2520_s28 + $0x8] sm:$0xff]  ;;  %v637_v56 = vld [vmem:[%s2821_s6 + $0x18] sm:$0xff]  ;;  %s2385_s28 = smov 64  }
  0x12   : > { %1952 = vmatprep.mubr.f32.mxu0 %v2536_v29  ;;  %2161 = vmatprep.subr.bf16.mxu1 %v2160_v22  ;;  %v635_v53 = vld [vmem:[%s2821_s6 + $0x8] sm:$0xff]  ;;  %v2184_v57 = vpack.c.bf16 %v637_v56, %v636_v54  ;;  %v638_v58 = vld [vmem:[%s2821_s6 + $0x20] sm:$0xff]  ;;  %v640_v62 = vld [vmem:[%s2821_s6 + $0x30] sm:$0xff] }
  0x13   : > { %2127 = vmatpush3.bf16.msra.mxu0 %v2124_v19  ;;  %v2180_v55 = vpack.c.bf16 %v635_v53, %v634_v52  ;;  %v639_v59 = vld [vmem:[%s2821_s6 + $0x28] sm:$0xff]  ;;  %v1782_v60 = vld [vmem:[%s2820_s5] ss:$0 sm:$0xff]  ;;  %v641_v63 = vld [vmem:[%s2821_s6 + $0x38] sm:$0xff] }
  0x14   : > { %2129 = vmatprep.subr.bf16.mxu0 %v2128_v25  ;;  %v2188_v61 = vpack.c.bf16 %v639_v59, %v638_v58  ;;  %v1781_v1 = vld [vmem:[%s2818_s3] ss:$0 sm:$0xff]  ;;  %v2192_v7 = vpack.c.bf16 %v641_v63, %v640_v62  ;;  %vm2615_vm1 = vmpackc.low %vm734_vm0, %vm734_vm0  ;;  %v643_v11 = vld [vmem:[%s2821_s6 + $0x48] sm:$0xff] }
  0x15   : > { %2163 = vmatpush3.bf16.msra.mxu1 %v2160_v22  ;;  %v642_v10 = vld [vmem:[%s2821_s6 + $0x40] sm:$0xff]  ;;  %v644_v16 = vld [vmem:[%s2821_s6 + $0x50] sm:$0xff]  ;;  %v645_v17 = vld [vmem:[%s2821_s6 + $0x58] sm:$0xff] }
  0x16   : > { %2165 = vmatprep.subr.bf16.mxu1 %v2164_v30  ;;  %v2196_v15 = vpack.c.bf16 %v643_v11, %v642_v10  ;;  %v2200_v19 = vpack.c.bf16 %v645_v17, %v644_v16  ;;  %v646_v20 = vld [vmem:[%s2821_s6 + $0x60] sm:$0xff]  ;;  %v647_v21 = vld [vmem:[%s2821_s6 + $0x68] sm:$0xff]  ;;  %v648_v24 = vld [vmem:[%s2821_s6 + $0x70] sm:$0xff] }
  0x17   : > { %2131 = vmatpush3.bf16.msra.mxu0 %v2128_v25  ;;  %v2204_v23 = vpack.c.bf16 %v647_v21, %v646_v20  ;;  %v649_v25 = vld [vmem:[%s2821_s6 + $0x78] sm:$0xff] }
  0x18   : > { %2133 = vmatprep.subr.bf16.mxu0 %v2132_v33 }
  0x19   : > { %2167 = vmatpush3.bf16.msra.mxu1 %v2164_v30 }
  0x1a   : > { %2169 = vmatprep.subr.bf16.mxu1 %v2168_v36 }
  0x1b   : > { %2135 = vmatpush3.bf16.msra.mxu0 %v2132_v33  ;;  %v1783_v33 = vld [vmem:[%s2822_s7] ss:$0 sm:$0xff] }
  0x1c   : > { %2137 = vmatprep.subr.bf16.mxu0 %v2136_v39 }
  0x1d   : > { %2171 = vmatpush3.bf16.msra.mxu1 %v2168_v36 }
  0x1e   : > { %2173 = vmatprep.subr.bf16.mxu1 %v2172_v42 }
  0x1f   : > { %2139 = vmatpush3.bf16.msra.mxu0 %v2136_v39 }
  0x20   : > { %2141 = vmatprep.subr.bf16.mxu0 %v2140_v45 }
  0x21   : > { %2175 = vmatpush3.bf16.msra.mxu1 %v2172_v42 }
  0x22   : > { %2177 = vmatprep.subr.bf16.mxu1 %v2176_v48 }
  0x23   : > { %2143 = vmatpush3.bf16.msra.mxu0 %v2140_v45 }
  0x24   : > { %2145 = vmatprep.subr.bf16.mxu0 %v2144_v49 }
  0x25   : > { %2179 = vmatpush3.bf16.msra.mxu1 %v2176_v48 }
  0x27   : > { %2147 = vmatpush3.bf16.msra.mxu0 %v2144_v49 }
  0x28   : > { %1988 = vmatmul.mubr.f32.vlgmr.msra.gmra.mrb[0].mxu1 %v2576_v50  ;;  %2181 = vmatprep.subr.bf16.mxu0 %v2180_v55 }
  0x2a   : > { %1953 = vmatmul.mubr.f32.vlgmr.msra.gmra.mrb[0].mxu0 %v2579_v51 }
  0x2b   : > { %2022 = vmatprep.mubr.f32.mxu0 %v436_v26  ;;  %2183 = vmatpush3.bf16.msra.mxu0 %v2180_v55  ;;  %v2208_v26 = vpack.c.bf16 %v649_v25, %v648_v24 }
  0x2c   : > { %2185 = vmatprep.subr.bf16.mxu0 %v2184_v57 }
  0x2f   : > { %2187 = vmatpush3.bf16.msra.mxu0 %v2184_v57 }
  0x30   : > { %2189 = vmatprep.subr.bf16.mxu0 %v2188_v61 }
  0x33   : > { %2191 = vmatpush3.bf16.msra.mxu0 %v2188_v61 }
  0x34   : > { %2193 = vmatprep.subr.bf16.mxu0 %v2192_v7 }
  0x37   : > { %2195 = vmatpush3.bf16.msra.mxu0 %v2192_v7 }
  0x38   : > { %2197 = vmatprep.subr.bf16.mxu0 %v2196_v15 }
  0x3b   : > { %2199 = vmatpush3.bf16.msra.mxu0 %v2196_v15 }
  0x3c   : > { %2201 = vmatprep.subr.bf16.mxu0 %v2200_v19 }
  0x3f   : > { %2203 = vmatpush3.bf16.msra.mxu0 %v2200_v19 }
  0x40   : > { %2205 = vmatprep.subr.bf16.mxu0 %v2204_v23 }
  0x43   : > { %2207 = vmatpush3.bf16.msra.mxu0 %v2204_v23 }
  0x44   : > { %2209 = vmatprep.subr.bf16.mxu0 %v2208_v26 }
  0x47   : > { %2211 = vmatpush3.bf16.msra.mxu0 %v2208_v26 }
  0x4a   : > { %2023 = vmatmul.mubr.f32.vlgmr.msra.gmra.mrb[2].mxu0 %v2576_v50 }
  0xfb   : > { %v1989_v0 = vpop.f32.mrb[0].mxu1 }
  0xfc   : > { %v631_v2 = vadd.f32 %v1989_v0, %v1782_v60  ;;  %v625_v3 = vpop.f32.mrb[1].mxu1 }
  0xfd   : > { %v1954_v4 = vpop.f32.mrb[0].mxu0  ;;  %v626_v5 = vadd.f32 %v1782_v60, %v625_v3 }
  0xfe   : > { %v527_v6 = vpop.f32.mrb[1].mxu0  ;;  %v533_v18 = vadd.f32 %v1954_v4, %v1781_v1 }
  0xff   : > { %v528_v9 = vadd.f32 %v1781_v1, %v527_v6  ;;  %v2212_v12 = vpack.c.bf16 %v631_v2, %v626_v5  ;;  %v2625_v13 = vpack.i.bf16 %v631_v2, %v626_v5 }
 0x100   : > { %v2649_v22 = vmul.f32 0.17677669, %v533_v18 }
 0x101   : > { %v2627_v14 = vmul.f32 0.17677669, %v528_v9  ;;  %2214 = vmatprep.subr.msk.bf16.mxu1 %vm2615_vm1, %v2212_v12 }
 0x102   : > { %2217 = vmatpush3.bf16.xpose.msk.msra.mxu1 %vm2615_vm1, %v2212_v12 }
 0x103   : > { %926 = vrot.lane.b32.xlu1 %v2627_v14, %s2384_s23  ;;  %2029 = vmatprep.mubr.msk.f32.mxu1 %vm734_vm0, %v2627_v14 }
 0x109   : > { %2030 = vmatmul.mubr.msk.f32.vlgmr.msra.gmra.mrb[2].mxu1 %vm734_vm0, %v2649_v22 }
 0x11d   : > { %v2024_v32 = vpop.f32.mrb[2].mxu0 }
 0x11e   : > { %v723_v34 = vpop.f32.mrb[3].mxu0  ;;  %v729_v35 = vadd.f32 %v2024_v32, %v1783_v33 }
 0x11f   : > { %v724_v36 = vadd.f32 %v1783_v33, %v723_v34 }
 0x121   : > { %v2218_v37 = vpack.c.bf16 %v729_v35, %v724_v36  ;;  %v2685_v3 = vpack.i.bf16 %v729_v35, %v724_v36 }
 0x123   : > { %2219 = vmatprep.subr.bf16.mxu1 %v2218_v37 }
 0x124   : > { %2221 = vmatpush3.bf16.msra.mxu1 %v2218_v37 }
 0x175   : > { %v927_v53 = vpop.permute.xlu1 %926 }
 0x1dc   : > { %v2031_v27 = vpop.f32.mrb[2].mxu1 }
 0x1dd   : > { %v813_v28 = vpop.f32.mrb[3].mxu1  ;;  %v826_v31 = vsel %vm822_vm2, %v2031_v27, -inf }
 0x1de   : > { %v823_v30 = vsel %vm822_vm2, %v813_v28, -inf }
 0x1df   : > { %824 = vmax.xlane.f32.xlu0 %v823_v30 }
 0x1e3   : > { %827 = vmax.xlane.f32.xlu0 %v826_v31 }
 0x1f9   : > { %2296 = vrot.lane.b32.xlu0 %v2625_v13, %s2384_s23 }
 0x26c   : > { %v825_v38 = vpop.xlane.xlu0 %824 }
 0x26d   : > { %v829_v39 = vsub.f32 %v813_v28, %v825_v38 }
 0x26f   : > { %v831_v42 = vmul.f32 1.442695, %v829_v39 }
 0x270   : > { %v828_v40 = vpop.xlane.xlu0 %827 }
 0x271   : > { %v830_v41 = vsub.f32 %v2031_v27, %v828_v40 }
 0x273   : > { %v833_v43 = vmul.f32 1.442695, %v830_v41 }
 0x274   : > { %v2297_v44 = vpop.permute.xlu0 %2296 }
 0x275   : > { %2340 = vpow2.f32 %v833_v43  ;;  %v2299_v45 = vunpack.i.h.bf16 %v2297_v44  ;;  %v2298_v46 = vunpack.i.l.bf16 %v2297_v44 }
 0x276   : > { %2342 = vpow2.f32 %v831_v42 }
 0x277   : > { %v2222_v47 = vpack.c.bf16 %v2299_v45, %v2298_v46 }
 0x279   : > { %2224 = vmatprep.subr.msk.bf16.mxu1 %vm2615_vm1, %v2222_v47 }
 0x27f   : > { %v2341_v48 = vpop.eup %2340 }
 0x280   : > { %v838_v49 = vsel %vm822_vm2, %v2341_v48, 0.0  ;;  %v2343_v50 = vpop.eup %2342 }
 0x281   : > { %839 = vadd.xlane.f32.xlu1 %v838_v49  ;;  %v835_v52 = vsel %vm822_vm2, %v2343_v50, 0.0 }
 0x285   : > { %836 = vadd.xlane.f32.xlu1 %v835_v52 }
 0x296   : > { %928 = vrot.lane.b32.xlu1 %v2649_v22, %s2384_s23 }
 0x30e   : > { %v840_v54 = vpop.xlane.xlu1 %839 }
 0x30f   : > { %2344 = vrcp.f32 %v840_v54 }
 0x312   : > { %v837_v55 = vpop.xlane.xlu1 %836 }
 0x313   : > { %2346 = vrcp.f32 %v837_v55 }
 0x316   : > { %v929_v60 = vpop.permute.xlu1 %928 }
 0x319   : > { %v2345_v56 = vpop.eup %2344 }
 0x31a   : > { %v844_v59 = vmul.f32 %v2345_v56, %v2341_v48 }
 0x31d   : > { %v2347_v57 = vpop.eup %2346 }
 0x31e   : > { %v843_v58 = vmul.f32 %v2347_v57, %v2343_v50 }
 0x320   : > { %2036 = vmatprep.mubr.msk.f32.mxu1 %vm822_vm2, %v843_v58 }
 0x321   : > { %2037 = vmatmul.mubr.msk.f32.vlgmr.msra.gmra.mrb[4].mxu1 %vm822_vm2, %v844_v59 }
 0x322   : > { %2227 = vmatpush3.bf16.xpose.msk.msra.mxu1 %vm2615_vm1, %v2222_v47  ;;  %2043 = vmatprep.mubr.msk.f32.mxu1 %vm734_vm0, %v927_v53 }
 0x329   : > { %2044 = vmatmul.mubr.msk.f32.vlgmr.msra.gmra.mrb[6].mxu1 %vm734_vm0, %v929_v60 }
 0x3f4   : > { %v2679_v61 = vpop.f32.mrb[4].mxu1 }
 0x3f5   : > { %v2681_v62 = vpop.f32.mrb[5].mxu1 }
 0x3fc   : > { %v2045_v63 = vpop.f32.mrb[6].mxu1 }
 0x3fd   : > { %v1008_v0 = vpop.f32.mrb[7].mxu1  ;;  %v1020_v1 = vsel %vm822_vm2, %v2045_v63, -inf }
 0x3fe   : > { %1021 = vmax.xlane.f32.xlu0 %v1020_v1  ;;  %v1017_v2 = vsel %vm822_vm2, %v1008_v0, -inf }
 0x3ff   : > { %1018 = vmax.xlane.f32.xlu1 %v1017_v2 }
 0x410   : > { %2301 = vrot.lane.b32.xlu1 %v2685_v3, %s2384_s23 }
 0x414   : > { %1128 = vrot.lane.b32.xlu1 %v2627_v14, %s2385_s28 }
 0x418   : > { %1130 = vrot.lane.b32.xlu1 %v2649_v22, %s2385_s28 }
 0x48b   : > { %v1022_v4 = vpop.xlane.xlu0 %1021 }
 0x48c   : > { %v1024_v5 = vsub.f32 %v2045_v63, %v1022_v4  ;;  %v1019_v6 = vpop.xlane.xlu1 %1018 }
 0x48d   : > { %v1023_v7 = vsub.f32 %v1008_v0, %v1019_v6 }
 0x48e   : > { %v1027_v9 = vmul.f32 1.442695, %v1024_v5 }
 0x48f   : > { %v1025_v10 = vmul.f32 1.442695, %v1023_v7 }
 0x490   : > { %2348 = vpow2.f32 %v1027_v9  ;;  %v2302_v11 = vpop.permute.xlu1 %2301 }
 0x491   : > { %v2304_v12 = vunpack.i.h.bf16 %v2302_v11  ;;  %v2303_v15 = vunpack.i.l.bf16 %v2302_v11  ;;  %2350 = vpow2.f32 %v1025_v10 }
 0x493   : > { %v2228_v16 = vpack.c.bf16 %v2304_v12, %v2303_v15 }
 0x494   : > { %v1129_v33 = vpop.permute.xlu1 %1128 }
 0x495   : > { %2229 = vmatprep.subr.bf16.mxu1 %v2228_v16 }
 0x496   : > { %2231 = vmatpush3.bf16.msra.mxu1 %v2228_v16 }
 0x498   : > { %v1131_v34 = vpop.permute.xlu1 %1130 }
 0x49a   : > { %v2349_v17 = vpop.eup %2348 }
 0x49b   : > { %v1032_v18 = vsel %vm822_vm2, %v2349_v17, 0.0  ;;  %v2351_v19 = vpop.eup %2350 }
 0x49c   : > { %1033 = vadd.xlane.f32.xlu0 %v1032_v18  ;;  %v1029_v20 = vsel %vm822_vm2, %v2351_v19, 0.0 }
 0x4a0   : > { %1030 = vadd.xlane.f32.xlu0 %v1029_v20 }
 0x4b6   : > { %2306 = vrot.lane.b32.xlu0 %v2625_v13, %s2385_s28 }
 0x529   : > { %v1034_v21 = vpop.xlane.xlu0 %1033 }
 0x52a   : > { %2352 = vrcp.f32 %v1034_v21 }
 0x52d   : > { %v1031_v23 = vpop.xlane.xlu0 %1030 }
 0x52e   : > { %2354 = vrcp.f32 %v1031_v23 }
 0x531   : > { %v2307_v24 = vpop.permute.xlu0 %2306 }
 0x532   : > { %v2309_v25 = vunpack.i.h.bf16 %v2307_v24  ;;  %v2308_v26 = vunpack.i.l.bf16 %v2307_v24 }
 0x534   : > { %v2232_v27 = vpack.c.bf16 %v2309_v25, %v2308_v26  ;;  %v2353_v28 = vpop.eup %2352 }
 0x535   : > { %v1038_v32 = vmul.f32 %v2353_v28, %v2349_v17 }
 0x536   : > { %2234 = vmatprep.subr.msk.bf16.mxu1 %vm2615_vm1, %v2232_v27 }
 0x538   : > { %v2355_v30 = vpop.eup %2354 }
 0x539   : > { %v1037_v31 = vmul.f32 %v2355_v30, %v2351_v19 }
 0x53b   : > { %2050 = vmatprep.mubr.msk.f32.mxu1 %vm822_vm2, %v1037_v31 }
 0x53c   : > { %2051 = vmatmul.mubr.msk.f32.vlgmr.msra.gmra.mrb[8].mxu1 %vm822_vm2, %v1038_v32 }
 0x53d   : > { %2237 = vmatpush3.bf16.xpose.msk.msra.mxu1 %vm2615_vm1, %v2232_v27  ;;  %2057 = vmatprep.mubr.msk.f32.mxu1 %vm734_vm0, %v1129_v33 }
 0x544   : > { %2058 = vmatmul.mubr.msk.f32.vlgmr.msra.gmra.mrb[10].mxu1 %vm734_vm0, %v1131_v34 }
 0x60f   : > { %v2705_v35 = vpop.f32.mrb[8].mxu1 }
 0x610   : > { %v2707_v36 = vpop.f32.mrb[9].mxu1 }
 0x611   : > { %v2325_v37 = vpack.i.bf16 %v2705_v35, %v2707_v36  ;;  %v1561_v35 = vld [vmem:[%s2823_s8 + $0x8] sm:$0xff]  ;;  %v1562_v36 = vld [vmem:[%s2823_s8 + $0x10] sm:$0xff] }
 0x617   : > { %v2059_v38 = vpop.f32.mrb[10].mxu1 }
 0x618   : > { %v1210_v39 = vpop.f32.mrb[11].mxu1  ;;  %v1222_v40 = vsel %vm822_vm2, %v2059_v38, -inf }
 0x619   : > { %1223 = vmax.xlane.f32.xlu0 %v1222_v40  ;;  %v1219_v41 = vsel %vm822_vm2, %v1210_v39, -inf }
 0x61a   : > { %1220 = vmax.xlane.f32.xlu1 %v1219_v41  ;;  %v1564_v41 = vld [vmem:[%s2823_s8 + $0x20] sm:$0xff] }
 0x62b   : > { %2311 = vrot.lane.b32.xlu1 %v2685_v3, %s2385_s28 }
 0x62f   : > { %1328 = vrot.lane.b32.xlu1 %v2627_v14, %s2386_s24 }
 0x633   : > { %1330 = vrot.lane.b32.xlu1 %v2649_v22, %s2386_s24 }
 0x6a6   : > { %v1224_v42 = vpop.xlane.xlu0 %1223 }
 0x6a7   : > { %v1226_v43 = vsub.f32 %v2059_v38, %v1224_v42  ;;  %v1221_v44 = vpop.xlane.xlu1 %1220  ;;  %v1560_v38 = vld [vmem:[%s2823_s8] sm:$0xff]  ;;  %v1565_v42 = vld [vmem:[%s2823_s8 + $0x28] sm:$0xff] }
 0x6a8   : > { %v1225_v45 = vsub.f32 %v1210_v39, %v1221_v44  ;;  %v1563_v39 = vld [vmem:[%s2823_s8 + $0x18] sm:$0xff]  ;;  %v1566_v44 = vld [vmem:[%s2823_s8 + $0x30] sm:$0xff] }
 0x6a9   : > { %v1229_v46 = vmul.f32 1.442695, %v1226_v43  ;;  %v2256_v40 = vpack.c.bf16 %v1563_v39, %v1562_v36  ;;  %v2260_v43 = vpack.c.bf16 %v1565_v42, %v1564_v41  ;;  %v1810_v36 = vld [vmem:[%s2826_s11] ss:$0 sm:$0xff] }
 0x6aa   : > { %v1227_v47 = vmul.f32 1.442695, %v1225_v45  ;;  %v1567_v45 = vld [vmem:[%s2823_s8 + $0x38] sm:$0xff] }
 0x6ab   : > { %2356 = vpow2.f32 %v1229_v46  ;;  %v2312_v48 = vpop.permute.xlu1 %2311  ;;  %v2264_v46 = vpack.c.bf16 %v1567_v45, %v1566_v44 }
 0x6ac   : > { %v2314_v49 = vunpack.i.h.bf16 %v2312_v48  ;;  %v2313_v50 = vunpack.i.l.bf16 %v2312_v48  ;;  %2358 = vpow2.f32 %v1227_v47  ;;  %v1568_v47 = vld [vmem:[%s2823_s8 + $0x40] sm:$0xff]  ;;  %v1569_v48 = vld [vmem:[%s2823_s8 + $0x48] sm:$0xff] }
 0x6ae   : > { %v2238_v52 = vpack.c.bf16 %v2314_v49, %v2313_v50  ;;  %v2268_v49 = vpack.c.bf16 %v1569_v48, %v1568_v47  ;;  %v1570_v50 = vld [vmem:[%s2823_s8 + $0x50] sm:$0xff] }
 0x6af   : > { %v1329_v4 = vpop.permute.xlu1 %1328 }
 0x6b0   : > { %2239 = vmatprep.subr.bf16.mxu1 %v2238_v52 }
 0x6b1   : > { %2241 = vmatpush3.bf16.msra.mxu1 %v2238_v52  ;;  %v1571_v52 = vld [vmem:[%s2823_s8 + $0x58] sm:$0xff] }
 0x6b5   : > { %v2357_v53 = vpop.eup %2356 }
 0x6b6   : > { %v1234_v14 = vsel %vm822_vm2, %v2357_v53, 0.0  ;;  %v2359_v54 = vpop.eup %2358 }
 0x6b7   : > { %1235 = vadd.xlane.f32.xlu0 %v1234_v14  ;;  %v1231_v22 = vsel %vm822_vm2, %v2359_v54, 0.0  ;;  %v1572_v14 = vld [vmem:[%s2823_s8 + $0x60] sm:$0xff] }
 0x6bb   : > { %1232 = vadd.xlane.f32.xlu0 %v1231_v22 }
 0x6d1   : > { %2316 = vrot.lane.b32.xlu0 %v2625_v13, %s2386_s24  ;;  %v1331_v13 = vpop.permute.xlu1 %1330 }
 0x744   : > { %v1236_v55 = vpop.xlane.xlu0 %1235 }
 0x745   : > { %2360 = vrcp.f32 %v1236_v55  ;;  %v1574_v55 = vld [vmem:[%s2823_s8 + $0x70] sm:$0xff] }
 0x748   : > { %v1233_v56 = vpop.xlane.xlu0 %1232 }
 0x749   : > { %2362 = vrcp.f32 %v1233_v56  ;;  %v1575_v56 = vld [vmem:[%s2823_s8 + $0x78] sm:$0xff] }
 0x74c   : > { %v2317_v57 = vpop.permute.xlu0 %2316 }
 0x74d   : > { %v2319_v58 = vunpack.i.h.bf16 %v2317_v57  ;;  %v2318_v59 = vunpack.i.l.bf16 %v2317_v57  ;;  %v2280_v57 = vpack.c.bf16 %v1575_v56, %v1574_v55 }
 0x74f   : > { %v2242_v60 = vpack.c.bf16 %v2319_v58, %v2318_v59  ;;  %v2361_v63 = vpop.eup %2360 }
 0x750   : > { %v1240_v2 = vmul.f32 %v2361_v63, %v2357_v53  ;;  %v2272_v53 = vpack.c.bf16 %v1571_v52, %v1570_v50 }
 0x751   : > { %2244 = vmatprep.subr.msk.bf16.mxu1 %vm2615_vm1, %v2242_v60 }
 0x753   : > { %v2363_v0 = vpop.eup %2362 }
 0x754   : > { %v1239_v1 = vmul.f32 %v2363_v0, %v2359_v54  ;;  %v1573_v54 = vld [vmem:[%s2823_s8 + $0x68] sm:$0xff] }
 0x755   : > { %v2276_v22 = vpack.c.bf16 %v1573_v54, %v1572_v14 }
 0x756   : > { %2064 = vmatprep.mubr.msk.f32.mxu1 %vm822_vm2, %v1239_v1 }
 0x757   : > { %2065 = vmatmul.mubr.msk.f32.vlgmr.msra.gmra.mrb[12].mxu1 %vm822_vm2, %v1240_v2 }
 0x758   : > { %2247 = vmatpush3.bf16.xpose.msk.msra.mxu1 %vm2615_vm1, %v2242_v60  ;;  %2071 = vmatprep.mubr.msk.f32.mxu1 %vm734_vm0, %v1329_v4 }
 0x75f   : > { %2072 = vmatmul.mubr.msk.f32.vlgmr.msra.gmra.mrb[14].mxu1 %vm734_vm0, %v1331_v13 }
 0x82a   : > { %v2066_v5 = vpop.f32.mrb[12].mxu1 }
 0x82b   : > { %v1319_v6 = vpop.f32.mrb[13].mxu1 }
 0x82c   : > { %v2330_v7 = vpack.i.bf16 %v2066_v5, %v1319_v6 }
 0x832   : > { %v2073_v9 = vpop.f32.mrb[14].mxu1 }
 0x833   : > { %v1410_v10 = vpop.f32.mrb[15].mxu1  ;;  %v1422_v11 = vsel %vm822_vm2, %v2073_v9, -inf }
 0x834   : > { %1423 = vmax.xlane.f32.xlu0 %v1422_v11  ;;  %v1419_v12 = vsel %vm822_vm2, %v1410_v10, -inf }
 0x835   : > { %1420 = vmax.xlane.f32.xlu1 %v1419_v12 }
 0x846   : > { %2321 = vrot.lane.b32.xlu1 %v2685_v3, %s2386_s24 }
 0x84a   : > { %2331 = vrot.lane.b32.xlu1 %v2330_v7, %s2385_s28 }
 0x8c1   : > { %v1424_v8 = vpop.xlane.xlu0 %1423 }
 0x8c2   : > { %v1426_v15 = vsub.f32 %v2073_v9, %v1424_v8  ;;  %v1421_v16 = vpop.xlane.xlu1 %1420 }
 0x8c3   : > { %v1425_v17 = vsub.f32 %v1410_v10, %v1421_v16 }
 0x8c4   : > { %v1429_v18 = vmul.f32 1.442695, %v1426_v15 }
 0x8c5   : > { %v1427_v19 = vmul.f32 1.442695, %v1425_v17 }
 0x8c6   : > { %v2322_v20 = vpop.permute.xlu1 %2321 }
 0x8c7   : > { %2364 = vpow2.f32 %v1427_v19  ;;  %v2324_v21 = vunpack.i.h.bf16 %v2322_v20  ;;  %v2323_v23 = vunpack.i.l.bf16 %v2322_v20 }
 0x8c8   : > { %2366 = vpow2.f32 %v1429_v18 }
 0x8c9   : > { %v2248_v24 = vpack.c.bf16 %v2324_v21, %v2323_v23 }
 0x8ca   : > { %v2332_v2 = vpop.permute.xlu1 %2331 }
 0x8cb   : > { %2249 = vmatprep.subr.bf16.mxu1 %v2248_v24  ;;  %v2334_v5 = vunpack.i.h.bf16 %v2332_v2  ;;  %v2333_v6 = vunpack.i.l.bf16 %v2332_v2 }
 0x8cc   : > { %2251 = vmatpush3.bf16.msra.mxu1 %v2248_v24 }
 0x8d1   : > { %v2365_v25 = vpop.eup %2364 }
 0x8d2   : > { %v1431_v26 = vsel %vm822_vm2, %v2365_v25, 0.0  ;;  %v2367_v3 = vpop.eup %2366 }
 0x8d3   : > { %1432 = vadd.xlane.f32.xlu0 %v1431_v26  ;;  %v1434_v27 = vsel %vm822_vm2, %v2367_v3, 0.0 }
 0x8d7   : > { %1435 = vadd.xlane.f32.xlu0 %v1434_v27 }
 0x8ed   : > { %2326 = vrot.lane.b32.xlu0 %v2325_v37, %s2386_s24  ;;  %v2252_v37 = vpack.c.bf16 %v1561_v35, %v1560_v38  ;;  %v1809_v38 = vld [vmem:[%s2825_s10] ss:$0 sm:$0xff] }
 0x8ef   : > { %2253 = vmatprep.subr.bf16.mxu0 %v2252_v37 }
 0x8f0   : > { %2255 = vmatpush3.bf16.msra.mxu0 %v2252_v37 }
 0x8f1   : > { %2257 = vmatprep.subr.bf16.mxu0 %v2256_v40 }
 0x8f4   : > { %2259 = vmatpush3.bf16.msra.mxu0 %v2256_v40 }
 0x8f5   : > { %2261 = vmatprep.subr.bf16.mxu0 %v2260_v43 }
 0x8f8   : > { %2263 = vmatpush3.bf16.msra.mxu0 %v2260_v43 }
 0x8f9   : > { %2265 = vmatprep.subr.bf16.mxu0 %v2264_v46 }
 0x8fc   : > { %2267 = vmatpush3.bf16.msra.mxu0 %v2264_v46 }
 0x8fd   : > { %2269 = vmatprep.subr.bf16.mxu0 %v2268_v49 }
 0x900   : > { %2271 = vmatpush3.bf16.msra.mxu0 %v2268_v49 }
 0x901   : > { %2273 = vmatprep.subr.bf16.mxu0 %v2272_v53 }
 0x904   : > { %2275 = vmatpush3.bf16.msra.mxu0 %v2272_v53 }
 0x905   : > { %2277 = vmatprep.subr.bf16.mxu0 %v2276_v22 }
 0x908   : > { %2279 = vmatpush3.bf16.msra.mxu0 %v2276_v22 }
 0x909   : > { %2281 = vmatprep.subr.bf16.mxu0 %v2280_v57 }
 0x90c   : > { %2283 = vmatpush3.bf16.msra.mxu0 %v2280_v57 }
 0x960   : > { %v1433_v28 = vpop.xlane.xlu0 %1432 }
 0x961   : > { %2368 = vrcp.f32 %v1433_v28 }
 0x964   : > { %v1436_v30 = vpop.xlane.xlu0 %1435 }
 0x965   : > { %2370 = vrcp.f32 %v1436_v30 }
 0x968   : > { %v2327_v63 = vpop.permute.xlu0 %2326 }
 0x969   : > { %v2329_v0 = vunpack.i.h.bf16 %v2327_v63  ;;  %v2328_v1 = vunpack.i.l.bf16 %v2327_v63 }
 0x96b   : > { %v2369_v31 = vpop.eup %2368  ;;  %v1553_v4 = vsel %vm734_vm0, %v2679_v61, %v2329_v0  ;;  %v1552_v13 = vsel %vm734_vm0, %v2681_v62, %v2328_v1  ;;  %v1808_v61 = vld [vmem:[%s2824_s9] ss:$0 sm:$0xff] }
 0x96c   : > { %v1439_v32 = vmul.f32 %v2369_v31, %v2365_v25  ;;  %v1555_v11 = vsel %vm1554_vm3, %v1552_v13, %v2333_v6  ;;  %v1556_v12 = vsel %vm1554_vm3, %v1553_v4, %v2334_v5 }
 0x96e   : > { %2078 = vmatprep.mubr.msk.f32.mxu1 %vm822_vm2, %v1439_v32 }
 0x96f   : > { %v2371_v33 = vpop.eup %2370 }
 0x970   : > { %v1440_v34 = vmul.f32 %v2371_v33, %v2367_v3 }
 0x972   : > { %2079 = vmatmul.mubr.msk.f32.vlgmr.msra.gmra.mrb[16].mxu1 %vm822_vm2, %v1440_v34 }
 0xa45   : > { %v2080_v58 = vpop.f32.mrb[16].mxu1 }
 0xa46   : > { %v1519_v59 = vpop.f32.mrb[17].mxu1 }
 0xa47   : > { %v2335_v60 = vpack.i.bf16 %v2080_v58, %v1519_v59 }
 0xa49   : > { %2336 = vrot.lane.b32.xlu1 %v2335_v60, %s2384_s23 }
 0xabb   : > { %v2337_v7 = vpop.permute.xlu1 %2336 }
 0xabc   : > { %v2339_v9 = vunpack.i.h.bf16 %v2337_v7  ;;  %v2338_v10 = vunpack.i.l.bf16 %v2337_v7 }
 0xabe   : > { %v1558_v8 = vsel %vm1557_vm4, %v1555_v11, %v2338_v10  ;;  %v1559_v15 = vsel %vm1557_vm4, %v1556_v12, %v2339_v9 }
 0xabf   : > { %2113 = vmatprep.mubr.f32.mxu0 %v1558_v8 }
 0xac0   : > { %2114 = vmatmul.mubr.f32.vlgmr.msra.gmra.mrb[4].mxu0 %v1559_v15 }
 0xb93   : > { %v2115_v16 = vpop.f32.mrb[4].mxu0 }
 0xb94   : > { %v1655_v17 = vadd.f32 %v2115_v16, %v1808_v61  ;;  %v1649_v62 = vpop.f32.mrb[5].mxu0 }
 0xb95   : > { %v1650_v18 = vadd.f32 %v1808_v61, %v1649_v62 }
 0xb96   : > { %v1659_v19 = vadd.f32 %v1655_v17, %v2579_v51 }
 0xb97   : > { %v1658_v20 = vadd.f32 %v1650_v18, %v2536_v29 }
 0xb98   : > { %1662 = vadd.xlane.f32.xlu0 %v1659_v19 }
 0xb99   : > { %1660 = vadd.xlane.f32.xlu1 %v1658_v20 }
 0xc25   : > { %v1663_v21 = vpop.xlane.xlu0 %1662 }
 0xc26   : > { %v1661_v23 = vpop.xlane.xlu1 %1660  ;;  %v1666_v24 = vmul.f32 0.0078125, %v1663_v21 }
 0xc27   : > { %v1665_v25 = vmul.f32 0.0078125, %v1661_v23 }
 0xc28   : > { %v1668_v3 = vsub.f32 %v1659_v19, %v1666_v24 }
 0xc29   : > { %v1667_v26 = vsub.f32 %v1658_v20, %v1665_v25 }
 0xc2a   : > { %v1670_v28 = vmul.f32 %v1668_v3, %v1668_v3 }
 0xc2b   : > { %v1669_v27 = vmul.f32 %v1667_v26, %v1667_v26 }
 0xc2d   : > { %1671 = vadd.xlane.f32.xlu0 %v1669_v27 }
 0xc31   : > { %1673 = vadd.xlane.f32.xlu0 %v1670_v28 }
 0xcba   : > { %v1672_v30 = vpop.xlane.xlu0 %1671 }
 0xcbb   : > { %v1675_v31 = vmul.f32 0.0078125, %v1672_v30 }
 0xcbd   : > { %v1677_v32 = vadd.f32 1e-05, %v1675_v31 }
 0xcbe   : > { %v1674_v33 = vpop.xlane.xlu0 %1673 }
 0xcbf   : > { %2372 = vrsqrt.f32 %v1677_v32  ;;  %v1676_v51 = vmul.f32 0.0078125, %v1674_v33 }
 0xcc1   : > { %v1678_v29 = vadd.f32 1e-05, %v1676_v51 }
 0xcc3   : > { %2374 = vrsqrt.f32 %v1678_v29 }
 0xcc9   : > { %v2373_v34 = vpop.eup %2372 }
 0xcca   : > { %v1681_v35 = vmul.f32 %v2373_v34, %v1667_v26 }
 0xccc   : > { %v1690_v37 = vmul.f32 %v1809_v38, %v1681_v35 }
 0xccd   : > { %v2375_v39 = vpop.eup %2374 }
 0xcce   : > { %v1699_v40 = vadd.f32 %v1810_v36, %v1690_v37  ;;  %v1682_v41 = vmul.f32 %v2375_v39, %v1668_v3 }
 0xcd0   : > { %1701 = vst [vmem:[%s433_s19] sm:$0xff] %v1699_v40  ;;  %v1691_v42 = vmul.f32 %v1809_v38, %v1682_v41 }
 0xcd2   : > { %v1700_v43 = vadd.f32 %v1810_v36, %v1691_v42 }
 0xcd4   : > { %1702 = vst [vmem:[%s433_s19 + $0x8] sm:$0xff] %v1700_v43 }
 0xcd5 PF: > { %s22_s21 = sadd.s32 1, %s2382_s21  }
 0xcd6   : > { %p19_p4 = scmp.ge.s32.totalorder %s22_s21, 4  }
 0xcd8   :  { %21 = sbr.rel (!%p19_p4) target bundleno = 1 (0x1), region = 101 }

// kernel: transformer_forward.11
= control target key start
LH: loop header
LB: loop body
LE: loop exit
PB: predicated region body
PF: predicated region fallthrough
CT: control target
= control target key end

     0   :  { %v858_v3 = vmov 0.0   ;;  %s1347_s1 = inlined_call_operand.vmem [shape: f32[128,512], index: 1, kind: input, shape index: {}]   ;;  %s1348_s3 = inlined_call_operand.vmem [shape: f32[512,128], index: 3, kind: input, shape index: {}]   ;;  %s1349_s0 = inlined_call_operand.vmem [shape: f32[32,128], index: 0, kind: input, shape index: {}]   ;;  %s1350_s2 = inlined_call_operand.vmem [shape: f32[1,512], index: 2, kind: input, shape index: {}]   ;;  %s1351_s4 = inlined_call_operand.vmem [shape: f32[1,128], index: 4, kind: input, shape index: {}]   ;;  %s1352_s5 = inlined_call_operand.vmem [shape: f32[1,128], index: 5, kind: input, shape index: {}]   ;;  %s1353_s6 = inlined_call_operand.vmem [shape: f32[1,128], index: 6, kind: input, shape index: {}]   ;;  %s1354_s7 = inlined_call_operand.vmem [shape: f32[32,128], index: 7, kind: output, shape index: {}]  }
   0x1   :  { %v31_v0 = vld [vmem:[%s1347_s1 + $0x8] sm:$0xff]  ;;  %v33_v2 = vld [vmem:[%s1347_s1 + $0x18] sm:$0xff]  ;;  %180 = vmatprep.mubr.f32.mxu0 %v858_v3  ;;  %269 = vmatprep.mubr.f32.mxu1 %v858_v3  ;;  %v30_v6 = vld [vmem:[%s1347_s1] sm:$0xff] }
   0x2   :  { %v35_v1 = vld [vmem:[%s1347_s1 + $0x28] sm:$0xff]  ;;  %v37_v5 = vld [vmem:[%s1347_s1 + $0x38] sm:$0xff]  ;;  %v34_v7 = vld [vmem:[%s1347_s1 + $0x20] sm:$0xff] }
   0x3   :  { %v721_v4 = vpack.c.bf16 %v35_v1, %v31_v0  ;;  %v753_v8 = vpack.c.bf16 %v37_v5, %v33_v2  ;;  %v723_v9 = vpack.c.bf16 %v34_v7, %v30_v6  ;;  %v32_v10 = vld [vmem:[%s1347_s1 + $0x10] sm:$0xff]  ;;  %v39_v12 = vld [vmem:[%s1347_s1 + $0x48] sm:$0xff]  ;;  %v41_v15 = vld [vmem:[%s1347_s1 + $0x58] sm:$0xff] }
   0x4   :  { %v36_v11 = vld [vmem:[%s1347_s1 + $0x30] sm:$0xff]  ;;  %v43_v14 = vld [vmem:[%s1347_s1 + $0x68] sm:$0xff]  ;;  %v45_v16 = vld [vmem:[%s1347_s1 + $0x78] sm:$0xff] }
   0x5   :  { %722 = vmatprep.subr.bf16.mxu0 %v721_v4  ;;  %v755_v13 = vpack.c.bf16 %v36_v11, %v32_v10  ;;  %754 = vmatprep.subr.bf16.mxu1 %v753_v8  ;;  %v725_v17 = vpack.c.bf16 %v43_v14, %v39_v12  ;;  %v757_v18 = vpack.c.bf16 %v45_v16, %v41_v15  ;;  %v38_v19 = vld [vmem:[%s1347_s1 + $0x40] sm:$0xff]  ;;  %v40_v21 = vld [vmem:[%s1347_s1 + $0x50] sm:$0xff]  ;;  %v47_v24 = vld [vmem:[%s1347_s1 + $0x88] sm:$0xff] }
   0x6   :  { %724 = vmatpush1.bf16.msra.mxu0 %v723_v9  ;;  %v42_v20 = vld [vmem:[%s1347_s1 + $0x60] sm:$0xff]  ;;  %v44_v23 = vld [vmem:[%s1347_s1 + $0x70] sm:$0xff]  ;;  %v51_v25 = vld [vmem:[%s1347_s1 + $0xa8] sm:$0xff] }
   0x7   :  { %756 = vmatpush1.bf16.msra.mxu1 %v755_v13  ;;  %v727_v22 = vpack.c.bf16 %v42_v20, %v38_v19  ;;  %726 = vmatprep.subr.bf16.mxu0 %v725_v17  ;;  %v759_v26 = vpack.c.bf16 %v44_v23, %v40_v21  ;;  %v729_v27 = vpack.c.bf16 %v51_v25, %v47_v24  ;;  %v49_v28 = vld [vmem:[%s1347_s1 + $0x98] sm:$0xff]  ;;  %v46_v30 = vld [vmem:[%s1347_s1 + $0x80] sm:$0xff]  ;;  %v48_v33 = vld [vmem:[%s1347_s1 + $0x90] sm:$0xff] }
   0x8   :  { %758 = vmatprep.subr.bf16.mxu1 %v757_v18  ;;  %v53_v29 = vld [vmem:[%s1347_s1 + $0xb8] sm:$0xff]  ;;  %v50_v32 = vld [vmem:[%s1347_s1 + $0xa0] sm:$0xff]  ;;  %v52_v34 = vld [vmem:[%s1347_s1 + $0xb0] sm:$0xff] }
   0x9   :  { %v761_v31 = vpack.c.bf16 %v53_v29, %v49_v28  ;;  %v731_v35 = vpack.c.bf16 %v50_v32, %v46_v30  ;;  %v55_v36 = vld [vmem:[%s1347_s1 + $0xc8] sm:$0xff]  ;;  %v57_v38 = vld [vmem:[%s1347_s1 + $0xd8] sm:$0xff]  ;;  %v763_v39 = vpack.c.bf16 %v52_v34, %v48_v33  ;;  %v54_v42 = vld [vmem:[%s1347_s1 + $0xc0] sm:$0xff] }
   0xa   :  { %728 = vmatpush1.bf16.msra.mxu0 %v727_v22  ;;  %v59_v37 = vld [vmem:[%s1347_s1 + $0xe8] sm:$0xff]  ;;  %v61_v41 = vld [vmem:[%s1347_s1 + $0xf8] sm:$0xff]  ;;  %v58_v43 = vld [vmem:[%s1347_s1 + $0xe0] sm:$0xff] }
   0xb   :  { %760 = vmatpush1.bf16.msra.mxu1 %v759_v26  ;;  %730 = vmatprep.subr.bf16.mxu0 %v729_v27  ;;  %v733_v40 = vpack.c.bf16 %v59_v37, %v55_v36  ;;  %v765_v44 = vpack.c.bf16 %v61_v41, %v57_v38  ;;  %v56_v45 = vld [vmem:[%s1347_s1 + $0xd0] sm:$0xff]  ;;  %v63_v47 = vld [vmem:[%s1347_s1 + $0x108] sm:$0xff]  ;;  %v65_v49 = vld [vmem:[%s1347_s1 + $0x118] sm:$0xff]  ;;  %v735_v51 = vpack.c.bf16 %v58_v43, %v54_v42 }
   0xc   :  { %762 = vmatprep.subr.bf16.mxu1 %v761_v31  ;;  %v60_v46 = vld [vmem:[%s1347_s1 + $0xf0] sm:$0xff]  ;;  %v67_v48 = vld [vmem:[%s1347_s1 + $0x128] sm:$0xff]  ;;  %v69_v50 = vld [vmem:[%s1347_s1 + $0x138] sm:$0xff] }
   0xd   :  { %v767_v52 = vpack.c.bf16 %v60_v46, %v56_v45  ;;  %v737_v53 = vpack.c.bf16 %v67_v48, %v63_v47  ;;  %v62_v54 = vld [vmem:[%s1347_s1 + $0x100] sm:$0xff]  ;;  %v64_v56 = vld [vmem:[%s1347_s1 + $0x110] sm:$0xff]  ;;  %v769_v57 = vpack.c.bf16 %v69_v50, %v65_v49  ;;  %v71_v59 = vld [vmem:[%s1347_s1 + $0x148] sm:$0xff] }
   0xe   :  { %732 = vmatpush1.bf16.msra.mxu0 %v731_v35  ;;  %v66_v55 = vld [vmem:[%s1347_s1 + $0x120] sm:$0xff]  ;;  %v68_v58 = vld [vmem:[%s1347_s1 + $0x130] sm:$0xff]  ;;  %v75_v60 = vld [vmem:[%s1347_s1 + $0x168] sm:$0xff] }
   0xf   :  { %764 = vmatpush1.bf16.msra.mxu1 %v763_v39  ;;  %734 = vmatprep.subr.bf16.mxu0 %v733_v40  ;;  %v73_v61 = vld [vmem:[%s1347_s1 + $0x158] sm:$0xff]  ;;  %v739_v63 = vpack.c.bf16 %v66_v55, %v62_v54  ;;  %v771_v0 = vpack.c.bf16 %v68_v58, %v64_v56  ;;  %v741_v1 = vpack.c.bf16 %v75_v60, %v71_v59  ;;  %v70_v2 = vld [vmem:[%s1347_s1 + $0x140] sm:$0xff]  ;;  %v72_v5 = vld [vmem:[%s1347_s1 + $0x150] sm:$0xff] }
  0x10   :  { %766 = vmatprep.subr.bf16.mxu1 %v765_v44  ;;  %v77_v62 = vld [vmem:[%s1347_s1 + $0x178] sm:$0xff]  ;;  %v74_v4 = vld [vmem:[%s1347_s1 + $0x160] sm:$0xff]  ;;  %v76_v7 = vld [vmem:[%s1347_s1 + $0x170] sm:$0xff] }
  0x11   :  { %v773_v6 = vpack.c.bf16 %v77_v62, %v73_v61  ;;  %v79_v8 = vld [vmem:[%s1347_s1 + $0x188] sm:$0xff]  ;;  %v81_v10 = vld [vmem:[%s1347_s1 + $0x198] sm:$0xff]  ;;  %v743_v12 = vpack.c.bf16 %v74_v4, %v70_v2  ;;  %v775_v13 = vpack.c.bf16 %v76_v7, %v72_v5  ;;  %v78_v15 = vld [vmem:[%s1347_s1 + $0x180] sm:$0xff] }
  0x12   :  { %736 = vmatpush1.bf16.msra.mxu0 %v735_v51  ;;  %v83_v9 = vld [vmem:[%s1347_s1 + $0x1a8] sm:$0xff]  ;;  %v85_v11 = vld [vmem:[%s1347_s1 + $0x1b8] sm:$0xff]  ;;  %v82_v16 = vld [vmem:[%s1347_s1 + $0x1a0] sm:$0xff] }
  0x13   :  { %768 = vmatpush1.bf16.msra.mxu1 %v767_v52  ;;  %738 = vmatprep.subr.bf16.mxu0 %v737_v53  ;;  %v745_v14 = vpack.c.bf16 %v83_v9, %v79_v8  ;;  %v80_v17 = vld [vmem:[%s1347_s1 + $0x190] sm:$0xff]  ;;  %v777_v18 = vpack.c.bf16 %v85_v11, %v81_v10  ;;  %v87_v20 = vld [vmem:[%s1347_s1 + $0x1c8] sm:$0xff]  ;;  %v89_v22 = vld [vmem:[%s1347_s1 + $0x1d8] sm:$0xff]  ;;  %v747_v24 = vpack.c.bf16 %v82_v16, %v78_v15 }
  0x14   :  { %770 = vmatprep.subr.bf16.mxu1 %v769_v57  ;;  %v84_v19 = vld [vmem:[%s1347_s1 + $0x1b0] sm:$0xff]  ;;  %v91_v21 = vld [vmem:[%s1347_s1 + $0x1e8] sm:$0xff]  ;;  %v93_v23 = vld [vmem:[%s1347_s1 + $0x1f8] sm:$0xff] }
  0x15   :  { %v779_v25 = vpack.c.bf16 %v84_v19, %v80_v17  ;;  %v749_v26 = vpack.c.bf16 %v91_v21, %v87_v20  ;;  %v86_v27 = vld [vmem:[%s1347_s1 + $0x1c0] sm:$0xff]  ;;  %v88_v29 = vld [vmem:[%s1347_s1 + $0x1d0] sm:$0xff]  ;;  %v781_v30 = vpack.c.bf16 %v93_v23, %v89_v22  ;;  %v327_v33 = vld [vmem:[%s1348_s3 + $0x88] sm:$0xff] }
  0x16   :  { %740 = vmatpush1.bf16.msra.mxu0 %v739_v63  ;;  %v90_v28 = vld [vmem:[%s1347_s1 + $0x1e0] sm:$0xff]  ;;  %v92_v31 = vld [vmem:[%s1347_s1 + $0x1f0] sm:$0xff]  ;;  %v359_v35 = vld [vmem:[%s1348_s3 + $0x188] sm:$0xff] }
  0x17   :  { %772 = vmatpush1.bf16.msra.mxu1 %v771_v0  ;;  %742 = vmatprep.subr.bf16.mxu0 %v741_v1  ;;  %v326_v32 = vld [vmem:[%s1348_s3 + $0x80] sm:$0xff]  ;;  %v751_v36 = vpack.c.bf16 %v90_v28, %v86_v27  ;;  %v783_v37 = vpack.c.bf16 %v92_v31, %v88_v29  ;;  %v311_v41 = vld [vmem:[%s1348_s3 + $0x8] sm:$0xff]  ;;  %v328_v44 = vld [vmem:[%s1348_s3 + $0x90] sm:$0xff] }
  0x18   :  { %774 = vmatprep.subr.bf16.mxu1 %v773_v6  ;;  %v358_v34 = vld [vmem:[%s1348_s3 + $0x180] sm:$0xff]  ;;  %v785_v38 = vpack.c.bf16 %v327_v33, %v326_v32  ;;  %v343_v43 = vld [vmem:[%s1348_s3 + $0x108] sm:$0xff]  ;;  %v329_v45 = vld [vmem:[%s1348_s3 + $0x98] sm:$0xff] }
  0x19   :  { %v817_v39 = vpack.c.bf16 %v359_v35, %v358_v34  ;;  %v310_v40 = vld [vmem:[%s1348_s3] sm:$0xff]  ;;  %v360_v47 = vld [vmem:[%s1348_s3 + $0x190] sm:$0xff]  ;;  %v361_v48 = vld [vmem:[%s1348_s3 + $0x198] sm:$0xff]  ;;  %v789_v51 = vpack.c.bf16 %v329_v45, %v328_v44 }
  0x1a   :  { %744 = vmatpush1.bf16.msra.mxu0 %v743_v12  ;;  %v342_v42 = vld [vmem:[%s1348_s3 + $0x100] sm:$0xff]  ;;  %v787_v49 = vpack.c.bf16 %v311_v41, %v310_v40  ;;  %v312_v52 = vld [vmem:[%s1348_s3 + $0x10] sm:$0xff]  ;;  %v313_v53 = vld [vmem:[%s1348_s3 + $0x18] sm:$0xff]  ;;  %v821_v55 = vpack.c.bf16 %v361_v48, %v360_v47 }
  0x1b   :  { %776 = vmatpush1.bf16.msra.mxu1 %v775_v13  ;;  %746 = vmatprep.subr.bf16.mxu0 %v745_v14  ;;  %v1126_v46 = vld [vmem:[%s1349_s0] sm:$0xff]  ;;  %v819_v50 = vpack.c.bf16 %v343_v43, %v342_v42  ;;  %v344_v54 = vld [vmem:[%s1348_s3 + $0x110] sm:$0xff]  ;;  %v345_v56 = vld [vmem:[%s1348_s3 + $0x118] sm:$0xff]  ;;  %v791_v62 = vpack.c.bf16 %v313_v53, %v312_v52 }
  0x1c   :  { %778 = vmatprep.subr.bf16.mxu1 %v777_v18  ;;  %v330_v57 = vld [vmem:[%s1348_s3 + $0xa0] sm:$0xff]  ;;  %v331_v58 = vld [vmem:[%s1348_s3 + $0xa8] sm:$0xff]  ;;  %v823_v63 = vpack.c.bf16 %v345_v56, %v344_v54  ;;  %v332_v7 = vld [vmem:[%s1348_s3 + $0xb0] sm:$0xff] }
  0x1d   :  { %v1158_v59 = vld [vmem:[%s1349_s0 + $0x8] sm:$0xff]  ;;  %v362_v60 = vld [vmem:[%s1348_s3 + $0x1a0] sm:$0xff]  ;;  %v793_v0 = vpack.c.bf16 %v331_v58, %v330_v57  ;;  %v333_v8 = vld [vmem:[%s1348_s3 + $0xb8] sm:$0xff] }
  0x1e   :  { %748 = vmatpush1.bf16.msra.mxu0 %v747_v24  ;;  %v363_v61 = vld [vmem:[%s1348_s3 + $0x1a8] sm:$0xff]  ;;  %v314_v1 = vld [vmem:[%s1348_s3 + $0x20] sm:$0xff]  ;;  %v1191_v9 = vld [vmem:[%s1349_s0 + $0x10] sm:$0xff]  ;;  %v797_v14 = vpack.c.bf16 %v333_v8, %v332_v7 }
  0x1f   :  { %780 = vmatpush1.bf16.msra.mxu1 %v779_v25  ;;  %750 = vmatprep.subr.bf16.mxu0 %v749_v26  ;;  %v315_v2 = vld [vmem:[%s1348_s3 + $0x28] sm:$0xff]  ;;  %v346_v4 = vld [vmem:[%s1348_s3 + $0x120] sm:$0xff]  ;;  %v825_v5 = vpack.c.bf16 %v363_v61, %v362_v60  ;;  %v364_v10 = vld [vmem:[%s1348_s3 + $0x1b0] sm:$0xff] }
  0x20   :  { %782 = vmatprep.subr.bf16.mxu1 %v781_v30  ;;  %v347_v6 = vld [vmem:[%s1348_s3 + $0x128] sm:$0xff]  ;;  %v365_v11 = vld [vmem:[%s1348_s3 + $0x1b8] sm:$0xff]  ;;  %v795_v12 = vpack.c.bf16 %v315_v2, %v314_v1  ;;  %v316_v15 = vld [vmem:[%s1348_s3 + $0x30] sm:$0xff] }
  0x21   :  { %v827_v13 = vpack.c.bf16 %v347_v6, %v346_v4  ;;  %v317_v16 = vld [vmem:[%s1348_s3 + $0x38] sm:$0xff]  ;;  %v348_v17 = vld [vmem:[%s1348_s3 + $0x130] sm:$0xff]  ;;  %v829_v18 = vpack.c.bf16 %v365_v11, %v364_v10  ;;  %v334_v20 = vld [vmem:[%s1348_s3 + $0xc0] sm:$0xff]  ;;  %v96_v10 = vlaneseq }
  0x22   :  { %752 = vmatpush1.bf16.msra.mxu0 %v751_v36  ;;  %v349_v19 = vld [vmem:[%s1348_s3 + $0x138] sm:$0xff]  ;;  %v335_v21 = vld [vmem:[%s1348_s3 + $0xc8] sm:$0xff]  ;;  %v366_v23 = vld [vmem:[%s1348_s3 + $0x1c0] sm:$0xff]  ;;  %v799_v25 = vpack.c.bf16 %v317_v16, %v316_v15 }
  0x23   :  { %784 = vmatpush1.bf16.msra.mxu1 %v783_v37  ;;  %786 = vmatprep.subr.bf16.mxu0 %v785_v38  ;;  %v1224_v22 = vld [vmem:[%s1349_s0 + $0x18] sm:$0xff]  ;;  %v367_v24 = vld [vmem:[%s1348_s3 + $0x1c8] sm:$0xff]  ;;  %v831_v26 = vpack.c.bf16 %v349_v19, %v348_v17  ;;  %v801_v27 = vpack.c.bf16 %v335_v21, %v334_v20  ;;  %v318_v28 = vld [vmem:[%s1348_s3 + $0x40] sm:$0xff]  ;;  %v97_v11 = vshrl.u32 %v96_v10, 7 }
  0x24   :  { %818 = vmatprep.subr.bf16.mxu1 %v817_v39  ;;  %v319_v29 = vld [vmem:[%s1348_s3 + $0x48] sm:$0xff]  ;;  %v350_v30 = vld [vmem:[%s1348_s3 + $0x140] sm:$0xff]  ;;  %v336_v32 = vld [vmem:[%s1348_s3 + $0xd0] sm:$0xff] }
  0x25   :  { %181 = vmatmul.mubr.f32.vlgmr.msra.gmra.mrb[0].mxu0 %v1126_v46  ;;  %v351_v31 = vld [vmem:[%s1348_s3 + $0x148] sm:$0xff]  ;;  %v337_v33 = vld [vmem:[%s1348_s3 + $0xd8] sm:$0xff]  ;;  %v368_v34 = vld [vmem:[%s1348_s3 + $0x1d0] sm:$0xff]  ;;  %v803_v36 = vpack.c.bf16 %v319_v29, %v318_v28  ;;  %v102_v15 = vsub.s32 1, %v97_v11  ;;  %v110_v16 = vsub.s32 3, %v97_v11 }
  0x26   :  { %270 = vmatmul.mubr.f32.vlgmr.msra.gmra.mrb[0].mxu1 %v1126_v46  ;;  %186 = vmatprep.mubr.f32.mxu0 %v858_v3  ;;  %v369_v35 = vld [vmem:[%s1348_s3 + $0x1d8] sm:$0xff]  ;;  %v835_v37 = vpack.c.bf16 %v351_v31, %v350_v30  ;;  %v805_v38 = vpack.c.bf16 %v337_v33, %v336_v32  ;;  %v320_v39 = vld [vmem:[%s1348_s3 + $0x50] sm:$0xff]  ;;  %v338_v44 = vld [vmem:[%s1348_s3 + $0xe0] sm:$0xff] }
  0x27   :  { %275 = vmatprep.mubr.f32.mxu1 %v858_v3  ;;  %788 = vmatpush3.bf16.msra.mxu0 %v787_v49  ;;  %v321_v40 = vld [vmem:[%s1348_s3 + $0x58] sm:$0xff]  ;;  %v352_v41 = vld [vmem:[%s1348_s3 + $0x150] sm:$0xff]  ;;  %v837_v42 = vpack.c.bf16 %v369_v35, %v368_v34  ;;  %v339_v45 = vld [vmem:[%s1348_s3 + $0xe8] sm:$0xff] }
  0x28   :  { %820 = vmatpush3.bf16.msra.mxu1 %v819_v50  ;;  %790 = vmatprep.subr.bf16.mxu0 %v789_v51  ;;  %v353_v43 = vld [vmem:[%s1348_s3 + $0x158] sm:$0xff]  ;;  %v370_v47 = vld [vmem:[%s1348_s3 + $0x1e0] sm:$0xff]  ;;  %v371_v48 = vld [vmem:[%s1348_s3 + $0x1e8] sm:$0xff]  ;;  %v807_v49 = vpack.c.bf16 %v321_v40, %v320_v39  ;;  %v809_v51 = vpack.c.bf16 %v339_v45, %v338_v44 }
  0x29   :  { %187 = vmatmul.mubr.f32.gmra.mrb[2].mxu0 %v1158_v59  ;;  %822 = vmatprep.subr.bf16.mxu1 %v821_v55  ;;  %v839_v50 = vpack.c.bf16 %v353_v43, %v352_v41  ;;  %v841_v52 = vpack.c.bf16 %v371_v48, %v370_v47  ;;  %v322_v53 = vld [vmem:[%s1348_s3 + $0x60] sm:$0xff]  ;;  %v323_v54 = vld [vmem:[%s1348_s3 + $0x68] sm:$0xff]  ;;  %v340_v60 = vld [vmem:[%s1348_s3 + $0xf0] sm:$0xff] }
  0x2a   :  { %276 = vmatmul.mubr.f32.gmra.mrb[2].mxu1 %v1158_v59  ;;  %192 = vmatprep.mubr.f32.mxu0 %v858_v3  ;;  %v354_v55 = vld [vmem:[%s1348_s3 + $0x160] sm:$0xff]  ;;  %v811_v56 = vpack.c.bf16 %v323_v54, %v322_v53  ;;  %v355_v57 = vld [vmem:[%s1348_s3 + $0x168] sm:$0xff]  ;;  %v341_v61 = vld [vmem:[%s1348_s3 + $0xf8] sm:$0xff] }
  0x2b   :  { %281 = vmatprep.mubr.f32.mxu1 %v858_v3  ;;  %792 = vmatpush3.bf16.msra.mxu0 %v791_v62  ;;  %v843_v58 = vpack.c.bf16 %v355_v57, %v354_v55  ;;  %v372_v62 = vld [vmem:[%s1348_s3 + $0x1f0] sm:$0xff]  ;;  %v325_v2 = vld [vmem:[%s1348_s3 + $0x78] sm:$0xff] }
  0x2c   :  { %824 = vmatpush3.bf16.msra.mxu1 %v823_v63  ;;  %794 = vmatprep.subr.bf16.mxu0 %v793_v0  ;;  %v813_v63 = vpack.c.bf16 %v341_v61, %v340_v60  ;;  %v373_v0 = vld [vmem:[%s1348_s3 + $0x1f8] sm:$0xff]  ;;  %v324_v1 = vld [vmem:[%s1348_s3 + $0x70] sm:$0xff] }
  0x2d   :  { %193 = vmatmul.mubr.f32.gmra.mrb[4].mxu0 %v1191_v9  ;;  %826 = vmatprep.subr.bf16.mxu1 %v825_v5  ;;  %v845_v4 = vpack.c.bf16 %v373_v0, %v372_v62  ;;  %v815_v5 = vpack.c.bf16 %v325_v2, %v324_v1  ;;  %v356_v6 = vld [vmem:[%s1348_s3 + $0x170] sm:$0xff]  ;;  %v357_v7 = vld [vmem:[%s1348_s3 + $0x178] sm:$0xff] }
  0x2e   :  { %282 = vmatmul.mubr.f32.gmra.mrb[4].mxu1 %v1191_v9  ;;  %198 = vmatprep.mubr.f32.mxu0 %v858_v3  ;;  %v847_v8 = vpack.c.bf16 %v357_v7, %v356_v6 }
  0x2f   :  { %287 = vmatprep.mubr.f32.mxu1 %v858_v3  ;;  %796 = vmatpush3.bf16.msra.mxu0 %v795_v12  ;;  %v833_v3 = vpack.c.bf16 %v367_v24, %v366_v23  ;;  %v98_v12 = vsub.s32 0, %v97_v11 }
  0x30   :  { %828 = vmatpush3.bf16.msra.mxu1 %v827_v13  ;;  %798 = vmatprep.subr.bf16.mxu0 %v797_v14  ;;  %v94_v13 = vld [vmem:[%s1350_s2] sm:$0xf]  ;;  %v106_v14 = vsub.s32 2, %v97_v11 }
  0x31   :  { %199 = vmatmul.mubr.f32.gmra.mrb[6].mxu0 %v1224_v22  ;;  %830 = vmatprep.subr.bf16.mxu1 %v829_v18  ;;  %v99_v17 = vrot.slane %v94_v13, %v98_v12  ;;  %v103_v19 = vrot.slane %v94_v13, %v102_v15  ;;  %v111_v20 = vrot.slane %v94_v13, %v110_v16  ;;  %v630_v11 = vld [vmem:[%s1351_s4] ss:$0 sm:$0xff] }
  0x32   :  { %288 = vmatmul.mubr.f32.gmra.mrb[6].mxu1 %v1224_v22  ;;  %v107_v18 = vrot.slane %v94_v13, %v106_v14 }
  0x33   :  { %800 = vmatpush3.bf16.msra.mxu0 %v799_v25 }
  0x34   :  { %832 = vmatpush3.bf16.msra.mxu1 %v831_v26  ;;  %802 = vmatprep.subr.bf16.mxu0 %v801_v27 }
  0x35   :  { %834 = vmatprep.subr.bf16.mxu1 %v833_v3 }
  0x37   :  { %804 = vmatpush3.bf16.msra.mxu0 %v803_v36 }
  0x38   :  { %836 = vmatpush3.bf16.msra.mxu1 %v835_v37  ;;  %806 = vmatprep.subr.bf16.mxu0 %v805_v38 }
  0x39   :  { %838 = vmatprep.subr.bf16.mxu1 %v837_v42 }
  0x3b   :  { %808 = vmatpush3.bf16.msra.mxu0 %v807_v49 }
  0x3c   :  { %840 = vmatpush3.bf16.msra.mxu1 %v839_v50  ;;  %810 = vmatprep.subr.bf16.mxu0 %v809_v51 }
  0x3d   :  { %842 = vmatprep.subr.bf16.mxu1 %v841_v52 }
  0x3f   :  { %812 = vmatpush3.bf16.msra.mxu0 %v811_v56 }
  0x40   :  { %844 = vmatpush3.bf16.msra.mxu1 %v843_v58  ;;  %814 = vmatprep.subr.bf16.mxu0 %v813_v63 }
  0x41   :  { %846 = vmatprep.subr.bf16.mxu1 %v845_v4 }
  0x43   :  { %816 = vmatpush3.bf16.msra.mxu0 %v815_v5 }
  0x44   :  { %848 = vmatpush3.bf16.msra.mxu1 %v847_v8 }
  0xf8   :  { %v182_v21 = vpop.f32.mrb[0].mxu0 }
  0xf9   :  { %v183_v23 = vadd.f32 %v182_v21, %v99_v17  ;;  %v271_v24 = vpop.f32.mrb[0].mxu1  ;;  %v184_v25 = vpop.f32.mrb[1].mxu0 }
  0xfa   :  { %v272_v26 = vadd.f32 %v271_v24, %v107_v18  ;;  %v185_v27 = vadd.f32 %v184_v25, %v103_v19  ;;  %v273_v28 = vpop.f32.mrb[1].mxu1 }
  0xfb   :  { %v274_v29 = vadd.f32 %v273_v28, %v111_v20  ;;  %v294_v32 = vmax.f32 %v183_v23, 0.0 }
  0xfc   :  { %v296_v30 = vmax.f32 %v272_v26, 0.0  ;;  %v295_v3 = vmax.f32 %v185_v27, 0.0  ;;  %v188_v31 = vpop.f32.mrb[2].mxu0 }
  0xfd   :  { %v297_v33 = vmax.f32 %v274_v29, 0.0  ;;  %v189_v34 = vadd.f32 %v188_v31, %v99_v17  ;;  %v277_v35 = vpop.f32.mrb[2].mxu1  ;;  %v190_v36 = vpop.f32.mrb[3].mxu0 }
  0xfe   :  { %v278_v37 = vadd.f32 %v277_v35, %v107_v18  ;;  %v191_v38 = vadd.f32 %v190_v36, %v103_v19  ;;  %v279_v39 = vpop.f32.mrb[3].mxu1  ;;  %445 = vmatprep.mubr.f32.mxu0 %v295_v3 }
  0xff   :  { %v280_v40 = vadd.f32 %v279_v39, %v111_v20  ;;  %530 = vmatprep.mubr.f32.mxu1 %v297_v33  ;;  %446 = vmatmul.mubr.f32.vlgmr.msra.gmra.mrb[8].mxu0 %v294_v32  ;;  %v298_v44 = vmax.f32 %v189_v34, 0.0 }
 0x100   :  { %v300_v41 = vmax.f32 %v278_v37, 0.0  ;;  %v299_v42 = vmax.f32 %v191_v38, 0.0  ;;  %531 = vmatmul.mubr.f32.vlgmr.msra.gmra.mrb[8].mxu1 %v296_v30  ;;  %v194_v43 = vpop.f32.mrb[4].mxu0 }
 0x101   :  { %v301_v45 = vmax.f32 %v280_v40, 0.0  ;;  %v195_v47 = vadd.f32 %v194_v43, %v99_v17  ;;  %v283_v48 = vpop.f32.mrb[4].mxu1  ;;  %v196_v49 = vpop.f32.mrb[5].mxu0 }
 0x102   :  { %v284_v50 = vadd.f32 %v283_v48, %v107_v18  ;;  %v197_v51 = vadd.f32 %v196_v49, %v103_v19  ;;  %v285_v52 = vpop.f32.mrb[5].mxu1  ;;  %450 = vmatprep.mubr.f32.mxu0 %v299_v42 }
 0x103   :  { %v286_v53 = vadd.f32 %v285_v52, %v111_v20  ;;  %535 = vmatprep.mubr.f32.mxu1 %v301_v45  ;;  %451 = vmatmul.mubr.f32.gmra.mrb[10].mxu0 %v298_v44  ;;  %v302_v57 = vmax.f32 %v195_v47, 0.0 }
 0x104   :  { %v304_v54 = vmax.f32 %v284_v50, 0.0  ;;  %v303_v55 = vmax.f32 %v197_v51, 0.0  ;;  %536 = vmatmul.mubr.f32.gmra.mrb[10].mxu1 %v300_v41  ;;  %v200_v56 = vpop.f32.mrb[6].mxu0 }
 0x105   :  { %v305_v58 = vmax.f32 %v286_v53, 0.0  ;;  %v201_v60 = vadd.f32 %v200_v56, %v99_v17  ;;  %v289_v61 = vpop.f32.mrb[6].mxu1  ;;  %v202_v62 = vpop.f32.mrb[7].mxu0 }
 0x106   :  { %v290_v63 = vadd.f32 %v289_v61, %v107_v18  ;;  %v203_v0 = vadd.f32 %v202_v62, %v103_v19  ;;  %v291_v1 = vpop.f32.mrb[7].mxu1  ;;  %455 = vmatprep.mubr.f32.mxu0 %v303_v55 }
 0x107   :  { %v292_v2 = vadd.f32 %v291_v1, %v111_v20  ;;  %540 = vmatprep.mubr.f32.mxu1 %v305_v58  ;;  %456 = vmatmul.mubr.f32.gmra.mrb[12].mxu0 %v302_v57  ;;  %v306_v6 = vmax.f32 %v201_v60, 0.0 }
 0x108   :  { %v308_v4 = vmax.f32 %v290_v63, 0.0  ;;  %v307_v5 = vmax.f32 %v203_v0, 0.0  ;;  %541 = vmatmul.mubr.f32.gmra.mrb[12].mxu1 %v304_v54 }
 0x109   :  { %v309_v7 = vmax.f32 %v292_v2, 0.0 }
 0x10a   :  { %460 = vmatprep.mubr.f32.mxu0 %v307_v5 }
 0x10b   :  { %545 = vmatprep.mubr.f32.mxu1 %v309_v7  ;;  %461 = vmatmul.mubr.f32.gmra.mrb[14].mxu0 %v306_v6 }
 0x10c   :  { %546 = vmatmul.mubr.f32.gmra.mrb[14].mxu1 %v308_v4 }
 0x1d2   :  { %v665_v8 = vpop.f32.mrb[8].mxu0 }
 0x1d3   :  { %v709_v10 = vpop.f32.mrb[8].mxu1  ;;  %v666_v12 = vpop.f32.mrb[9].mxu0 }
 0x1d4   :  { %v667_v13 = vadd.f32 %v666_v12, %v665_v8  ;;  %v710_v14 = vpop.f32.mrb[9].mxu1 }
 0x1d5   :  { %v711_v15 = vadd.f32 %v710_v14, %v709_v10  ;;  %v631_v10 = vld [vmem:[%s1352_s5] ss:$0 sm:$0xff] }
 0x1d6   :  { %v448_v16 = vadd.f32 %v667_v13, %v630_v11  ;;  %v668_v17 = vpop.f32.mrb[10].mxu0  ;;  %v632_v13 = vld [vmem:[%s1353_s6] ss:$0 sm:$0xff] }
 0x1d7   :  { %v712_v18 = vpop.f32.mrb[10].mxu1  ;;  %v669_v19 = vpop.f32.mrb[11].mxu0 }
 0x1d8   :  { %v533_v20 = vadd.f32 %v711_v15, %v448_v16  ;;  %v670_v21 = vadd.f32 %v669_v19, %v668_v17  ;;  %v713_v23 = vpop.f32.mrb[11].mxu1 }
 0x1d9   :  { %v714_v24 = vadd.f32 %v713_v23, %v712_v18 }
 0x1da   :  { %v453_v25 = vadd.f32 %v670_v21, %v630_v11  ;;  %v671_v26 = vpop.f32.mrb[12].mxu0  ;;  %v551_v27 = vadd.f32 %v533_v20, %v1126_v46 }
 0x1db   :  { %v715_v28 = vpop.f32.mrb[12].mxu1  ;;  %v672_v29 = vpop.f32.mrb[13].mxu0 }
 0x1dc   :  { %v538_v30 = vadd.f32 %v714_v24, %v453_v25  ;;  %v673_v3 = vadd.f32 %v672_v29, %v671_v26  ;;  %v716_v31 = vpop.f32.mrb[13].mxu1  ;;  %555 = vadd.xlane.f32.xlu0 %v551_v27 }
 0x1dd   :  { %v717_v32 = vadd.f32 %v716_v31, %v715_v28 }
 0x1de   :  { %v458_v33 = vadd.f32 %v673_v3, %v630_v11  ;;  %v674_v34 = vpop.f32.mrb[14].mxu0  ;;  %v552_v35 = vadd.f32 %v538_v30, %v1158_v59 }
 0x1df   :  { %v718_v36 = vpop.f32.mrb[14].mxu1  ;;  %v675_v37 = vpop.f32.mrb[15].mxu0 }
 0x1e0   :  { %v543_v38 = vadd.f32 %v717_v32, %v458_v33  ;;  %v676_v39 = vadd.f32 %v675_v37, %v674_v34  ;;  %v719_v40 = vpop.f32.mrb[15].mxu1  ;;  %557 = vadd.xlane.f32.xlu0 %v552_v35 }
 0x1e1   :  { %v720_v41 = vadd.f32 %v719_v40, %v718_v36 }
 0x1e2   :  { %v463_v42 = vadd.f32 %v676_v39, %v630_v11  ;;  %v553_v46 = vadd.f32 %v543_v38, %v1191_v9 }
 0x1e4   :  { %v548_v43 = vadd.f32 %v720_v41, %v463_v42  ;;  %559 = vadd.xlane.f32.xlu1 %v553_v46 }
 0x1e6   :  { %v554_v44 = vadd.f32 %v548_v43, %v1224_v22 }
 0x1e8   :  { %561 = vadd.xlane.f32.xlu1 %v554_v44 }
 0x269   :  { %v556_v45 = vpop.xlane.xlu0 %555 }
 0x26a   :  { %v564_v47 = vmul.f32 0.0078125, %v556_v45 }
 0x26c   :  { %v568_v48 = vsub.f32 %v551_v27, %v564_v47 }
 0x26d   :  { %v558_v49 = vpop.xlane.xlu0 %557 }
 0x26e   :  { %v565_v59 = vmul.f32 0.0078125, %v558_v49  ;;  %v572_v50 = vmul.f32 %v568_v48, %v568_v48 }
 0x270   :  { %v569_v51 = vsub.f32 %v552_v35, %v565_v59  ;;  %576 = vadd.xlane.f32.xlu0 %v572_v50 }
 0x271   :  { %v560_v52 = vpop.xlane.xlu1 %559 }
 0x272   :  { %v566_v53 = vmul.f32 0.0078125, %v560_v52  ;;  %v573_v54 = vmul.f32 %v569_v51, %v569_v51 }
 0x274   :  { %v570_v55 = vsub.f32 %v553_v46, %v566_v53  ;;  %578 = vadd.xlane.f32.xlu1 %v573_v54 }
 0x275   :  { %v562_v56 = vpop.xlane.xlu1 %561 }
 0x276   :  { %v567_v9 = vmul.f32 0.0078125, %v562_v56  ;;  %v574_v57 = vmul.f32 %v570_v55, %v570_v55 }
 0x278   :  { %v571_v58 = vsub.f32 %v554_v44, %v567_v9  ;;  %580 = vadd.xlane.f32.xlu0 %v574_v57 }
 0x27a   :  { %v575_v22 = vmul.f32 %v571_v58, %v571_v58 }
 0x27c   :  { %582 = vadd.xlane.f32.xlu1 %v575_v22 }
 0x2fd   :  { %v577_v60 = vpop.xlane.xlu0 %576 }
 0x2fe   :  { %v584_v61 = vmul.f32 0.0078125, %v577_v60 }
 0x300   :  { %v588_v62 = vadd.f32 1e-05, %v584_v61 }
 0x301   :  { %v579_v63 = vpop.xlane.xlu1 %578 }
 0x302   :  { %850 = vrsqrt.f32 %v588_v62  ;;  %v585_v0 = vmul.f32 0.0078125, %v579_v63 }
 0x304   :  { %v589_v1 = vadd.f32 1e-05, %v585_v0 }
 0x305   :  { %v581_v2 = vpop.xlane.xlu0 %580 }
 0x306   :  { %852 = vrsqrt.f32 %v589_v1  ;;  %v586_v4 = vmul.f32 0.0078125, %v581_v2 }
 0x308   :  { %v590_v5 = vadd.f32 1e-05, %v586_v4 }
 0x309   :  { %v583_v6 = vpop.xlane.xlu1 %582 }
 0x30a   :  { %854 = vrsqrt.f32 %v590_v5  ;;  %v587_v7 = vmul.f32 0.0078125, %v583_v6 }
 0x30c   :  { %v851_v8 = vpop.eup %850  ;;  %v591_v11 = vadd.f32 1e-05, %v587_v7 }
 0x30d   :  { %v596_v12 = vmul.f32 %v851_v8, %v568_v48 }
 0x30e   :  { %856 = vrsqrt.f32 %v591_v11 }
 0x30f   :  { %v607_v14 = vmul.f32 %v631_v10, %v596_v12 }
 0x310   :  { %v853_v15 = vpop.eup %852 }
 0x311   :  { %v618_v16 = vadd.f32 %v632_v13, %v607_v14  ;;  %v597_v17 = vmul.f32 %v853_v15, %v569_v51 }
 0x313   :  { %622 = vst [vmem:[%s1354_s7] sm:$0xff] %v618_v16  ;;  %v608_v18 = vmul.f32 %v631_v10, %v597_v17 }
 0x314   :  { %v855_v19 = vpop.eup %854 }
 0x315   :  { %v619_v20 = vadd.f32 %v632_v13, %v608_v18  ;;  %v598_v21 = vmul.f32 %v855_v19, %v570_v55 }
 0x317   :  { %623 = vst [vmem:[%s1354_s7 + $0x8] sm:$0xff] %v619_v20  ;;  %v609_v23 = vmul.f32 %v631_v10, %v598_v21 }
 0x318   :  { %v857_v24 = vpop.eup %856 }
 0x319   :  { %v620_v25 = vadd.f32 %v632_v13, %v609_v23  ;;  %v599_v26 = vmul.f32 %v857_v24, %v571_v58 }
 0x31b   :  { %624 = vst [vmem:[%s1354_s7 + $0x10] sm:$0xff] %v620_v25  ;;  %v610_v27 = vmul.f32 %v631_v10, %v599_v26 }
 0x31d   :  { %v621_v28 = vadd.f32 %v632_v13, %v610_v27 }
 0x31f   :  { %625 = vst [vmem:[%s1354_s7 + $0x18] sm:$0xff] %v621_v28 }

// kernel: transformer_forward.10
= control target key start
LH: loop header
LB: loop body
LE: loop exit
PB: predicated region body
PF: predicated region fallthrough
CT: control target
= control target key end

     0   :  { %s3614_s0 = inlined_call_operand.hbm [shape: f32[2,16,128], index: 0, kind: input, shape index: {}, may-alias: {0,1}]   ;;  %s3615_s1 = inlined_call_operand.hbm [shape: f32[2,16,128], index: 1, kind: input, shape index: {}, may-alias: {0,1}]   ;;  %s3616_s2 = inlined_call_operand.hbm [shape: f32[128,128], index: 2, kind: input, shape index: {}]   ;;  %s3617_s3 = inlined_call_operand.hbm [shape: f32[1,128], index: 3, kind: input, shape index: {}]   ;;  %s3618_s4 = inlined_call_operand.hbm [shape: f32[128,128], index: 4, kind: input, shape index: {}]   ;;  %s3619_s5 = inlined_call_operand.hbm [shape: f32[1,128], index: 5, kind: input, shape index: {}]   ;;  %s3620_s6 = inlined_call_operand.hbm [shape: f32[128,128], index: 6, kind: input, shape index: {}]   ;;  %s3621_s7 = inlined_call_operand.vmem [shape: f32[1,128], index: 7, kind: input, shape index: {}]   ;;  %s3622_s8 = inlined_call_operand.hbm [shape: f32[128,128], index: 8, kind: input, shape index: {}]   ;;  %s3623_s9 = inlined_call_operand.hbm [shape: f32[1,128], index: 9, kind: input, shape index: {}]   ;;  %s3624_s10 = inlined_call_operand.vmem [shape: f32[1,128], index: 10, kind: input, shape index: {}]   ;;  %s3625_s11 = inlined_call_operand.vmem [shape: f32[1,128], index: 11, kind: input, shape index: {}]   ;;  %s3626_s12 = inlined_call_operand.vmem [shape: f32[2,16,128], index: 12, kind: output, shape index: {}]  }
   0x1   :  { %3633 = sst [smem:[#allocation22_spill]] %s3616_s2 }
   0x2   :  { %3634 = sst [smem:[#allocation23_spill]] %s3617_s3 }
   0x3   :  { %3635 = sst [smem:[#allocation24_spill]] %s3621_s7 }
   0x4   :  { %3636 = sst [smem:[#allocation25_spill]] %s3624_s10 }
   0x5   :  { %3637 = sst [smem:[#allocation26_spill]] %s3625_s11 }
   0x6   :  { %3638 = sst [smem:[#allocation27_spill]] %s3626_s12 }
   0x7   :  { %17 = vsyncpa [#allocation3], 0 }
   0x8   :  { %19 = vsyncpa [#allocation3 + $0x1], 0 }
   0x9   :  { %20 = vsyncpa [#allocation5], 0 }
   0xa   :  { %22 = vsyncpa [#allocation5 + $0x1], 0 }
   0xb   :  { %23 = vsyncpa [#allocation8], 0 }
   0xc   :  { %24 = vsyncpa [#allocation11], 0 }
   0xd   :  { %25 = vsyncpa [#allocation14], 0  ;;  %s3117_s21 = smov 0   ;;  %s3119_s22 = smov 0  }
   0xe   :  { %s3121_s23 = smov 0   ;;  %s3123_s24 = smov 0  }
   0xf LB: > { %s3038_s25 = smov [#allocation6]   ;;  %s3138_s27 = sadd.s32 4294967295, %s3036_s24   ;;  %s3036_s24 = sphi %s3123_s24, %s3667_s24   ;;  %s3032_s23 = sphi %s3121_s23, %s3666_s23   ;;  %s3028_s22 = sphi %s3119_s22, %s3665_s22   ;;  %s3024_s21 = sphi %s3117_s21, %s3664_s21  }
  0x10   : > { %s336_s26 = sshll.u32 %s3038_s25, 4  ;;  %p1995_p0 = scmp.ge.s32.totalorder %s3036_s24, 1  ;;  %s3143_s26 = int_to_ptr.vmem [resolvable:$true] %s336_s26 }
  0x11   : > { %p3629_p1 = scmp.eq.s32.totalorder %s3138_s27, 0  ;;  %p324_p2 = scmp.lt.s32.totalorder %s3036_s24, 3 }
  0x12   : > { %s3039_s29 = smov [#allocation7]   ;;  %s3040_s14 = smov [#allocation10]  }
  0x13   : > { %p3145_p3 = pnand %p1995_p0, %p324_p2  ;;  %s350_s30 = sshll.u32 %s3039_s29, 4  ;;  %s3157_s30 = int_to_ptr.vmem [resolvable:$true] %s350_s30 }
  0x14   : > { %s374_s15 = sshll.u32 %s3040_s14, 4  ;;  %s3641_s2 = sld [smem:[#allocation22_spill]]  ;;  %s3159_s15 = int_to_ptr.vmem [resolvable:$true] %s374_s15 }
  0x15   : > { %s3639_s28 = scalar_select %p3145_p3, 1, 0 }
  0x16   : > { %p2557_p4 = pneg %p3145_p3 }
  0x18   : > { %p3153_p5 = pnand %p2557_p4, %p3629_p1 }
  0x1a   : > { %s2726_s18 = scalar_lea.hbm %s3641_s2, 2048  ;;  %p3169_p7 = pneg %p3153_p5 }
  0x1b   : > { %p2727_p6 = scmp.ne.s32.totalorder %s3641_s2, %s2726_s18  ;;  %p2733_p10 = scmp.lt.u32.totalorder %s2726_s18, %s3641_s2 }
  0x1d   : > { %p2729_p8 = pnand %p3169_p7, %p2727_p6 }
  0x1f   : > { %p2730_p9 = pneg %p2729_p8 }
  0x21   : > { %p2735_p11 = pnand %p2733_p10, %p2730_p9 }
  0x23   : > { %2738 = shalt.err (!%p2735_p11)
}
  0x24   : > { %s2739_s16 = scalar_lea.vmem %s3143_s26, 2048  ;;  %p2747_p2 = scmp.lt.s32.totalorder %s3143_s26, %s3143_s26 }
  0x25   : > { %p2740_p12 = scmp.ne.s32.totalorder %s3143_s26, %s2739_s16  ;;  %p2748_p4 = scmp.lt.s32.totalorder %s2739_s16, %s2739_s16 }
  0x27   : > { %p2742_p13 = pnand %p2740_p12, %p3169_p7  ;;  %p2749_p6 = por %p2748_p4, %p2747_p2 }
  0x29   : > { %p2743_p0 = pneg %p2742_p13 }
  0x2b   : > { %p2750_p8 = pnand %p2749_p6, %p2743_p0 }
  0x2d   : > { %2753 = shalt.err (!%p2750_p8)
}
  0x2e   : > { %s3627_s17 = smov 128   ;;  %s3631_s18 = smov 8  }
  0x2f   : > { %2560 = dma.hbm_to_vmem [thread:$0]  (!%p3153_p5), %s3641_s2, 2048, %s3143_s26, [#allocation5], %s3627_s17, %s3627_s17, %s3631_s18  }
  0x30   : > { %s3643_s3 = sld [smem:[#allocation23_spill]] }
  0x36   : > { %s2754_s16 = scalar_lea.hbm %s3643_s3, 16 }
  0x37   : > { %p2755_p9 = scmp.ne.s32.totalorder %s3643_s3, %s2754_s16  ;;  %p2761_p12 = scmp.lt.u32.totalorder %s2754_s16, %s3643_s3 }
  0x39   : > { %p2757_p10 = pnand %p2755_p9, %p3169_p7 }
  0x3b   : > { %p2758_p11 = pneg %p2757_p10 }
  0x3d   : > { %p2763_p13 = pnand %p2761_p12, %p2758_p11 }
  0x3f   : > { %2766 = shalt.err (!%p2763_p13)
}
  0x40   : > { %s2767_s26 = scalar_lea.vmem %s3157_s30, 16  ;;  %s2774_s11 = scalar_lea.vmem %s3157_s30, 32 }
  0x41   : > { %p2768_p0 = scmp.ne.s32.totalorder %s3157_s30, %s2767_s26  ;;  %p2775_p6 = scmp.lt.s32.totalorder %s3157_s30, %s3157_s30 }
  0x42   : > { %p2776_p8 = scmp.lt.s32.totalorder %s2774_s11, %s2767_s26 }
  0x43   : > { %p2770_p2 = pnand %p2768_p0, %p3169_p7 }
  0x44   : > { %p2777_p9 = por %p2776_p8, %p2775_p6 }
  0x45   : > { %p2771_p4 = pneg %p2770_p2 }
  0x47   : > { %p2778_p10 = pnand %p2777_p9, %p2771_p4 }
  0x49   : > { %2781 = shalt.err (!%p2778_p10)
}
  0x4a   : > { %2563 = dma.hbm_to_vmem [thread:$0]  (!%p3153_p5), %s3643_s3, 16, %s3157_s30, [#allocation8]  }
  0x4b   : > { %s2782_s20 = scalar_lea.hbm %s3619_s5, 16 }
  0x4c   : > { %p2783_p11 = scmp.ne.s32.totalorder %s3619_s5, %s2782_s20  ;;  %p2789_p0 = scmp.lt.u32.totalorder %s2782_s20, %s3619_s5 }
  0x4e   : > { %p2785_p12 = pnand %p2783_p11, %p3169_p7 }
  0x50   : > { %p2786_p13 = pneg %p2785_p12 }
  0x52   : > { %p2791_p2 = pnand %p2789_p0, %p2786_p13 }
  0x54   : > { %2794 = shalt.err (!%p2791_p2)
}
  0x55   : > { %s2795_s30 = scalar_lea.vmem %s3159_s15, 16  ;;  %s2802_s11 = scalar_lea.vmem %s3159_s15, 32 }
  0x56   : > { %p2796_p4 = scmp.ne.s32.totalorder %s3159_s15, %s2795_s30  ;;  %p2803_p9 = scmp.lt.s32.totalorder %s3159_s15, %s3159_s15 }
  0x57   : > { %p2804_p10 = scmp.lt.s32.totalorder %s2802_s11, %s2795_s30 }
  0x58   : > { %p2798_p6 = pnand %p2796_p4, %p3169_p7 }
  0x59   : > { %p2805_p11 = por %p2804_p10, %p2803_p9 }
  0x5a   : > { %p2799_p8 = pneg %p2798_p6 }
  0x5c   : > { %p2806_p12 = pnand %p2805_p11, %p2799_p8 }
  0x5e   : > { %2809 = shalt.err (!%p2806_p12)
}
  0x5f   : > { %2569 = dma.hbm_to_vmem [thread:$0]  (!%p3153_p5), %s3619_s5, 16, %s3159_s15, [#allocation11]  }
  0x60   : > { %s3043_s12 = smov [#allocation13]   ;;  %s3044_s20 = smov [#allocation9]  }
  0x61   : > { %s400_s19 = sshll.u32 %s3043_s12, 4  ;;  %s360_s29 = sshll.u32 %s3044_s20, 4  ;;  %s401_s19 = int_to_ptr.vmem [resolvable:$true] %s400_s19  ;;  %s361_s29 = int_to_ptr.vmem [resolvable:$true] %s360_s29 }
  0x62   : > { %s2810_s26 = scalar_lea.hbm %s3622_s8, 2048 }
  0x63   : > { %p2811_p13 = scmp.ne.s32.totalorder %s3622_s8, %s2810_s26  ;;  %p2817_p4 = scmp.lt.u32.totalorder %s2810_s26, %s3622_s8 }
  0x65   : > { %p2813_p0 = pnand %p2811_p13, %p3169_p7 }
  0x67   : > { %p2814_p2 = pneg %p2813_p0 }
  0x69   : > { %p2819_p6 = pnand %p2817_p4, %p2814_p2 }
  0x6b   : > { %2822 = shalt.err (!%p2819_p6)
}
  0x6c   : > { %s2823_s15 = scalar_lea.vmem %s401_s19, 2048  ;;  %p2831_p11 = scmp.lt.s32.totalorder %s401_s19, %s401_s19 }
  0x6d   : > { %p2824_p8 = scmp.ne.s32.totalorder %s401_s19, %s2823_s15  ;;  %p2832_p12 = scmp.lt.s32.totalorder %s2823_s15, %s2823_s15 }
  0x6f   : > { %p2826_p9 = pnand %p2824_p8, %p3169_p7  ;;  %p2833_p1 = por %p2832_p12, %p2831_p11 }
  0x71   : > { %p2827_p10 = pneg %p2826_p9 }
  0x73   : > { %p2834_p3 = pnand %p2833_p1, %p2827_p10 }
  0x75   : > { %2837 = shalt.err (!%p2834_p3)
}
  0x76   : > { %s3644_s10 = smov 128   ;;  %s2838_s16 = scalar_lea.hbm %s3618_s4, 2048 }
  0x77   : > { %2575 = dma.hbm_to_vmem [thread:$0]  (!%p3153_p5), %s3622_s8, 2048, %s401_s19, [#allocation14], %s3644_s10, %s3644_s10, %s3631_s18  }
  0x78   : > { %p2839_p1 = scmp.ne.s32.totalorder %s3618_s4, %s2838_s16  ;;  %p2845_p0 = scmp.lt.u32.totalorder %s2838_s16, %s3618_s4 }
  0x7a   : > { %p2841_p3 = pnand %p2839_p1, %p3169_p7 }
  0x7c   : > { %p2842_p13 = pneg %p2841_p3 }
  0x7e   : > { %p2847_p2 = pnand %p2845_p0, %p2842_p13 }
  0x80   : > { %2850 = shalt.err (!%p2847_p2)
}
  0x81   : > { %s2851_s15 = scalar_lea.vmem %s361_s29, 2048  ;;  %p2859_p9 = scmp.lt.s32.totalorder %s361_s29, %s361_s29 }
  0x82   : > { %p2852_p4 = scmp.ne.s32.totalorder %s361_s29, %s2851_s15  ;;  %p2860_p10 = scmp.lt.s32.totalorder %s2851_s15, %s2851_s15 }
  0x84   : > { %p2854_p6 = pnand %p2852_p4, %p3169_p7  ;;  %p2861_p11 = por %p2860_p10, %p2859_p9 }
  0x86   : > { %p2855_p8 = pneg %p2854_p6 }
  0x88   : > { %p2862_p12 = pnand %p2861_p11, %p2855_p8 }
  0x8a   : > { %2865 = shalt.err (!%p2862_p12)
}
  0x8b   : > { %2566 = dma.hbm_to_vmem [thread:$0]  (!%p3153_p5), %s3618_s4, 2048, %s361_s29, [#allocation8], %s3644_s10, %s3644_s10, %s3631_s18  }
  0x8c   : > { %s3045_s12 = smov [#allocation12]   ;;  %s3046_s14 = smov [#allocation15]  }
  0x8d   : > { %s384_s20 = sshll.u32 %s3045_s12, 4  ;;  %s414_s16 = sshll.u32 %s3046_s14, 4  ;;  %s385_s20 = int_to_ptr.vmem [resolvable:$true] %s384_s20  ;;  %s415_s16 = int_to_ptr.vmem [resolvable:$true] %s414_s16 }
  0x8e   : > { %s2866_s11 = scalar_lea.hbm %s3620_s6, 2048 }
  0x8f   : > { %p2867_p1 = scmp.ne.s32.totalorder %s3620_s6, %s2866_s11  ;;  %p2873_p0 = scmp.lt.u32.totalorder %s2866_s11, %s3620_s6 }
  0x91   : > { %p2869_p3 = pnand %p2867_p1, %p3169_p7 }
  0x93   : > { %p2870_p13 = pneg %p2869_p3 }
  0x95   : > { %p2875_p2 = pnand %p2873_p0, %p2870_p13 }
  0x97   : > { %2878 = shalt.err (!%p2875_p2)
}
  0x98   : > { %s2879_s29 = scalar_lea.vmem %s385_s20, 2048  ;;  %p2887_p9 = scmp.lt.s32.totalorder %s385_s20, %s385_s20 }
  0x99   : > { %p2880_p4 = scmp.ne.s32.totalorder %s385_s20, %s2879_s29  ;;  %p2888_p10 = scmp.lt.s32.totalorder %s2879_s29, %s2879_s29 }
  0x9b   : > { %p2882_p6 = pnand %p2880_p4, %p3169_p7  ;;  %p2889_p11 = por %p2888_p10, %p2887_p9 }
  0x9d   : > { %p2883_p8 = pneg %p2882_p6 }
  0x9f   : > { %p2890_p12 = pnand %p2889_p11, %p2883_p8 }
  0xa1   : > { %2893 = shalt.err (!%p2890_p12)
}
  0xa2   : > { %2572 = dma.hbm_to_vmem [thread:$0]  (!%p3153_p5), %s3620_s6, 2048, %s385_s20, [#allocation11], %s3644_s10, %s3644_s10, %s3631_s18  }
  0xa3   : > { %s2894_s26 = scalar_lea.hbm %s3623_s9, 16 }
  0xa4   : > { %p2895_p1 = scmp.ne.s32.totalorder %s3623_s9, %s2894_s26  ;;  %p2901_p0 = scmp.lt.u32.totalorder %s2894_s26, %s3623_s9 }
  0xa6   : > { %p2897_p3 = pnand %p2895_p1, %p3169_p7 }
  0xa8   : > { %p2898_p13 = pneg %p2897_p3 }
  0xaa   : > { %p2903_p2 = pnand %p2901_p0, %p2898_p13 }
  0xac   : > { %2906 = shalt.err (!%p2903_p2)
}
  0xad   : > { %s2907_s19 = scalar_lea.vmem %s415_s16, 16  ;;  %s2914_s20 = scalar_lea.vmem %s415_s16, 32 }
  0xae   : > { %p2908_p4 = scmp.ne.s32.totalorder %s415_s16, %s2907_s19  ;;  %p2915_p9 = scmp.lt.s32.totalorder %s415_s16, %s415_s16 }
  0xaf   : > { %p2916_p10 = scmp.lt.s32.totalorder %s2914_s20, %s2907_s19 }
  0xb0   : > { %p2910_p6 = pnand %p2908_p4, %p3169_p7 }
  0xb1   : > { %p2917_p11 = por %p2916_p10, %p2915_p9 }
  0xb2   : > { %p2911_p8 = pneg %p2910_p6 }
  0xb4   : > { %p2918_p12 = pnand %p2917_p11, %p2911_p8 }
  0xb6   : > { %2921 = shalt.err (!%p2918_p12)
}
  0xb7   : > { %2578 = dma.hbm_to_vmem [thread:$0]  (!%p3153_p5), %s3623_s9, 16, %s415_s16, [#allocation14]  }
  0xb8   : > { %s3323_s25 = sadd.s32 1, %s3036_s24   ;;  %s38_s17 = sadd.s32 1, %s3032_s23 }
  0xb9   : > { %s35_s13 = ssub.s32 %s3036_s24, %s3323_s25  ;;  %p45_p1 = scmp.ne.s32.totalorder %s3032_s23, %s3028_s22 }
  0xba   : > { %p36_p7 = scmp.eq.s32.totalorder %s35_s13, 0  ;;  %p46_p3 = scmp.eq.s32.totalorder %s3036_s24, 0 }
  0xbb   : > { %p51_p13 = scmp.ne.s32.totalorder %s3028_s22, %s3024_s21  ;;  %p3645_p2 = scmp.eq.s32.totalorder %s3138_s27, 0 }
  0xbc   : > { %s3334_s12 = scalar_select %p36_p7, %s3032_s23, %s38_s17  }
  0xbd   : > { %p47_p0 = por %p46_p3, %p45_p1  ;;  %p3338_p4 = por %p3645_p2, %p51_p13 }
  0xbe   : > { %p2593_p6 = scmp.lt.s32.totalorder %s3036_s24, 2  ;;  %s431_s26 = sand.u32 1, %s3032_s23  }
  0xbf   : > { %s2004_s16 = sshll.u32 %s431_s26, 4  ;;  %s2054_s30 = sshll.u32 %s3036_s24, 8 }
  0xc0   : > { %s3348_s15 = scalar_lea.hbm %s3614_s0, %s2054_s30  ;;  %s435_s21 = scalar_lea.vmem [#allocation2], %s2004_s16 }
  0xc1   : > { %s442_s19 = sshll.u32 %s435_s21, 4  ;;  %p3352_p5 = pnand %p2593_p6, %p47_p0  ;;  %s3350_s19 = int_to_ptr.vmem [resolvable:$true] %s442_s19 }
  0xc2   : > { %s3359_s13 = scalar_lea.hbm %s3615_s1, %s2054_s30  ;;  %s456_s17 = scalar_lea.vmem [#allocation4], %s2004_s16 }
  0xc3   : > { %s3361_s11 = sshll.u32 %s456_s17, 4  ;;  %s3363_s7 = scalar_lea.sflag [#allocation3], %s431_s26  ;;  %s3395_s11 = int_to_ptr.vmem [resolvable:$true] %s3361_s11 }
  0xc4   : > { %s2922_s21 = scalar_lea.hbm %s3348_s15, 256  ;;  %p2924_p9 = pneg %p3352_p5 }
  0xc5   : > { %p2923_p8 = scmp.ne.s32.totalorder %s3348_s15, %s2922_s21  ;;  %s2927_s29 = scalar_lea.hbm %s3614_s0, 512 }
  0xc6   : > { %p2928_p12 = scmp.lt.u32.totalorder %s3348_s15, %s3614_s0  ;;  %p2929_p7 = scmp.lt.u32.totalorder %s2927_s29, %s2922_s21 }
  0xc7   : > { %p2925_p10 = pnand %p2924_p9, %p2923_p8  ;;  %p2931_p3 = scmp.lt.u32.totalorder %s2922_s21, %s3348_s15 }
  0xc8   : > { %p2930_p1 = por %p2929_p7, %p2928_p12 }
  0xc9   : > { %p2926_p11 = pneg %p2925_p10 }
  0xca   : > { %p2932_p13 = por %p2931_p3, %p2930_p1 }
  0xcc   : > { %p2933_p0 = pnand %p2932_p13, %p2926_p11 }
  0xce   : > { %2936 = shalt.err (!%p2933_p0)
}
  0xcf   : > { %s2937_s26 = scalar_lea.vmem %s3350_s19, 256  ;;  %s3047_s3 = smov [#allocation2]  }
  0xd0   : > { %p2938_p2 = scmp.ne.s32.totalorder %s3350_s19, %s2937_s26  ;;  %s2942_s18 = sshll.u32 %s3047_s3, 4  ;;  %s2943_s18 = int_to_ptr.vmem [resolvable:$false] %s2942_s18 }
  0xd1   : > { %s2944_s16 = scalar_lea.vmem %s2943_s18, 512  ;;  %p2945_p10 = scmp.lt.s32.totalorder %s3350_s19, %s2943_s18 }
  0xd2   : > { %p2940_p6 = pnand %p2938_p2, %p2924_p9  ;;  %p2946_p12 = scmp.lt.s32.totalorder %s2944_s16, %s2937_s26 }
  0xd4   : > { %p2941_p8 = pneg %p2940_p6  ;;  %p2947_p7 = por %p2946_p12, %p2945_p10 }
  0xd6   : > { %p2948_p1 = pnand %p2947_p7, %p2941_p8 }
  0xd8   : > { %2951 = shalt.err (!%p2948_p1)
}
  0xd9   : > { %s3648_s17 = smov 8   ;;  %s452_s21 = sand.u32 1, %s3036_s24  }
  0xda   : > { %2582 = dma.hbm_to_vmem [thread:$0]  (!%p3352_p5), %s3348_s15, 256, %s3350_s19, %s3363_s7, %s3644_s10, %s3644_s10, %s3648_s17  }
  0xdb   : > { %s3398_s29 = scalar_lea.sflag [#allocation5], %s452_s21  ;;  %s2952_s2 = scalar_lea.hbm %s3359_s13, 256 }
  0xdc   : > { %p2953_p11 = scmp.ne.s32.totalorder %s3359_s13, %s2952_s2  ;;  %s2957_s3 = scalar_lea.hbm %s3615_s1, 512 }
  0xdd   : > { %p2958_p0 = scmp.lt.u32.totalorder %s3359_s13, %s3615_s1  ;;  %p2959_p2 = scmp.lt.u32.totalorder %s2957_s3, %s2952_s2 }
  0xde   : > { %p2955_p3 = pnand %p2953_p11, %p2924_p9  ;;  %p2961_p8 = scmp.lt.u32.totalorder %s2952_s2, %s3359_s13 }
  0xdf   : > { %p2960_p6 = por %p2959_p2, %p2958_p0 }
  0xe0   : > { %p2956_p13 = pneg %p2955_p3 }
  0xe1   : > { %p2962_p10 = por %p2961_p8, %p2960_p6 }
  0xe3   : > { %p2963_p12 = pnand %p2962_p10, %p2956_p13 }
  0xe5   : > { %2966 = shalt.err (!%p2963_p12)
}
  0xe6   : > { %s2967_s24 = scalar_lea.vmem %s3395_s11, 256  ;;  %s3048_s15 = smov [#allocation4]  }
  0xe7   : > { %p2968_p7 = scmp.ne.s32.totalorder %s3395_s11, %s2967_s24  ;;  %s2972_s19 = sshll.u32 %s3048_s15, 4  ;;  %s2973_s19 = int_to_ptr.vmem [resolvable:$false] %s2972_s19 }
  0xe8   : > { %s2974_s7 = scalar_lea.vmem %s2973_s19, 512  ;;  %p2975_p3 = scmp.lt.s32.totalorder %s3395_s11, %s2973_s19 }
  0xe9   : > { %p2970_p1 = pnand %p2968_p7, %p2924_p9  ;;  %p2976_p0 = scmp.lt.s32.totalorder %s2974_s7, %s2967_s24 }
  0xeb   : > { %p2971_p11 = pneg %p2970_p1  ;;  %p2977_p2 = por %p2976_p0, %p2975_p3 }
  0xed   : > { %p2978_p6 = pnand %p2977_p2, %p2971_p11 }
  0xef   : > { %2981 = shalt.err (!%p2978_p6)
}
  0xf0   : > { %2585 = dma.hbm_to_vmem [thread:$0]  (!%p3352_p5), %s3359_s13, 256, %s3395_s11, %s3398_s29, %s3644_s10, %s3644_s10, %s3648_s17  }
  0xf1   : > { %p3649_p9 = scmp.ne.s32.totalorder %s3639_s28, 0 }
  0xf2   : > { %s477_s21 = sand.u32 (!%p3649_p9), 1, %s3028_s22  }
  0xf3   : > { %475 = sbr.rel (%p3649_p9) target bundleno = 3546 (0xdda), region = 68  ;;  %s3430_s2 = sshll.u32 (!%p3649_p9), %s477_s21, 4 }
  0xf4   : > { %s478_s30 = scalar_lea.sflag (!%p3649_p9), [#allocation3], %s477_s21  ;;  %s481_s26 = scalar_lea.vmem (!%p3649_p9), [#allocation2], %s3430_s2 }
  0xfa   : > { %2999 = dma.done.wait (%p3338_p4), %s478_s30, 256  }
  0xfb   : > { %3001 = vsyncadd (%p3338_p4), %s478_s30, 4294967040  ;;  %s486_s10 = sand.u32 1, %s3138_s27   ;;  %s490_s28 = scalar_lea.vmem [#allocation4], %s3430_s2 }
  0xfc   : > { %s487_s20 = scalar_lea.sflag [#allocation5], %s486_s10 }
  0xfd   : > { %3003 = dma.done.wait (%p3338_p4), %s487_s20, 256  }
  0xfe   : > { %3005 = vsyncadd (%p3338_p4), %s487_s20, 4294967040  ;;  %p3650_p5 = scmp.eq.s32.totalorder %s3138_s27, 0 }
 0x100   : > { %3007 = dma.done.wait (%p3650_p5), [#allocation5], 2048   ;;  %p3651_p13 = pmov %p3650_p5 }
 0x101   : > { %p3652_p8 = pmov %p3650_p5 }
 0x102   : > { %3009 = vsyncadd (%p3651_p13), [#allocation5], 4294965248 }
 0x103   : > { %3011 = dma.done.wait (%p3652_p8), [#allocation8], 2064   ;;  %p3653_p10 = pmov %p3650_p5 }
 0x104   : > { %p3654_p12 = pmov %p3650_p5 }
 0x105   : > { %3013 = vsyncadd (%p3653_p10), [#allocation8], 4294965232 }
 0x106   : > { %3015 = dma.done.wait (%p3654_p12), [#allocation11], 2064   ;;  %p3655_p7 = pmov %p3650_p5 }
 0x107   : > { %p3656_p4 = pmov %p3650_p5 }
 0x108   : > { %3017 = vsyncadd (%p3655_p7), [#allocation11], 4294965232 }
 0x109   : > { %3019 = dma.done.wait (%p3656_p4), [#allocation14], 2064   ;;  %p3657_p1 = pmov %p3656_p4 }
 0x10a   : > { %v671_v0 = vld [vmem:[#allocation9] sm:$0xff]  ;;  %v672_v1 = vld [vmem:[#allocation9 + $0x8] sm:$0xff]  ;;  %v673_v2 = vld [vmem:[#allocation9 + $0x10] sm:$0xff]  ;;  %vm869_vm0 = vcmask 261120   ;;  %s3049_s14 = smov 96   ;;  %vm957_vm2 = vcmask 130048  }
 0x10b   : > { %3021 = vsyncadd (%p3657_p1), [#allocation14], 4294965232  ;;  %v2389_v3 = vpack.c.bf16 %v672_v1, %v671_v0  ;;  %v674_v4 = vld [vmem:[#allocation9 + $0x18] sm:$0xff]  ;;  %v574_v6 = vld [vmem:[#allocation6 + $0x8] sm:$0xff]  ;;  %s3660_s17 = sld [smem:[#allocation24_spill]]  ;;  %s3050_s29 = smov 64  }
 0x10c   : > { %v573_v5 = vld [vmem:[#allocation6] sm:$0xff]  ;;  %v2393_v7 = vpack.c.bf16 %v674_v4, %v673_v2  ;;  %v676_v10 = vld [vmem:[#allocation9 + $0x28] sm:$0xff]  ;;  %v576_v12 = vld [vmem:[#allocation6 + $0x18] sm:$0xff]  ;;  %s3051_s3 = smov 32   ;;  %vm1689_vm3 = vcmask 523264   ;;  %vm1692_vm4 = vcmask 785408  }
 0x10d   : > { %v2357_v8 = vpack.c.bf16 %v574_v6, %v573_v5  ;;  %v675_v9 = vld [vmem:[#allocation9 + $0x20] sm:$0xff]  ;;  %v575_v11 = vld [vmem:[#allocation6 + $0x10] sm:$0xff]  ;;  %2390 = vmatprep.subr.bf16.mxu1 %v2389_v3  ;;  %v678_v18 = vld [vmem:[#allocation9 + $0x38] sm:$0xff]  ;;  %p564_p11 = scmp.lt.s32.totalorder %s3138_s27, 1  ;;  %s3661_s24 = sld [smem:[#allocation25_spill]] }
 0x10e   : > { %2392 = vmatpush3.bf16.msra.mxu1 %v2389_v3  ;;  %v2361_v13 = vpack.c.bf16 %v576_v12, %v575_v11  ;;  %v577_v14 = vld [vmem:[#allocation6 + $0x20] sm:$0xff]  ;;  %v578_v15 = vld [vmem:[#allocation6 + $0x28] sm:$0xff]  ;;  %v2397_v16 = vpack.c.bf16 %v676_v10, %v675_v9  ;;  %v677_v17 = vld [vmem:[#allocation9 + $0x30] sm:$0xff]  ;;  %s3662_s21 = sld [smem:[#allocation26_spill]] }
 0x10f   : > { %2358 = vmatprep.subr.bf16.mxu0 %v2357_v8  ;;  %2394 = vmatprep.subr.bf16.mxu1 %v2393_v7  ;;  %v2365_v19 = vpack.c.bf16 %v578_v15, %v577_v14  ;;  %v579_v20 = vld [vmem:[#allocation6 + $0x30] sm:$0xff]  ;;  %v580_v21 = vld [vmem:[#allocation6 + $0x38] sm:$0xff]  ;;  %v2401_v22 = vpack.c.bf16 %v678_v18, %v677_v17  ;;  %v679_v23 = vld [vmem:[#allocation9 + $0x40] sm:$0xff]  ;;  %s3669_s27 = smov (!%p564_p11, %s3138_s27), 1 }
 0x110   : > { %2360 = vmatpush3.bf16.msra.mxu0 %v2357_v8  ;;  %v680_v24 = vld [vmem:[#allocation9 + $0x48] sm:$0xff]  ;;  %v2369_v25 = vpack.c.bf16 %v580_v21, %v579_v20  ;;  %v581_v27 = vld [vmem:[#allocation6 + $0x40] sm:$0xff]  ;;  %v681_v31 = vld [vmem:[#allocation9 + $0x50] sm:$0xff]  ;;  %s2056_s15 = sshll.u32 %s3669_s27, 4 }
 0x111   : > { %2362 = vmatprep.subr.bf16.mxu0 %v2361_v13  ;;  %v571_v26 = vld [vmem:[%s490_s28] sm:$0xff]  ;;  %v582_v28 = vld [vmem:[#allocation6 + $0x48] sm:$0xff]  ;;  %v2405_v30 = vpack.c.bf16 %v680_v24, %v679_v23  ;;  %v584_v35 = vld [vmem:[#allocation6 + $0x58] sm:$0xff] }
 0x112   : > { %2396 = vmatpush3.bf16.msra.mxu1 %v2393_v7  ;;  %2228 = vmatprep.mubr.f32.mxu1 %v571_v26  ;;  %v3463_v29 = vld [vmem:[%s481_s26] sm:$0xff]  ;;  %v2373_v33 = vpack.c.bf16 %v582_v28, %v581_v27  ;;  %v586_v41 = vld [vmem:[#allocation6 + $0x68] sm:$0xff]  ;;  %v588_v47 = vld [vmem:[#allocation6 + $0x78] sm:$0xff] }
 0x113   : > { %2398 = vmatprep.subr.bf16.mxu1 %v2397_v16  ;;  %2193 = vmatprep.mubr.f32.mxu0 %v3463_v29  ;;  %v682_v32 = vld [vmem:[#allocation9 + $0x58] sm:$0xff]  ;;  %v583_v34 = vld [vmem:[#allocation6 + $0x50] sm:$0xff]  ;;  %v683_v37 = vld [vmem:[#allocation9 + $0x60] sm:$0xff] }
 0x114   : > { %2364 = vmatpush3.bf16.msra.mxu0 %v2361_v13  ;;  %v2409_v36 = vpack.c.bf16 %v682_v32, %v681_v31  ;;  %v684_v38 = vld [vmem:[#allocation9 + $0x68] sm:$0xff]  ;;  %v2377_v39 = vpack.c.bf16 %v584_v35, %v583_v34  ;;  %v585_v40 = vld [vmem:[#allocation6 + $0x60] sm:$0xff]  ;;  %v685_v43 = vld [vmem:[#allocation9 + $0x70] sm:$0xff] }
 0x115   : > { %2366 = vmatprep.subr.bf16.mxu0 %v2365_v19  ;;  %v2413_v42 = vpack.c.bf16 %v684_v38, %v683_v37  ;;  %v686_v44 = vld [vmem:[#allocation9 + $0x78] sm:$0xff]  ;;  %v2381_v45 = vpack.c.bf16 %v586_v41, %v585_v40  ;;  %v587_v46 = vld [vmem:[#allocation6 + $0x70] sm:$0xff]  ;;  %v769_v52 = vld [vmem:[#allocation12] sm:$0xff] }
 0x116   : > { %2400 = vmatpush3.bf16.msra.mxu1 %v2397_v16  ;;  %v2417_v48 = vpack.c.bf16 %v686_v44, %v685_v43  ;;  %v2385_v49 = vpack.c.bf16 %v588_v47, %v587_v46  ;;  %v3468_v50 = vld [vmem:[%s490_s28 + $0x8] sm:$0xff]  ;;  %v2023_v60 = vld [vmem:[#allocation10] ss:$0 sm:$0xff]  ;;  %v2022_v1 = vld [vmem:[#allocation7] ss:$0 sm:$0xff] }
 0x117   : > { %2402 = vmatprep.subr.bf16.mxu1 %v2401_v22  ;;  %v3472_v51 = vld [vmem:[%s481_s26 + $0x8] sm:$0xff]  ;;  %vm3478_vm1 = vmpackc.low %vm869_vm0, %vm869_vm0  ;;  %s3663_s26 = sld [smem:[#allocation27_spill]] }
 0x118   : > { %2368 = vmatpush3.bf16.msra.mxu0 %v2365_v19  ;;  %v770_v53 = vld [vmem:[#allocation12 + $0x8] sm:$0xff]  ;;  %v771_v54 = vld [vmem:[#allocation12 + $0x10] sm:$0xff]  ;;  %v772_v56 = vld [vmem:[#allocation12 + $0x18] sm:$0xff] }
 0x119   : > { %2370 = vmatprep.subr.bf16.mxu0 %v2369_v25  ;;  %v2421_v55 = vpack.c.bf16 %v770_v53, %v769_v52  ;;  %v2425_v57 = vpack.c.bf16 %v772_v56, %v771_v54  ;;  %v773_v58 = vld [vmem:[#allocation12 + $0x20] sm:$0xff]  ;;  %v774_v59 = vld [vmem:[#allocation12 + $0x28] sm:$0xff]  ;;  %v775_v62 = vld [vmem:[#allocation12 + $0x30] sm:$0xff] }
 0x11a   : > { %2404 = vmatpush3.bf16.msra.mxu1 %v2401_v22  ;;  %v2429_v61 = vpack.c.bf16 %v774_v59, %v773_v58  ;;  %v776_v63 = vld [vmem:[#allocation12 + $0x38] sm:$0xff]  ;;  %v777_v10 = vld [vmem:[#allocation12 + $0x40] sm:$0xff]  ;;  %v778_v11 = vld [vmem:[#allocation12 + $0x48] sm:$0xff] }
 0x11b   : > { %2406 = vmatprep.subr.bf16.mxu1 %v2405_v30  ;;  %v2433_v7 = vpack.c.bf16 %v776_v63, %v775_v62  ;;  %v2437_v15 = vpack.c.bf16 %v778_v11, %v777_v10  ;;  %v779_v16 = vld [vmem:[#allocation12 + $0x50] sm:$0xff]  ;;  %v780_v17 = vld [vmem:[#allocation12 + $0x58] sm:$0xff]  ;;  %v781_v20 = vld [vmem:[#allocation12 + $0x60] sm:$0xff] }
 0x11c   : > { %2372 = vmatpush3.bf16.msra.mxu0 %v2369_v25  ;;  %v2441_v19 = vpack.c.bf16 %v780_v17, %v779_v16  ;;  %v782_v21 = vld [vmem:[#allocation12 + $0x68] sm:$0xff]  ;;  %v783_v24 = vld [vmem:[#allocation12 + $0x70] sm:$0xff]  ;;  %v784_v25 = vld [vmem:[#allocation12 + $0x78] sm:$0xff] }
 0x11d   : > { %2374 = vmatprep.subr.bf16.mxu0 %v2373_v33  ;;  %v2445_v23 = vpack.c.bf16 %v782_v21, %v781_v20  ;;  %s568_s10 = scalar_lea.vmem %s3663_s26, %s2056_s15 }
 0x11e   : > { %2408 = vmatpush3.bf16.msra.mxu1 %v2405_v30 }
 0x11f   : > { %2410 = vmatprep.subr.bf16.mxu1 %v2409_v36 }
 0x120   : > { %2376 = vmatpush3.bf16.msra.mxu0 %v2373_v33  ;;  %v2024_v33 = vld [vmem:[%s3660_s17] ss:$0 sm:$0xff] }
 0x121   : > { %2378 = vmatprep.subr.bf16.mxu0 %v2377_v39 }
 0x122   : > { %2412 = vmatpush3.bf16.msra.mxu1 %v2409_v36 }
 0x123   : > { %2414 = vmatprep.subr.bf16.mxu1 %v2413_v42 }
 0x124   : > { %2380 = vmatpush3.bf16.msra.mxu0 %v2377_v39 }
 0x125   : > { %2382 = vmatprep.subr.bf16.mxu0 %v2381_v45 }
 0x126   : > { %2416 = vmatpush3.bf16.msra.mxu1 %v2413_v42 }
 0x127   : > { %2418 = vmatprep.subr.bf16.mxu1 %v2417_v48 }
 0x128   : > { %2384 = vmatpush3.bf16.msra.mxu0 %v2381_v45 }
 0x129   : > { %2386 = vmatprep.subr.bf16.mxu0 %v2385_v49 }
 0x12a   : > { %2420 = vmatpush3.bf16.msra.mxu1 %v2417_v48 }
 0x12c   : > { %2388 = vmatpush3.bf16.msra.mxu0 %v2385_v49 }
 0x12d   : > { %2229 = vmatmul.mubr.f32.vlgmr.msra.gmra.mrb[0].mxu1 %v3468_v50  ;;  %2422 = vmatprep.subr.bf16.mxu0 %v2421_v55 }
 0x12f   : > { %2194 = vmatmul.mubr.f32.vlgmr.msra.gmra.mrb[0].mxu0 %v3472_v51 }
 0x130   : > { %2263 = vmatprep.mubr.f32.mxu0 %v571_v26  ;;  %2424 = vmatpush3.bf16.msra.mxu0 %v2421_v55  ;;  %v2449_v26 = vpack.c.bf16 %v784_v25, %v783_v24 }
 0x131   : > { %2426 = vmatprep.subr.bf16.mxu0 %v2425_v57 }
 0x134   : > { %2428 = vmatpush3.bf16.msra.mxu0 %v2425_v57 }
 0x135   : > { %2430 = vmatprep.subr.bf16.mxu0 %v2429_v61 }
 0x138   : > { %2432 = vmatpush3.bf16.msra.mxu0 %v2429_v61 }
 0x139   : > { %2434 = vmatprep.subr.bf16.mxu0 %v2433_v7 }
 0x13c   : > { %2436 = vmatpush3.bf16.msra.mxu0 %v2433_v7 }
 0x13d   : > { %2438 = vmatprep.subr.bf16.mxu0 %v2437_v15 }
 0x140   : > { %2440 = vmatpush3.bf16.msra.mxu0 %v2437_v15 }
 0x141   : > { %2442 = vmatprep.subr.bf16.mxu0 %v2441_v19 }
 0x144   : > { %2444 = vmatpush3.bf16.msra.mxu0 %v2441_v19 }
 0x145   : > { %2446 = vmatprep.subr.bf16.mxu0 %v2445_v23 }
 0x148   : > { %2448 = vmatpush3.bf16.msra.mxu0 %v2445_v23 }
 0x149   : > { %2450 = vmatprep.subr.bf16.mxu0 %v2449_v26 }
 0x14c   : > { %2452 = vmatpush3.bf16.msra.mxu0 %v2449_v26 }
 0x14f   : > { %2264 = vmatmul.mubr.f32.vlgmr.msra.gmra.mrb[2].mxu0 %v3468_v50 }
 0x200   : > { %v2230_v0 = vpop.f32.mrb[0].mxu1 }
 0x201   : > { %v766_v2 = vadd.f32 %v2230_v0, %v2023_v60  ;;  %v760_v3 = vpop.f32.mrb[1].mxu1 }
 0x202   : > { %v2195_v4 = vpop.f32.mrb[0].mxu0  ;;  %v761_v5 = vadd.f32 %v2023_v60, %v760_v3 }
 0x203   : > { %v662_v6 = vpop.f32.mrb[1].mxu0  ;;  %v668_v18 = vadd.f32 %v2195_v4, %v2022_v1 }
 0x204   : > { %v663_v9 = vadd.f32 %v2022_v1, %v662_v6  ;;  %v2453_v12 = vpack.c.bf16 %v766_v2, %v761_v5  ;;  %v3482_v13 = vpack.i.bf16 %v766_v2, %v761_v5 }
 0x205   : > { %v3494_v22 = vmul.f32 0.17677669, %v668_v18 }
 0x206   : > { %v3484_v14 = vmul.f32 0.17677669, %v663_v9  ;;  %2455 = vmatprep.subr.msk.bf16.mxu1 %vm3478_vm1, %v2453_v12 }
 0x207   : > { %2458 = vmatpush3.bf16.xpose.msk.msra.mxu1 %vm3478_vm1, %v2453_v12 }
 0x208   : > { %1061 = vrot.lane.b32.xlu1 %v3484_v14, %s3049_s14  ;;  %2270 = vmatprep.mubr.msk.f32.mxu1 %vm869_vm0, %v3484_v14 }
 0x20e   : > { %2271 = vmatmul.mubr.msk.f32.vlgmr.msra.gmra.mrb[2].mxu1 %vm869_vm0, %v3494_v22 }
 0x222   : > { %v2265_v32 = vpop.f32.mrb[2].mxu0 }
 0x223   : > { %v858_v34 = vpop.f32.mrb[3].mxu0  ;;  %v864_v35 = vadd.f32 %v2265_v32, %v2024_v33 }
 0x224   : > { %v859_v36 = vadd.f32 %v2024_v33, %v858_v34 }
 0x226   : > { %v2459_v37 = vpack.c.bf16 %v864_v35, %v859_v36  ;;  %v3524_v3 = vpack.i.bf16 %v864_v35, %v859_v36 }
 0x228   : > { %2460 = vmatprep.subr.bf16.mxu1 %v2459_v37 }
 0x229   : > { %2462 = vmatpush3.bf16.msra.mxu1 %v2459_v37 }
 0x27a   : > { %v1062_v53 = vpop.permute.xlu1 %1061 }
 0x2e1   : > { %v2272_v27 = vpop.f32.mrb[2].mxu1 }
 0x2e2   : > { %v948_v28 = vpop.f32.mrb[3].mxu1  ;;  %v961_v31 = vsel %vm957_vm2, %v2272_v27, -inf }
 0x2e3   : > { %v958_v30 = vsel %vm957_vm2, %v948_v28, -inf }
 0x2e4   : > { %959 = vmax.xlane.f32.xlu0 %v958_v30 }
 0x2e8   : > { %962 = vmax.xlane.f32.xlu0 %v961_v31 }
 0x2fe   : > { %2646 = vrot.lane.b32.xlu0 %v3482_v13, %s3049_s14 }
 0x371   : > { %v960_v38 = vpop.xlane.xlu0 %959 }
 0x372   : > { %v964_v39 = vsub.f32 %v948_v28, %v960_v38 }
 0x374   : > { %v966_v42 = vmul.f32 1.442695, %v964_v39 }
 0x375   : > { %v963_v40 = vpop.xlane.xlu0 %962 }
 0x376   : > { %v965_v41 = vsub.f32 %v2272_v27, %v963_v40 }
 0x378   : > { %v968_v43 = vmul.f32 1.442695, %v965_v41 }
 0x379   : > { %v2647_v44 = vpop.permute.xlu0 %2646 }
 0x37a   : > { %2690 = vpow2.f32 %v968_v43  ;;  %v2649_v45 = vunpack.i.h.bf16 %v2647_v44  ;;  %v2648_v46 = vunpack.i.l.bf16 %v2647_v44 }
 0x37b   : > { %2692 = vpow2.f32 %v966_v42 }
 0x37c   : > { %v2463_v47 = vpack.c.bf16 %v2649_v45, %v2648_v46 }
 0x37e   : > { %2465 = vmatprep.subr.msk.bf16.mxu1 %vm3478_vm1, %v2463_v47 }
 0x384   : > { %v2691_v48 = vpop.eup %2690 }
 0x385   : > { %v973_v49 = vsel %vm957_vm2, %v2691_v48, 0.0  ;;  %v2693_v50 = vpop.eup %2692 }
 0x386   : > { %974 = vadd.xlane.f32.xlu1 %v973_v49  ;;  %v970_v52 = vsel %vm957_vm2, %v2693_v50, 0.0 }
 0x38a   : > { %971 = vadd.xlane.f32.xlu1 %v970_v52 }
 0x39b   : > { %1063 = vrot.lane.b32.xlu1 %v3494_v22, %s3049_s14 }
 0x413   : > { %v975_v54 = vpop.xlane.xlu1 %974 }
 0x414   : > { %2694 = vrcp.f32 %v975_v54 }
 0x417   : > { %v972_v55 = vpop.xlane.xlu1 %971 }
 0x418   : > { %2696 = vrcp.f32 %v972_v55 }
 0x41b   : > { %v1064_v60 = vpop.permute.xlu1 %1063 }
 0x41e   : > { %v2695_v56 = vpop.eup %2694 }
 0x41f   : > { %v979_v59 = vmul.f32 %v2695_v56, %v2691_v48 }
 0x422   : > { %v2697_v57 = vpop.eup %2696 }
 0x423   : > { %v978_v58 = vmul.f32 %v2697_v57, %v2693_v50 }
 0x425   : > { %2277 = vmatprep.mubr.msk.f32.mxu1 %vm957_vm2, %v978_v58 }
 0x426   : > { %2278 = vmatmul.mubr.msk.f32.vlgmr.msra.gmra.mrb[4].mxu1 %vm957_vm2, %v979_v59 }
 0x427   : > { %2468 = vmatpush3.bf16.xpose.msk.msra.mxu1 %vm3478_vm1, %v2463_v47  ;;  %2284 = vmatprep.mubr.msk.f32.mxu1 %vm869_vm0, %v1062_v53 }
 0x42e   : > { %2285 = vmatmul.mubr.msk.f32.vlgmr.msra.gmra.mrb[6].mxu1 %vm869_vm0, %v1064_v60 }
 0x4f9   : > { %v3518_v61 = vpop.f32.mrb[4].mxu1 }
 0x4fa   : > { %v3520_v62 = vpop.f32.mrb[5].mxu1 }
 0x501   : > { %v2286_v63 = vpop.f32.mrb[6].mxu1 }
 0x502   : > { %v1143_v0 = vpop.f32.mrb[7].mxu1  ;;  %v1155_v1 = vsel %vm957_vm2, %v2286_v63, -inf }
 0x503   : > { %1156 = vmax.xlane.f32.xlu0 %v1155_v1  ;;  %v1152_v2 = vsel %vm957_vm2, %v1143_v0, -inf }
 0x504   : > { %1153 = vmax.xlane.f32.xlu1 %v1152_v2 }
 0x515   : > { %2651 = vrot.lane.b32.xlu1 %v3524_v3, %s3049_s14 }
 0x519   : > { %1263 = vrot.lane.b32.xlu1 %v3484_v14, %s3050_s29 }
 0x51d   : > { %1265 = vrot.lane.b32.xlu1 %v3494_v22, %s3050_s29 }
 0x590   : > { %v1157_v4 = vpop.xlane.xlu0 %1156 }
 0x591   : > { %v1159_v5 = vsub.f32 %v2286_v63, %v1157_v4  ;;  %v1154_v6 = vpop.xlane.xlu1 %1153 }
 0x592   : > { %v1158_v7 = vsub.f32 %v1143_v0, %v1154_v6 }
 0x593   : > { %v1162_v9 = vmul.f32 1.442695, %v1159_v5 }
 0x594   : > { %v1160_v10 = vmul.f32 1.442695, %v1158_v7 }
 0x595   : > { %2698 = vpow2.f32 %v1162_v9  ;;  %v2652_v11 = vpop.permute.xlu1 %2651 }
 0x596   : > { %v2654_v12 = vunpack.i.h.bf16 %v2652_v11  ;;  %v2653_v15 = vunpack.i.l.bf16 %v2652_v11  ;;  %2700 = vpow2.f32 %v1160_v10 }
 0x598   : > { %v2469_v16 = vpack.c.bf16 %v2654_v12, %v2653_v15 }
 0x599   : > { %v1264_v33 = vpop.permute.xlu1 %1263 }
 0x59a   : > { %2470 = vmatprep.subr.bf16.mxu1 %v2469_v16 }
 0x59b   : > { %2472 = vmatpush3.bf16.msra.mxu1 %v2469_v16 }
 0x59d   : > { %v1266_v34 = vpop.permute.xlu1 %1265 }
 0x59f   : > { %v2699_v17 = vpop.eup %2698 }
 0x5a0   : > { %v1167_v18 = vsel %vm957_vm2, %v2699_v17, 0.0  ;;  %v2701_v19 = vpop.eup %2700 }
 0x5a1   : > { %1168 = vadd.xlane.f32.xlu0 %v1167_v18  ;;  %v1164_v20 = vsel %vm957_vm2, %v2701_v19, 0.0 }
 0x5a5   : > { %1165 = vadd.xlane.f32.xlu0 %v1164_v20 }
 0x5bb   : > { %2656 = vrot.lane.b32.xlu0 %v3482_v13, %s3050_s29 }
 0x62e   : > { %v1169_v21 = vpop.xlane.xlu0 %1168 }
 0x62f   : > { %2702 = vrcp.f32 %v1169_v21 }
 0x632   : > { %v1166_v23 = vpop.xlane.xlu0 %1165 }
 0x633   : > { %2704 = vrcp.f32 %v1166_v23 }
 0x636   : > { %v2657_v24 = vpop.permute.xlu0 %2656 }
 0x637   : > { %v2659_v25 = vunpack.i.h.bf16 %v2657_v24  ;;  %v2658_v26 = vunpack.i.l.bf16 %v2657_v24 }
 0x639   : > { %v2473_v27 = vpack.c.bf16 %v2659_v25, %v2658_v26  ;;  %v2703_v28 = vpop.eup %2702 }
 0x63a   : > { %v1173_v32 = vmul.f32 %v2703_v28, %v2699_v17 }
 0x63b   : > { %2475 = vmatprep.subr.msk.bf16.mxu1 %vm3478_vm1, %v2473_v27 }
 0x63d   : > { %v2705_v30 = vpop.eup %2704 }
 0x63e   : > { %v1172_v31 = vmul.f32 %v2705_v30, %v2701_v19 }
 0x640   : > { %2291 = vmatprep.mubr.msk.f32.mxu1 %vm957_vm2, %v1172_v31 }
 0x641   : > { %2292 = vmatmul.mubr.msk.f32.vlgmr.msra.gmra.mrb[8].mxu1 %vm957_vm2, %v1173_v32 }
 0x642   : > { %2478 = vmatpush3.bf16.xpose.msk.msra.mxu1 %vm3478_vm1, %v2473_v27  ;;  %2298 = vmatprep.mubr.msk.f32.mxu1 %vm869_vm0, %v1264_v33 }
 0x649   : > { %2299 = vmatmul.mubr.msk.f32.vlgmr.msra.gmra.mrb[10].mxu1 %vm869_vm0, %v1266_v34 }
 0x714   : > { %v3544_v35 = vpop.f32.mrb[8].mxu1 }
 0x715   : > { %v3546_v36 = vpop.f32.mrb[9].mxu1 }
 0x716   : > { %v2675_v37 = vpack.i.bf16 %v3544_v35, %v3546_v36  ;;  %v1699_v35 = vld [vmem:[#allocation13 + $0x20] sm:$0xff]  ;;  %v1700_v36 = vld [vmem:[#allocation13 + $0x28] sm:$0xff] }
 0x71c   : > { %v2300_v38 = vpop.f32.mrb[10].mxu1 }
 0x71d   : > { %v1345_v39 = vpop.f32.mrb[11].mxu1  ;;  %v1357_v40 = vsel %vm957_vm2, %v2300_v38, -inf }
 0x71e   : > { %1358 = vmax.xlane.f32.xlu0 %v1357_v40  ;;  %v1354_v41 = vsel %vm957_vm2, %v1345_v39, -inf  ;;  %v1697_v40 = vld [vmem:[#allocation13 + $0x10] sm:$0xff] }
 0x71f   : > { %1355 = vmax.xlane.f32.xlu1 %v1354_v41 }
 0x730   : > { %2661 = vrot.lane.b32.xlu1 %v3524_v3, %s3050_s29 }
 0x734   : > { %1463 = vrot.lane.b32.xlu1 %v3484_v14, %s3051_s3 }
 0x738   : > { %1465 = vrot.lane.b32.xlu1 %v3494_v22, %s3051_s3 }
 0x7ab   : > { %v1359_v42 = vpop.xlane.xlu0 %1358 }
 0x7ac   : > { %v1361_v43 = vsub.f32 %v2300_v38, %v1359_v42  ;;  %v1356_v44 = vpop.xlane.xlu1 %1355  ;;  %v1695_v38 = vld [vmem:[#allocation13] sm:$0xff]  ;;  %v1698_v42 = vld [vmem:[#allocation13 + $0x18] sm:$0xff] }
 0x7ad   : > { %v1360_v45 = vsub.f32 %v1345_v39, %v1356_v44  ;;  %v1696_v39 = vld [vmem:[#allocation13 + $0x8] sm:$0xff]  ;;  %v1701_v44 = vld [vmem:[#allocation13 + $0x30] sm:$0xff] }
 0x7ae   : > { %v1364_v46 = vmul.f32 1.442695, %v1361_v43  ;;  %v2493_v41 = vpack.c.bf16 %v1696_v39, %v1695_v38  ;;  %v2497_v43 = vpack.c.bf16 %v1698_v42, %v1697_v40  ;;  %v2050_v38 = vld [vmem:[%s3661_s24] ss:$0 sm:$0xff] }
 0x7af   : > { %v1362_v47 = vmul.f32 1.442695, %v1360_v45  ;;  %v1702_v45 = vld [vmem:[#allocation13 + $0x38] sm:$0xff] }
 0x7b0   : > { %2706 = vpow2.f32 %v1364_v46  ;;  %v2662_v48 = vpop.permute.xlu1 %2661  ;;  %2494 = vmatprep.subr.bf16.mxu0 %v2493_v41  ;;  %v2505_v46 = vpack.c.bf16 %v1702_v45, %v1701_v44  ;;  %v2051_v40 = vld [vmem:[%s3662_s21] ss:$0 sm:$0xff] }
 0x7b1   : > { %v2664_v49 = vunpack.i.h.bf16 %v2662_v48  ;;  %v2663_v50 = vunpack.i.l.bf16 %v2662_v48  ;;  %2708 = vpow2.f32 %v1362_v47  ;;  %2496 = vmatpush3.bf16.msra.mxu0 %v2493_v41  ;;  %v1703_v47 = vld [vmem:[#allocation13 + $0x40] sm:$0xff]  ;;  %v1704_v48 = vld [vmem:[#allocation13 + $0x48] sm:$0xff] }
 0x7b2   : > { %2498 = vmatprep.subr.bf16.mxu0 %v2497_v43 }
 0x7b3   : > { %v2479_v52 = vpack.c.bf16 %v2664_v49, %v2663_v50  ;;  %v2509_v49 = vpack.c.bf16 %v1704_v48, %v1703_v47  ;;  %v1705_v50 = vld [vmem:[#allocation13 + $0x50] sm:$0xff] }
 0x7b4   : > { %v1464_v4 = vpop.permute.xlu1 %1463 }
 0x7b5   : > { %2480 = vmatprep.subr.bf16.mxu1 %v2479_v52  ;;  %2500 = vmatpush3.bf16.msra.mxu0 %v2497_v43 }
 0x7b6   : > { %2482 = vmatpush3.bf16.msra.mxu1 %v2479_v52  ;;  %v1706_v52 = vld [vmem:[#allocation13 + $0x58] sm:$0xff] }
 0x7ba   : > { %v2707_v53 = vpop.eup %2706 }
 0x7bb   : > { %v1369_v14 = vsel %vm957_vm2, %v2707_v53, 0.0  ;;  %v2709_v54 = vpop.eup %2708 }
 0x7bc   : > { %1370 = vadd.xlane.f32.xlu0 %v1369_v14  ;;  %v1366_v22 = vsel %vm957_vm2, %v2709_v54, 0.0  ;;  %v1707_v14 = vld [vmem:[#allocation13 + $0x60] sm:$0xff] }
 0x7c0   : > { %1367 = vadd.xlane.f32.xlu0 %v1366_v22 }
 0x7d6   : > { %2666 = vrot.lane.b32.xlu0 %v3482_v13, %s3051_s3  ;;  %v1466_v13 = vpop.permute.xlu1 %1465 }
 0x849   : > { %v1371_v55 = vpop.xlane.xlu0 %1370 }
 0x84a   : > { %2710 = vrcp.f32 %v1371_v55  ;;  %v1709_v55 = vld [vmem:[#allocation13 + $0x70] sm:$0xff] }
 0x84d   : > { %v1368_v56 = vpop.xlane.xlu0 %1367 }
 0x84e   : > { %2712 = vrcp.f32 %v1368_v56  ;;  %v1710_v56 = vld [vmem:[#allocation13 + $0x78] sm:$0xff] }
 0x851   : > { %v2667_v57 = vpop.permute.xlu0 %2666 }
 0x852   : > { %v2669_v58 = vunpack.i.h.bf16 %v2667_v57  ;;  %v2668_v59 = vunpack.i.l.bf16 %v2667_v57  ;;  %v2521_v57 = vpack.c.bf16 %v1710_v56, %v1709_v55 }
 0x854   : > { %v2483_v60 = vpack.c.bf16 %v2669_v58, %v2668_v59  ;;  %v2711_v63 = vpop.eup %2710 }
 0x855   : > { %v1375_v2 = vmul.f32 %v2711_v63, %v2707_v53  ;;  %v2513_v53 = vpack.c.bf16 %v1706_v52, %v1705_v50 }
 0x856   : > { %2485 = vmatprep.subr.msk.bf16.mxu1 %vm3478_vm1, %v2483_v60 }
 0x858   : > { %v2713_v0 = vpop.eup %2712 }
 0x859   : > { %v1374_v1 = vmul.f32 %v2713_v0, %v2709_v54  ;;  %v1708_v54 = vld [vmem:[#allocation13 + $0x68] sm:$0xff] }
 0x85a   : > { %v2517_v22 = vpack.c.bf16 %v1708_v54, %v1707_v14 }
 0x85b   : > { %2305 = vmatprep.mubr.msk.f32.mxu1 %vm957_vm2, %v1374_v1 }
 0x85c   : > { %2306 = vmatmul.mubr.msk.f32.vlgmr.msra.gmra.mrb[12].mxu1 %vm957_vm2, %v1375_v2 }
 0x85d   : > { %2488 = vmatpush3.bf16.xpose.msk.msra.mxu1 %vm3478_vm1, %v2483_v60  ;;  %2312 = vmatprep.mubr.msk.f32.mxu1 %vm869_vm0, %v1464_v4 }
 0x864   : > { %2313 = vmatmul.mubr.msk.f32.vlgmr.msra.gmra.mrb[14].mxu1 %vm869_vm0, %v1466_v13 }
 0x92f   : > { %v2307_v5 = vpop.f32.mrb[12].mxu1 }
 0x930   : > { %v1454_v6 = vpop.f32.mrb[13].mxu1 }
 0x931   : > { %v2680_v7 = vpack.i.bf16 %v2307_v5, %v1454_v6 }
 0x937   : > { %v2314_v9 = vpop.f32.mrb[14].mxu1 }
 0x938   : > { %v1545_v10 = vpop.f32.mrb[15].mxu1  ;;  %v1557_v11 = vsel %vm957_vm2, %v2314_v9, -inf }
 0x939   : > { %1558 = vmax.xlane.f32.xlu0 %v1557_v11  ;;  %v1554_v12 = vsel %vm957_vm2, %v1545_v10, -inf }
 0x93a   : > { %1555 = vmax.xlane.f32.xlu1 %v1554_v12 }
 0x94b   : > { %2671 = vrot.lane.b32.xlu1 %v3524_v3, %s3051_s3 }
 0x94f   : > { %2681 = vrot.lane.b32.xlu1 %v2680_v7, %s3050_s29 }
 0x9c6   : > { %v1559_v8 = vpop.xlane.xlu0 %1558 }
 0x9c7   : > { %v1561_v15 = vsub.f32 %v2314_v9, %v1559_v8  ;;  %v1556_v16 = vpop.xlane.xlu1 %1555 }
 0x9c8   : > { %v1560_v17 = vsub.f32 %v1545_v10, %v1556_v16  ;;  %v2049_v16 = vld [vmem:[#allocation15] ss:$0 sm:$0xff] }
 0x9c9   : > { %v1564_v18 = vmul.f32 1.442695, %v1561_v15 }
 0x9ca   : > { %v1562_v19 = vmul.f32 1.442695, %v1560_v17 }
 0x9cb   : > { %v2672_v20 = vpop.permute.xlu1 %2671 }
 0x9cc   : > { %2714 = vpow2.f32 %v1562_v19  ;;  %v2674_v21 = vunpack.i.h.bf16 %v2672_v20  ;;  %v2673_v23 = vunpack.i.l.bf16 %v2672_v20 }
 0x9cd   : > { %2716 = vpow2.f32 %v1564_v18 }
 0x9ce   : > { %v2489_v24 = vpack.c.bf16 %v2674_v21, %v2673_v23 }
 0x9cf   : > { %v2682_v2 = vpop.permute.xlu1 %2681 }
 0x9d0   : > { %2490 = vmatprep.subr.bf16.mxu1 %v2489_v24  ;;  %v2684_v5 = vunpack.i.h.bf16 %v2682_v2  ;;  %v2683_v6 = vunpack.i.l.bf16 %v2682_v2 }
 0x9d1   : > { %2492 = vmatpush3.bf16.msra.mxu1 %v2489_v24 }
 0x9d6   : > { %v2715_v25 = vpop.eup %2714 }
 0x9d7   : > { %v1566_v26 = vsel %vm957_vm2, %v2715_v25, 0.0  ;;  %v2717_v3 = vpop.eup %2716 }
 0x9d8   : > { %1567 = vadd.xlane.f32.xlu0 %v1566_v26  ;;  %v1569_v27 = vsel %vm957_vm2, %v2717_v3, 0.0 }
 0x9dc   : > { %1570 = vadd.xlane.f32.xlu0 %v1569_v27 }
 0x9f2   : > { %2676 = vrot.lane.b32.xlu0 %v2675_v37, %s3051_s3  ;;  %v2501_v37 = vpack.c.bf16 %v1700_v36, %v1699_v35 }
 0x9f4   : > { %2502 = vmatprep.subr.bf16.mxu0 %v2501_v37 }
 0x9f5   : > { %2504 = vmatpush3.bf16.msra.mxu0 %v2501_v37 }
 0x9f6   : > { %2506 = vmatprep.subr.bf16.mxu0 %v2505_v46 }
 0x9f9   : > { %2508 = vmatpush3.bf16.msra.mxu0 %v2505_v46 }
 0x9fa   : > { %2510 = vmatprep.subr.bf16.mxu0 %v2509_v49 }
 0x9fd   : > { %2512 = vmatpush3.bf16.msra.mxu0 %v2509_v49 }
 0x9fe   : > { %2514 = vmatprep.subr.bf16.mxu0 %v2513_v53 }
 0xa01   : > { %2516 = vmatpush3.bf16.msra.mxu0 %v2513_v53 }
 0xa02   : > { %2518 = vmatprep.subr.bf16.mxu0 %v2517_v22 }
 0xa05   : > { %2520 = vmatpush3.bf16.msra.mxu0 %v2517_v22 }
 0xa06   : > { %2522 = vmatprep.subr.bf16.mxu0 %v2521_v57 }
 0xa09   : > { %2524 = vmatpush3.bf16.msra.mxu0 %v2521_v57 }
 0xa65   : > { %v1568_v28 = vpop.xlane.xlu0 %1567 }
 0xa66   : > { %2718 = vrcp.f32 %v1568_v28 }
 0xa69   : > { %v1571_v30 = vpop.xlane.xlu0 %1570 }
 0xa6a   : > { %2720 = vrcp.f32 %v1571_v30 }
 0xa6d   : > { %v2677_v63 = vpop.permute.xlu0 %2676 }
 0xa6e   : > { %v2679_v0 = vunpack.i.h.bf16 %v2677_v63  ;;  %v2678_v1 = vunpack.i.l.bf16 %v2677_v63 }
 0xa70   : > { %v2719_v31 = vpop.eup %2718  ;;  %v1688_v4 = vsel %vm869_vm0, %v3518_v61, %v2679_v0  ;;  %v1687_v13 = vsel %vm869_vm0, %v3520_v62, %v2678_v1 }
 0xa71   : > { %v1574_v32 = vmul.f32 %v2719_v31, %v2715_v25  ;;  %v1690_v11 = vsel %vm1689_vm3, %v1687_v13, %v2683_v6  ;;  %v1691_v12 = vsel %vm1689_vm3, %v1688_v4, %v2684_v5 }
 0xa73   : > { %2319 = vmatprep.mubr.msk.f32.mxu1 %vm957_vm2, %v1574_v32 }
 0xa74   : > { %v2721_v33 = vpop.eup %2720 }
 0xa75   : > { %v1575_v34 = vmul.f32 %v2721_v33, %v2717_v3 }
 0xa77   : > { %2320 = vmatmul.mubr.msk.f32.vlgmr.msra.gmra.mrb[16].mxu1 %vm957_vm2, %v1575_v34 }
 0xb4a   : > { %v2321_v58 = vpop.f32.mrb[16].mxu1 }
 0xb4b   : > { %v1654_v59 = vpop.f32.mrb[17].mxu1 }
 0xb4c   : > { %v2685_v60 = vpack.i.bf16 %v2321_v58, %v1654_v59 }
 0xb4e   : > { %2686 = vrot.lane.b32.xlu1 %v2685_v60, %s3049_s14 }
 0xbc0   : > { %v2687_v7 = vpop.permute.xlu1 %2686 }
 0xbc1   : > { %v2689_v9 = vunpack.i.h.bf16 %v2687_v7  ;;  %v2688_v10 = vunpack.i.l.bf16 %v2687_v7 }
 0xbc3   : > { %v1693_v8 = vsel %vm1692_vm4, %v1690_v11, %v2688_v10  ;;  %v1694_v15 = vsel %vm1692_vm4, %v1691_v12, %v2689_v9 }
 0xbc4   : > { %2354 = vmatprep.mubr.f32.mxu0 %v1693_v8 }
 0xbc5   : > { %2355 = vmatmul.mubr.f32.vlgmr.msra.gmra.mrb[4].mxu0 %v1694_v15 }
 0xc98   : > { %v2356_v17 = vpop.f32.mrb[4].mxu0 }
 0xc99   : > { %v1790_v18 = vadd.f32 %v2356_v17, %v2049_v16  ;;  %v1784_v61 = vpop.f32.mrb[5].mxu0 }
 0xc9a   : > { %v1785_v19 = vadd.f32 %v2049_v16, %v1784_v61 }
 0xc9b   : > { %v1794_v62 = vadd.f32 %v1790_v18, %v3472_v51 }
 0xc9c   : > { %v1793_v20 = vadd.f32 %v1785_v19, %v3463_v29 }
 0xc9d   : > { %1797 = vadd.xlane.f32.xlu0 %v1794_v62 }
 0xc9e   : > { %1795 = vadd.xlane.f32.xlu1 %v1793_v20 }
 0xd2a   : > { %v1798_v21 = vpop.xlane.xlu0 %1797 }
 0xd2b   : > { %v1796_v23 = vpop.xlane.xlu1 %1795  ;;  %v1801_v24 = vmul.f32 0.0078125, %v1798_v21 }
 0xd2c   : > { %v1800_v25 = vmul.f32 0.0078125, %v1796_v23 }
 0xd2d   : > { %v1803_v3 = vsub.f32 %v1794_v62, %v1801_v24 }
 0xd2e   : > { %v1802_v26 = vsub.f32 %v1793_v20, %v1800_v25 }
 0xd2f   : > { %v1805_v28 = vmul.f32 %v1803_v3, %v1803_v3 }
 0xd30   : > { %v1804_v27 = vmul.f32 %v1802_v26, %v1802_v26 }
 0xd32   : > { %1806 = vadd.xlane.f32.xlu0 %v1804_v27 }
 0xd36   : > { %1808 = vadd.xlane.f32.xlu0 %v1805_v28 }
 0xdbf   : > { %v1807_v30 = vpop.xlane.xlu0 %1806 }
 0xdc0   : > { %v1810_v31 = vmul.f32 0.0078125, %v1807_v30 }
 0xdc2   : > { %v1812_v32 = vadd.f32 1e-05, %v1810_v31 }
 0xdc3   : > { %v1809_v51 = vpop.xlane.xlu0 %1808 }
 0xdc4   : > { %2722 = vrsqrt.f32 %v1812_v32  ;;  %v1811_v29 = vmul.f32 0.0078125, %v1809_v51 }
 0xdc6   : > { %v1813_v33 = vadd.f32 1e-05, %v1811_v29 }
 0xdc8   : > { %2724 = vrsqrt.f32 %v1813_v33 }
 0xdce   : > { %v2723_v34 = vpop.eup %2722 }
 0xdcf   : > { %v1816_v39 = vmul.f32 %v2723_v34, %v1802_v26 }
 0xdd1   : > { %v1825_v41 = vmul.f32 %v2050_v38, %v1816_v39 }
 0xdd2   : > { %v2725_v42 = vpop.eup %2724 }
 0xdd3   : > { %v1834_v43 = vadd.f32 %v2051_v40, %v1825_v41  ;;  %v1817_v35 = vmul.f32 %v2725_v42, %v1803_v3 }
 0xdd5   : > { %1836 = vst [vmem:[%s568_s10] sm:$0xff] %v1834_v43  ;;  %v1826_v36 = vmul.f32 %v2050_v38, %v1817_v35 }
 0xdd7   : > { %v1835_v37 = vadd.f32 %v2051_v40, %v1826_v36 }
 0xdd9   : > { %1837 = vst [vmem:[%s568_s10 + $0x8] sm:$0xff] %v1835_v37 }
 0xdda PF: > { %p28_p3 = scmp.ge.s32.totalorder %s3323_s25, 4   ;;  %s3664_s21 = smov %s3028_s22 }
 0xddb   : > { %s3665_s22 = smov %s3032_s23  ;;  %s3666_s23 = smov %s3334_s12 }
 0xddc   : > { %s3667_s24 = smov %s3323_s25  ;;  %30 = sbr.rel (!%p28_p3) target bundleno = 15 (0xf), region = 149 }
 0xde3   :  { %1859 = vsyncpa [#allocation3], 1 }
 0xde4   :  { %1861 = vsyncpa [#allocation3 + $0x1], 1 }
 0xde5   :  { %1862 = vsyncpa [#allocation5], 1 }
 0xde6   :  { %1864 = vsyncpa [#allocation5 + $0x1], 1 }
 0xde7   :  { %1865 = vsyncpa [#allocation8], 1 }
 0xde8   :  { %1866 = vsyncpa [#allocation11], 1 }
 0xde9   :  { %1867 = vsyncpa [#allocation14], 1 }

// kernel: transformer_forward.14
= control target key start
LH: loop header
LB: loop body
LE: loop exit
PB: predicated region body
PF: predicated region fallthrough
CT: control target
= control target key end

     0   :  { %s2467_s21 = smov 0   ;;  %s2865_s0 = inlined_call_operand.vmem [shape: f32[2,16,128], index: 0, kind: input, shape index: {}, may-alias: {0,1}]   ;;  %s2866_s1 = inlined_call_operand.vmem [shape: f32[2,16,128], index: 1, kind: input, shape index: {}, may-alias: {0,1}]   ;;  %s2867_s2 = inlined_call_operand.vmem [shape: f32[128,128], index: 2, kind: input, shape index: {}]   ;;  %s2868_s3 = inlined_call_operand.vmem [shape: f32[1,128], index: 3, kind: input, shape index: {}]   ;;  %s2869_s4 = inlined_call_operand.vmem [shape: f32[128,128], index: 4, kind: input, shape index: {}]   ;;  %s2870_s5 = inlined_call_operand.vmem [shape: f32[1,128], index: 5, kind: input, shape index: {}]   ;;  %s2871_s6 = inlined_call_operand.vmem [shape: f32[128,128], index: 6, kind: input, shape index: {}]   ;;  %s2872_s7 = inlined_call_operand.vmem [shape: f32[1,128], index: 7, kind: input, shape index: {}]   ;;  %s2873_s8 = inlined_call_operand.vmem [shape: f32[128,128], index: 8, kind: input, shape index: {}]   ;;  %s2874_s9 = inlined_call_operand.vmem [shape: f32[1,128], index: 9, kind: input, shape index: {}]   ;;  %s2875_s10 = inlined_call_operand.vmem [shape: f32[1,128], index: 10, kind: input, shape index: {}]   ;;  %s2876_s11 = inlined_call_operand.vmem [shape: f32[1,128], index: 11, kind: input, shape index: {}]   ;;  %s2877_s12 = inlined_call_operand.vmem [shape: f32[2,16,128], index: 12, kind: output, shape index: {}]  }
   0x1 LB: > { %s1785_s22 = sadd.s32 4294967295, %s2397_s21   ;;  %p1789_p0 = scmp.ge.s32.totalorder %s2397_s21, 1  ;;  %s2397_s21 = sphi %s2467_s21, %s22_s21  }
   0x2   : > { %p372_p1 = scmp.lt.s32.totalorder %s2397_s21, 3 }
   0x4   : > { %p373_p2 = pnand %p1789_p0, %p372_p1 }
   0x5   : > { %v536_v0 = vld [vmem:[%s2869_s4] sm:$0xff] (!%p373_p2)  ;;  %v537_v1 = vld [vmem:[%s2869_s4 + $0x8] sm:$0xff] (!%p373_p2)  ;;  %v538_v2 = vld [vmem:[%s2869_s4 + $0x10] sm:$0xff] (!%p373_p2)  ;;  %p419_p3 = scmp.lt.s32.totalorder (!%p373_p2), %s1785_s22, 1  ;;  %vm734_vm0 = vcmask (!%p373_p2), 261120   ;;  %s2399_s23 = smov (!%p373_p2), 96  }
   0x6   : > { %376 = sbr.rel (%p373_p2) target bundleno = 3289 (0xcd9), region = 68  ;;  %v2163_v3 = vpack.c.bf16 (!%p373_p2), %v537_v1, %v536_v0  ;;  %v539_v4 = vld [vmem:[%s2869_s4 + $0x18] sm:$0xff] (!%p373_p2)  ;;  %v438_v5 = vld [vmem:[%s2867_s2] sm:$0xff] (!%p373_p2)  ;;  %v439_v6 = vld [vmem:[%s2867_s2 + $0x8] sm:$0xff] (!%p373_p2)  ;;  %vm831_vm3 = vcmask (!%p373_p2), 130048   ;;  %s2401_s24 = smov (!%p373_p2), 32  }
   0x7   : > { %v2167_v7 = vpack.c.bf16 (!%p373_p2), %v539_v4, %v538_v2  ;;  %v2131_v8 = vpack.c.bf16 (!%p373_p2), %v439_v6, %v438_v5  ;;  %v540_v9 = vld [vmem:[%s2869_s4 + $0x20] sm:$0xff] (!%p373_p2)  ;;  %v541_v10 = vld [vmem:[%s2869_s4 + $0x28] sm:$0xff] (!%p373_p2)  ;;  %v440_v11 = vld [vmem:[%s2867_s2 + $0x10] sm:$0xff] (!%p373_p2)  ;;  %vm1569_vm5 = vcmask (!%p373_p2), 523264   ;;  %vm1572_vm6 = vcmask (!%p373_p2), 785408  }
   0x8   : > { %2164 = vmatprep.subr.bf16.mxu1 (!%p373_p2), %v2163_v3  ;;  %v441_v12 = vld [vmem:[%s2867_s2 + $0x18] sm:$0xff] (!%p373_p2)  ;;  %v442_v14 = vld [vmem:[%s2867_s2 + $0x20] sm:$0xff] (!%p373_p2)  ;;  %v443_v15 = vld [vmem:[%s2867_s2 + $0x28] sm:$0xff] (!%p373_p2)  ;;  %v2171_v16 = vpack.c.bf16 (!%p373_p2), %v541_v10, %v540_v9 }
   0x9   : > { %2166 = vmatpush3.bf16.msra.mxu1 (!%p373_p2), %v2163_v3  ;;  %2132 = vmatprep.subr.bf16.mxu0 (!%p373_p2), %v2131_v8  ;;  %v2135_v13 = vpack.c.bf16 (!%p373_p2), %v441_v12, %v440_v11  ;;  %v542_v17 = vld [vmem:[%s2869_s4 + $0x30] sm:$0xff] (!%p373_p2)  ;;  %v543_v18 = vld [vmem:[%s2869_s4 + $0x38] sm:$0xff] (!%p373_p2)  ;;  %v2139_v19 = vpack.c.bf16 (!%p373_p2), %v443_v15, %v442_v14  ;;  %v544_v23 = vld [vmem:[%s2869_s4 + $0x40] sm:$0xff] (!%p373_p2) }
   0xa   : > { %2168 = vmatprep.subr.bf16.mxu1 (!%p373_p2), %v2167_v7  ;;  %2134 = vmatpush3.bf16.msra.mxu0 (!%p373_p2), %v2131_v8  ;;  %v444_v20 = vld [vmem:[%s2867_s2 + $0x30] sm:$0xff] (!%p373_p2)  ;;  %v445_v21 = vld [vmem:[%s2867_s2 + $0x38] sm:$0xff] (!%p373_p2)  ;;  %v2175_v22 = vpack.c.bf16 (!%p373_p2), %v543_v18, %v542_v17  ;;  %v545_v24 = vld [vmem:[%s2869_s4 + $0x48] sm:$0xff] (!%p373_p2) }
   0xb   : > { %2136 = vmatprep.subr.bf16.mxu0 (!%p373_p2), %v2135_v13  ;;  %v2143_v25 = vpack.c.bf16 (!%p373_p2), %v445_v21, %v444_v20  ;;  %v446_v27 = vld [vmem:[%s2867_s2 + $0x40] sm:$0xff] (!%p373_p2)  ;;  %v447_v28 = vld [vmem:[%s2867_s2 + $0x48] sm:$0xff] (!%p373_p2)  ;;  %v2179_v30 = vpack.c.bf16 (!%p373_p2), %v545_v24, %v544_v23  ;;  %v546_v31 = vld [vmem:[%s2869_s4 + $0x50] sm:$0xff] (!%p373_p2) }
   0xc   : > { %v547_v32 = vld [vmem:[%s2869_s4 + $0x58] sm:$0xff] (!%p373_p2)  ;;  %v2147_v33 = vpack.c.bf16 (!%p373_p2), %v447_v28, %v446_v27  ;;  %v448_v34 = vld [vmem:[%s2867_s2 + $0x50] sm:$0xff] (!%p373_p2)  ;;  %v548_v37 = vld [vmem:[%s2869_s4 + $0x60] sm:$0xff] (!%p373_p2)  ;;  %v822_v27 = vlaneseq (!%p373_p2) }
   0xd   : > { %s2881_s22 = smov (!%p419_p3, %s1785_s22), 1  ;;  %2170 = vmatpush3.bf16.msra.mxu1 %v2167_v7  ;;  %v449_v35 = vld [vmem:[%s2867_s2 + $0x58] sm:$0xff]  ;;  %v2183_v36 = vpack.c.bf16 %v547_v32, %v546_v31  ;;  %v549_v38 = vld [vmem:[%s2869_s4 + $0x68] sm:$0xff]  ;;  %v450_v40 = vld [vmem:[%s2867_s2 + $0x60] sm:$0xff] }
   0xe   : > { %s2511_s13 = sshll.u32 %s2881_s22, 4  ;;  %2172 = vmatprep.subr.bf16.mxu1 %v2171_v16  ;;  %2138 = vmatpush3.bf16.msra.mxu0 %v2135_v13  ;;  %v2151_v39 = vpack.c.bf16 %v449_v35, %v448_v34  ;;  %v451_v41 = vld [vmem:[%s2867_s2 + $0x68] sm:$0xff]  ;;  %v2187_v42 = vpack.c.bf16 %v549_v38, %v548_v37  ;;  %v550_v43 = vld [vmem:[%s2869_s4 + $0x70] sm:$0xff]  ;;  %v551_v44 = vld [vmem:[%s2869_s4 + $0x78] sm:$0xff]  ;;  %v2675_v28 = vshrl.u32 %v822_v27, 7 }
   0xf   : > { %s2529_s25 = scalar_lea.vmem %s2866_s1, %s2511_s13  ;;  %s2535_s28 = scalar_lea.vmem %s2865_s0, %s2511_s13  ;;  %2140 = vmatprep.subr.bf16.mxu0 %v2139_v19  ;;  %v2155_v45 = vpack.c.bf16 %v451_v41, %v450_v40  ;;  %v452_v46 = vld [vmem:[%s2867_s2 + $0x70] sm:$0xff]  ;;  %v453_v47 = vld [vmem:[%s2867_s2 + $0x78] sm:$0xff]  ;;  %v2191_v48 = vpack.c.bf16 %v551_v44, %v550_v43  ;;  %v634_v52 = vld [vmem:[%s2871_s6] sm:$0xff] }
  0x10   : > { %v436_v26 = vld [vmem:[%s2529_s25] sm:$0xff]  ;;  %v2159_v49 = vpack.c.bf16 %v453_v47, %v452_v46  ;;  %v2591_v50 = vld [vmem:[%s2529_s25 + $0x8] sm:$0xff]  ;;  %v636_v54 = vld [vmem:[%s2871_s6 + $0x10] sm:$0xff]  ;;  %v2680_v31 = vadd.s32 8, %v2675_v28  ;;  %s433_s19 = scalar_lea.vmem %s2877_s12, %s2511_s13 }
  0x11   : > { %2002 = vmatprep.mubr.f32.mxu1 %v436_v26  ;;  %v2551_v29 = vld [vmem:[%s2535_s28] sm:$0xff]  ;;  %2174 = vmatpush3.bf16.msra.mxu1 %v2171_v16  ;;  %v2594_v51 = vld [vmem:[%s2535_s28 + $0x8] sm:$0xff]  ;;  %v637_v56 = vld [vmem:[%s2871_s6 + $0x18] sm:$0xff]  ;;  %s2400_s28 = smov 64  }
  0x12   : > { %1967 = vmatprep.mubr.f32.mxu0 %v2551_v29  ;;  %2176 = vmatprep.subr.bf16.mxu1 %v2175_v22  ;;  %v635_v53 = vld [vmem:[%s2871_s6 + $0x8] sm:$0xff]  ;;  %v2199_v57 = vpack.c.bf16 %v637_v56, %v636_v54  ;;  %v638_v58 = vld [vmem:[%s2871_s6 + $0x20] sm:$0xff]  ;;  %v640_v62 = vld [vmem:[%s2871_s6 + $0x30] sm:$0xff] }
  0x13   : > { %2142 = vmatpush3.bf16.msra.mxu0 %v2139_v19  ;;  %v2195_v55 = vpack.c.bf16 %v635_v53, %v634_v52  ;;  %v639_v59 = vld [vmem:[%s2871_s6 + $0x28] sm:$0xff]  ;;  %v1797_v60 = vld [vmem:[%s2870_s5] ss:$0 sm:$0xff]  ;;  %v641_v63 = vld [vmem:[%s2871_s6 + $0x38] sm:$0xff] }
  0x14   : > { %2144 = vmatprep.subr.bf16.mxu0 %v2143_v25  ;;  %v2203_v61 = vpack.c.bf16 %v639_v59, %v638_v58  ;;  %v1796_v1 = vld [vmem:[%s2868_s3] ss:$0 sm:$0xff]  ;;  %v2207_v7 = vpack.c.bf16 %v641_v63, %v640_v62  ;;  %vm2630_vm1 = vmpackc.low %vm734_vm0, %vm734_vm0  ;;  %v643_v11 = vld [vmem:[%s2871_s6 + $0x48] sm:$0xff] }
  0x15   : > { %2178 = vmatpush3.bf16.msra.mxu1 %v2175_v22  ;;  %v642_v10 = vld [vmem:[%s2871_s6 + $0x40] sm:$0xff]  ;;  %v644_v16 = vld [vmem:[%s2871_s6 + $0x50] sm:$0xff]  ;;  %v645_v17 = vld [vmem:[%s2871_s6 + $0x58] sm:$0xff] }
  0x16   : > { %2180 = vmatprep.subr.bf16.mxu1 %v2179_v30  ;;  %v2211_v15 = vpack.c.bf16 %v643_v11, %v642_v10  ;;  %v2215_v19 = vpack.c.bf16 %v645_v17, %v644_v16  ;;  %v646_v20 = vld [vmem:[%s2871_s6 + $0x60] sm:$0xff]  ;;  %v647_v21 = vld [vmem:[%s2871_s6 + $0x68] sm:$0xff]  ;;  %v648_v24 = vld [vmem:[%s2871_s6 + $0x70] sm:$0xff] }
  0x17   : > { %2146 = vmatpush3.bf16.msra.mxu0 %v2143_v25  ;;  %v2219_v23 = vpack.c.bf16 %v647_v21, %v646_v20  ;;  %v649_v25 = vld [vmem:[%s2871_s6 + $0x78] sm:$0xff] }
  0x18   : > { %2148 = vmatprep.subr.bf16.mxu0 %v2147_v33 }
  0x19   : > { %2182 = vmatpush3.bf16.msra.mxu1 %v2179_v30  ;;  %v2677_v30 = vand.u32 127, %v822_v27 }
  0x1a   : > { %2184 = vmatprep.subr.bf16.mxu1 %v2183_v36 }
  0x1b   : > { %2150 = vmatpush3.bf16.msra.mxu0 %v2147_v33  ;;  %vm827_vm2 = vcmp.le.s32.totalorder %v2677_v30, %v2675_v28  ;;  %vm828_vm4 = vcmp.le.s32.totalorder %v2677_v30, %v2680_v31 }
  0x1c   : > { %2152 = vmatprep.subr.bf16.mxu0 %v2151_v39 }
  0x1d   : > { %2186 = vmatpush3.bf16.msra.mxu1 %v2183_v36 }
  0x1e   : > { %2188 = vmatprep.subr.bf16.mxu1 %v2187_v42 }
  0x1f   : > { %2154 = vmatpush3.bf16.msra.mxu0 %v2151_v39  ;;  %v1798_v39 = vld [vmem:[%s2872_s7] ss:$0 sm:$0xff] }
  0x20   : > { %2156 = vmatprep.subr.bf16.mxu0 %v2155_v45 }
  0x21   : > { %2190 = vmatpush3.bf16.msra.mxu1 %v2187_v42 }
  0x22   : > { %2192 = vmatprep.subr.bf16.mxu1 %v2191_v48 }
  0x23   : > { %2158 = vmatpush3.bf16.msra.mxu0 %v2155_v45 }
  0x24   : > { %2160 = vmatprep.subr.bf16.mxu0 %v2159_v49 }
  0x25   : > { %2194 = vmatpush3.bf16.msra.mxu1 %v2191_v48 }
  0x27   : > { %2162 = vmatpush3.bf16.msra.mxu0 %v2159_v49 }
  0x28   : > { %2003 = vmatmul.mubr.f32.vlgmr.msra.gmra.mrb[0].mxu1 %v2591_v50  ;;  %2196 = vmatprep.subr.bf16.mxu0 %v2195_v55 }
  0x2a   : > { %1968 = vmatmul.mubr.f32.vlgmr.msra.gmra.mrb[0].mxu0 %v2594_v51 }
  0x2b   : > { %2037 = vmatprep.mubr.f32.mxu0 %v436_v26  ;;  %2198 = vmatpush3.bf16.msra.mxu0 %v2195_v55  ;;  %v2223_v26 = vpack.c.bf16 %v649_v25, %v648_v24 }
  0x2c   : > { %2200 = vmatprep.subr.bf16.mxu0 %v2199_v57 }
  0x2f   : > { %2202 = vmatpush3.bf16.msra.mxu0 %v2199_v57 }
  0x30   : > { %2204 = vmatprep.subr.bf16.mxu0 %v2203_v61 }
  0x33   : > { %2206 = vmatpush3.bf16.msra.mxu0 %v2203_v61 }
  0x34   : > { %2208 = vmatprep.subr.bf16.mxu0 %v2207_v7 }
  0x37   : > { %2210 = vmatpush3.bf16.msra.mxu0 %v2207_v7 }
  0x38   : > { %2212 = vmatprep.subr.bf16.mxu0 %v2211_v15 }
  0x3b   : > { %2214 = vmatpush3.bf16.msra.mxu0 %v2211_v15 }
  0x3c   : > { %2216 = vmatprep.subr.bf16.mxu0 %v2215_v19 }
  0x3f   : > { %2218 = vmatpush3.bf16.msra.mxu0 %v2215_v19 }
  0x40   : > { %2220 = vmatprep.subr.bf16.mxu0 %v2219_v23 }
  0x43   : > { %2222 = vmatpush3.bf16.msra.mxu0 %v2219_v23 }
  0x44   : > { %2224 = vmatprep.subr.bf16.mxu0 %v2223_v26 }
  0x47   : > { %2226 = vmatpush3.bf16.msra.mxu0 %v2223_v26 }
  0x4a   : > { %2038 = vmatmul.mubr.f32.vlgmr.msra.gmra.mrb[2].mxu0 %v2591_v50 }
  0xfb   : > { %v2004_v0 = vpop.f32.mrb[0].mxu1 }
  0xfc   : > { %v631_v2 = vadd.f32 %v2004_v0, %v1797_v60  ;;  %v625_v3 = vpop.f32.mrb[1].mxu1 }
  0xfd   : > { %v1969_v4 = vpop.f32.mrb[0].mxu0  ;;  %v626_v5 = vadd.f32 %v1797_v60, %v625_v3 }
  0xfe   : > { %v527_v6 = vpop.f32.mrb[1].mxu0  ;;  %v533_v18 = vadd.f32 %v1969_v4, %v1796_v1 }
  0xff   : > { %v528_v9 = vadd.f32 %v1796_v1, %v527_v6  ;;  %v2227_v12 = vpack.c.bf16 %v631_v2, %v626_v5  ;;  %v2640_v13 = vpack.i.bf16 %v631_v2, %v626_v5 }
 0x100   : > { %v2664_v22 = vmul.f32 0.17677669, %v533_v18 }
 0x101   : > { %v2642_v14 = vmul.f32 0.17677669, %v528_v9  ;;  %2229 = vmatprep.subr.msk.bf16.mxu1 %vm2630_vm1, %v2227_v12 }
 0x102   : > { %2232 = vmatpush3.bf16.xpose.msk.msra.mxu1 %vm2630_vm1, %v2227_v12 }
 0x103   : > { %935 = vrot.lane.b32.xlu1 %v2642_v14, %s2399_s23  ;;  %2044 = vmatprep.mubr.msk.f32.mxu1 %vm734_vm0, %v2642_v14 }
 0x109   : > { %2045 = vmatmul.mubr.msk.f32.vlgmr.msra.gmra.mrb[2].mxu1 %vm734_vm0, %v2664_v22 }
 0x11d   : > { %v2039_v38 = vpop.f32.mrb[2].mxu0 }
 0x11e   : > { %v723_v40 = vpop.f32.mrb[3].mxu0  ;;  %v729_v41 = vadd.f32 %v2039_v38, %v1798_v39 }
 0x11f   : > { %v724_v42 = vadd.f32 %v1798_v39, %v723_v40 }
 0x121   : > { %v2233_v43 = vpack.c.bf16 %v729_v41, %v724_v42  ;;  %v2723_v12 = vpack.i.bf16 %v729_v41, %v724_v42 }
 0x123   : > { %2234 = vmatprep.subr.bf16.mxu1 %v2233_v43 }
 0x124   : > { %2236 = vmatpush3.bf16.msra.mxu1 %v2233_v43 }
 0x175   : > { %v936_v59 = vpop.permute.xlu1 %935 }
 0x1dc   : > { %v2046_v32 = vpop.f32.mrb[2].mxu1 }
 0x1dd   : > { %v813_v33 = vpop.f32.mrb[3].mxu1  ;;  %v830_v36 = vsel %vm828_vm4, %v2046_v32, -1e+30 }
 0x1de   : > { %v829_v34 = vsel %vm827_vm2, %v813_v33, -1e+30  ;;  %v835_v37 = vsel %vm831_vm3, %v830_v36, -inf }
 0x1df   : > { %v832_v35 = vsel %vm831_vm3, %v829_v34, -inf }
 0x1e0   : > { %833 = vmax.xlane.f32.xlu0 %v832_v35 }
 0x1e4   : > { %836 = vmax.xlane.f32.xlu0 %v835_v37 }
 0x1fa   : > { %2311 = vrot.lane.b32.xlu0 %v2640_v13, %s2399_s23 }
 0x26d   : > { %v834_v44 = vpop.xlane.xlu0 %833 }
 0x26e   : > { %v838_v45 = vsub.f32 %v829_v34, %v834_v44 }
 0x270   : > { %v840_v48 = vmul.f32 1.442695, %v838_v45 }
 0x271   : > { %v837_v46 = vpop.xlane.xlu0 %836 }
 0x272   : > { %v839_v47 = vsub.f32 %v830_v36, %v837_v46 }
 0x274   : > { %v842_v49 = vmul.f32 1.442695, %v839_v47 }
 0x275   : > { %v2312_v50 = vpop.permute.xlu0 %2311 }
 0x276   : > { %2355 = vpow2.f32 %v842_v49  ;;  %v2314_v52 = vunpack.i.h.bf16 %v2312_v50  ;;  %v2313_v53 = vunpack.i.l.bf16 %v2312_v50 }
 0x277   : > { %2357 = vpow2.f32 %v840_v48 }
 0x278   : > { %v2237_v54 = vpack.c.bf16 %v2314_v52, %v2313_v53 }
 0x27a   : > { %2239 = vmatprep.subr.msk.bf16.mxu1 %vm2630_vm1, %v2237_v54 }
 0x280   : > { %v2356_v55 = vpop.eup %2355 }
 0x281   : > { %v847_v56 = vsel %vm831_vm3, %v2356_v55, 0.0  ;;  %v2358_v57 = vpop.eup %2357 }
 0x282   : > { %848 = vadd.xlane.f32.xlu1 %v847_v56  ;;  %v844_v58 = vsel %vm831_vm3, %v2358_v57, 0.0 }
 0x286   : > { %845 = vadd.xlane.f32.xlu1 %v844_v58 }
 0x297   : > { %937 = vrot.lane.b32.xlu1 %v2664_v22, %s2399_s23 }
 0x30f   : > { %v849_v60 = vpop.xlane.xlu1 %848 }
 0x310   : > { %2359 = vrcp.f32 %v849_v60 }
 0x313   : > { %v846_v61 = vpop.xlane.xlu1 %845 }
 0x314   : > { %2361 = vrcp.f32 %v846_v61 }
 0x317   : > { %v938_v2 = vpop.permute.xlu1 %937 }
 0x31a   : > { %v2360_v62 = vpop.eup %2359 }
 0x31b   : > { %v853_v1 = vmul.f32 %v2360_v62, %v2356_v55 }
 0x31e   : > { %v2362_v63 = vpop.eup %2361 }
 0x31f   : > { %v852_v0 = vmul.f32 %v2362_v63, %v2358_v57 }
 0x321   : > { %2051 = vmatprep.mubr.msk.f32.mxu1 %vm831_vm3, %v852_v0 }
 0x322   : > { %2052 = vmatmul.mubr.msk.f32.vlgmr.msra.gmra.mrb[4].mxu1 %vm831_vm3, %v853_v1 }
 0x323   : > { %2242 = vmatpush3.bf16.xpose.msk.msra.mxu1 %vm2630_vm1, %v2237_v54  ;;  %2058 = vmatprep.mubr.msk.f32.mxu1 %vm734_vm0, %v936_v59 }
 0x32a   : > { %2059 = vmatmul.mubr.msk.f32.vlgmr.msra.gmra.mrb[6].mxu1 %vm734_vm0, %v938_v2 }
 0x3f5   : > { %v2711_v3 = vpop.f32.mrb[4].mxu1 }
 0x3f6   : > { %v2713_v4 = vpop.f32.mrb[5].mxu1 }
 0x3fd   : > { %v2060_v5 = vpop.f32.mrb[6].mxu1 }
 0x3fe   : > { %v1027_v6 = vsel %vm828_vm4, %v2060_v5, -1e+30  ;;  %v1017_v7 = vpop.f32.mrb[7].mxu1 }
 0x3ff   : > { %v1026_v9 = vsel %vm827_vm2, %v1017_v7, -1e+30  ;;  %v1031_v10 = vsel %vm831_vm3, %v1027_v6, -inf }
 0x400   : > { %1032 = vmax.xlane.f32.xlu0 %v1031_v10  ;;  %v1028_v11 = vsel %vm831_vm3, %v1026_v9, -inf }
 0x401   : > { %1029 = vmax.xlane.f32.xlu1 %v1028_v11 }
 0x412   : > { %2316 = vrot.lane.b32.xlu1 %v2723_v12, %s2399_s23 }
 0x416   : > { %1139 = vrot.lane.b32.xlu1 %v2642_v14, %s2400_s28 }
 0x41a   : > { %1141 = vrot.lane.b32.xlu1 %v2664_v22, %s2400_s28 }
 0x48d   : > { %v1033_v15 = vpop.xlane.xlu0 %1032 }
 0x48e   : > { %v1035_v16 = vsub.f32 %v1027_v6, %v1033_v15  ;;  %v1030_v17 = vpop.xlane.xlu1 %1029 }
 0x48f   : > { %v1034_v18 = vsub.f32 %v1026_v9, %v1030_v17 }
 0x490   : > { %v1038_v19 = vmul.f32 1.442695, %v1035_v16 }
 0x491   : > { %v1036_v20 = vmul.f32 1.442695, %v1034_v18 }
 0x492   : > { %2363 = vpow2.f32 %v1038_v19  ;;  %v2317_v21 = vpop.permute.xlu1 %2316 }
 0x493   : > { %v2319_v23 = vunpack.i.h.bf16 %v2317_v21  ;;  %v2318_v24 = vunpack.i.l.bf16 %v2317_v21  ;;  %2365 = vpow2.f32 %v1036_v20 }
 0x495   : > { %v2243_v25 = vpack.c.bf16 %v2319_v23, %v2318_v24 }
 0x496   : > { %v1140_v44 = vpop.permute.xlu1 %1139 }
 0x497   : > { %2244 = vmatprep.subr.bf16.mxu1 %v2243_v25 }
 0x498   : > { %2246 = vmatpush3.bf16.msra.mxu1 %v2243_v25 }
 0x49a   : > { %v1142_v45 = vpop.permute.xlu1 %1141 }
 0x49c   : > { %v2364_v26 = vpop.eup %2363 }
 0x49d   : > { %v1043_v27 = vsel %vm831_vm3, %v2364_v26, 0.0  ;;  %v2366_v32 = vpop.eup %2365 }
 0x49e   : > { %1044 = vadd.xlane.f32.xlu0 %v1043_v27  ;;  %v1040_v33 = vsel %vm831_vm3, %v2366_v32, 0.0 }
 0x4a2   : > { %1041 = vadd.xlane.f32.xlu0 %v1040_v33 }
 0x4b8   : > { %2321 = vrot.lane.b32.xlu0 %v2640_v13, %s2400_s28 }
 0x52b   : > { %v1045_v34 = vpop.xlane.xlu0 %1044 }
 0x52c   : > { %2367 = vrcp.f32 %v1045_v34 }
 0x52f   : > { %v1042_v35 = vpop.xlane.xlu0 %1041 }
 0x530   : > { %2369 = vrcp.f32 %v1042_v35 }
 0x533   : > { %v2322_v36 = vpop.permute.xlu0 %2321 }
 0x534   : > { %v2324_v37 = vunpack.i.h.bf16 %v2322_v36  ;;  %v2323_v38 = vunpack.i.l.bf16 %v2322_v36 }
 0x536   : > { %v2247_v39 = vpack.c.bf16 %v2324_v37, %v2323_v38  ;;  %v2368_v40 = vpop.eup %2367 }
 0x537   : > { %v1049_v43 = vmul.f32 %v2368_v40, %v2364_v26 }
 0x538   : > { %2249 = vmatprep.subr.msk.bf16.mxu1 %vm2630_vm1, %v2247_v39 }
 0x53a   : > { %v2370_v41 = vpop.eup %2369 }
 0x53b   : > { %v1048_v42 = vmul.f32 %v2370_v41, %v2366_v32 }
 0x53d   : > { %2065 = vmatprep.mubr.msk.f32.mxu1 %vm831_vm3, %v1048_v42 }
 0x53e   : > { %2066 = vmatmul.mubr.msk.f32.vlgmr.msra.gmra.mrb[8].mxu1 %vm831_vm3, %v1049_v43 }
 0x53f   : > { %2252 = vmatpush3.bf16.xpose.msk.msra.mxu1 %vm2630_vm1, %v2247_v39  ;;  %2072 = vmatprep.mubr.msk.f32.mxu1 %vm734_vm0, %v1140_v44 }
 0x546   : > { %2073 = vmatmul.mubr.msk.f32.vlgmr.msra.gmra.mrb[10].mxu1 %vm734_vm0, %v1142_v45 }
 0x611   : > { %v2743_v46 = vpop.f32.mrb[8].mxu1 }
 0x612   : > { %v2745_v47 = vpop.f32.mrb[9].mxu1 }
 0x613   : > { %v2340_v48 = vpack.i.bf16 %v2743_v46, %v2745_v47  ;;  %v1576_v46 = vld [vmem:[%s2873_s8 + $0x8] sm:$0xff]  ;;  %v1577_v47 = vld [vmem:[%s2873_s8 + $0x10] sm:$0xff] }
 0x619   : > { %v2074_v49 = vpop.f32.mrb[10].mxu1 }
 0x61a   : > { %v1231_v50 = vsel %vm828_vm4, %v2074_v49, -1e+30  ;;  %v1221_v52 = vpop.f32.mrb[11].mxu1 }
 0x61b   : > { %v1230_v53 = vsel %vm827_vm2, %v1221_v52, -1e+30  ;;  %v1235_v54 = vsel %vm831_vm3, %v1231_v50, -inf }
 0x61c   : > { %1236 = vmax.xlane.f32.xlu0 %v1235_v54  ;;  %v1232_v55 = vsel %vm831_vm3, %v1230_v53, -inf  ;;  %v1575_v54 = vld [vmem:[%s2873_s8] sm:$0xff] }
 0x61d   : > { %1233 = vmax.xlane.f32.xlu1 %v1232_v55  ;;  %v1578_v55 = vld [vmem:[%s2873_s8 + $0x18] sm:$0xff] }
 0x62e   : > { %2326 = vrot.lane.b32.xlu1 %v2723_v12, %s2400_s28 }
 0x632   : > { %1341 = vrot.lane.b32.xlu1 %v2642_v14, %s2401_s24 }
 0x636   : > { %1343 = vrot.lane.b32.xlu1 %v2664_v22, %s2401_s24 }
 0x6a9   : > { %v1237_v56 = vpop.xlane.xlu0 %1236 }
 0x6aa   : > { %v1239_v57 = vsub.f32 %v1231_v50, %v1237_v56  ;;  %v1234_v58 = vpop.xlane.xlu1 %1233  ;;  %v2271_v56 = vpack.c.bf16 %v1578_v55, %v1577_v47  ;;  %v1825_v47 = vld [vmem:[%s2876_s11] ss:$0 sm:$0xff] }
 0x6ab   : > { %v1238_v59 = vsub.f32 %v1230_v53, %v1234_v58  ;;  %v1580_v58 = vld [vmem:[%s2873_s8 + $0x28] sm:$0xff] }
 0x6ac   : > { %v1242_v60 = vmul.f32 1.442695, %v1239_v57  ;;  %v1579_v57 = vld [vmem:[%s2873_s8 + $0x20] sm:$0xff] }
 0x6ad   : > { %v1240_v61 = vmul.f32 1.442695, %v1238_v59  ;;  %v2275_v59 = vpack.c.bf16 %v1580_v58, %v1579_v57 }
 0x6ae   : > { %2371 = vpow2.f32 %v1242_v60  ;;  %v2327_v62 = vpop.permute.xlu1 %2326  ;;  %v1581_v60 = vld [vmem:[%s2873_s8 + $0x30] sm:$0xff] }
 0x6af   : > { %v2329_v63 = vunpack.i.h.bf16 %v2327_v62  ;;  %v2328_v0 = vunpack.i.l.bf16 %v2327_v62  ;;  %2373 = vpow2.f32 %v1240_v61  ;;  %v1582_v61 = vld [vmem:[%s2873_s8 + $0x38] sm:$0xff] }
 0x6b0   : > { %v2279_v62 = vpack.c.bf16 %v1582_v61, %v1581_v60 }
 0x6b1   : > { %v2253_v1 = vpack.c.bf16 %v2329_v63, %v2328_v0  ;;  %v1583_v63 = vld [vmem:[%s2873_s8 + $0x40] sm:$0xff]  ;;  %v1584_v0 = vld [vmem:[%s2873_s8 + $0x48] sm:$0xff] }
 0x6b2   : > { %v1342_v20 = vpop.permute.xlu1 %1341 }
 0x6b3   : > { %2254 = vmatprep.subr.bf16.mxu1 %v2253_v1 }
 0x6b4   : > { %2256 = vmatpush3.bf16.msra.mxu1 %v2253_v1  ;;  %v2283_v1 = vpack.c.bf16 %v1584_v0, %v1583_v63 }
 0x6b8   : > { %v2372_v2 = vpop.eup %2371 }
 0x6b9   : > { %v1247_v14 = vsel %vm831_vm3, %v2372_v2, 0.0  ;;  %v2374_v5 = vpop.eup %2373 }
 0x6ba   : > { %1248 = vadd.xlane.f32.xlu0 %v1247_v14  ;;  %v1244_v22 = vsel %vm831_vm3, %v2374_v5, 0.0  ;;  %v1586_v14 = vld [vmem:[%s2873_s8 + $0x58] sm:$0xff] }
 0x6be   : > { %1245 = vadd.xlane.f32.xlu0 %v1244_v22  ;;  %v1587_v22 = vld [vmem:[%s2873_s8 + $0x60] sm:$0xff] }
 0x6d4   : > { %2331 = vrot.lane.b32.xlu0 %v2640_v13, %s2401_s24  ;;  %v1344_v13 = vpop.permute.xlu1 %1343 }
 0x747   : > { %v1249_v6 = vpop.xlane.xlu0 %1248 }
 0x748   : > { %2375 = vrcp.f32 %v1249_v6  ;;  %v1588_v6 = vld [vmem:[%s2873_s8 + $0x68] sm:$0xff] }
 0x74b   : > { %v1246_v7 = vpop.xlane.xlu0 %1245 }
 0x74c   : > { %2377 = vrcp.f32 %v1246_v7  ;;  %v2291_v7 = vpack.c.bf16 %v1588_v6, %v1587_v22 }
 0x74f   : > { %v2332_v9 = vpop.permute.xlu0 %2331 }
 0x750   : > { %v2334_v10 = vunpack.i.h.bf16 %v2332_v9  ;;  %v2333_v11 = vunpack.i.l.bf16 %v2332_v9  ;;  %v1589_v9 = vld [vmem:[%s2873_s8 + $0x70] sm:$0xff] }
 0x752   : > { %v2257_v15 = vpack.c.bf16 %v2334_v10, %v2333_v11  ;;  %v2376_v16 = vpop.eup %2375  ;;  %v1590_v10 = vld [vmem:[%s2873_s8 + $0x78] sm:$0xff] }
 0x753   : > { %v1253_v19 = vmul.f32 %v2376_v16, %v2372_v2  ;;  %v1585_v2 = vld [vmem:[%s2873_s8 + $0x50] sm:$0xff]  ;;  %v2295_v11 = vpack.c.bf16 %v1590_v10, %v1589_v9 }
 0x754   : > { %2259 = vmatprep.subr.msk.bf16.mxu1 %vm2630_vm1, %v2257_v15 }
 0x756   : > { %v2378_v17 = vpop.eup %2377 }
 0x757   : > { %v1252_v18 = vmul.f32 %v2378_v17, %v2374_v5  ;;  %v2287_v5 = vpack.c.bf16 %v1586_v14, %v1585_v2 }
 0x759   : > { %2079 = vmatprep.mubr.msk.f32.mxu1 %vm831_vm3, %v1252_v18 }
 0x75a   : > { %2080 = vmatmul.mubr.msk.f32.vlgmr.msra.gmra.mrb[12].mxu1 %vm831_vm3, %v1253_v19 }
 0x75b   : > { %2262 = vmatpush3.bf16.xpose.msk.msra.mxu1 %vm2630_vm1, %v2257_v15  ;;  %2086 = vmatprep.mubr.msk.f32.mxu1 %vm734_vm0, %v1342_v20 }
 0x762   : > { %2087 = vmatmul.mubr.msk.f32.vlgmr.msra.gmra.mrb[14].mxu1 %vm734_vm0, %v1344_v13 }
 0x82d   : > { %v2081_v21 = vpop.f32.mrb[12].mxu1 }
 0x82e   : > { %v1332_v23 = vpop.f32.mrb[13].mxu1 }
 0x82f   : > { %v2345_v24 = vpack.i.bf16 %v2081_v21, %v1332_v23 }
 0x835   : > { %v2088_v25 = vpop.f32.mrb[14].mxu1 }
 0x836   : > { %v1433_v26 = vsel %vm828_vm4, %v2088_v25, -1e+30  ;;  %v1423_v27 = vpop.f32.mrb[15].mxu1 }
 0x837   : > { %v1432_v32 = vsel %vm827_vm2, %v1423_v27, -1e+30  ;;  %v1437_v8 = vsel %vm831_vm3, %v1433_v26, -inf }
 0x838   : > { %1438 = vmax.xlane.f32.xlu0 %v1437_v8  ;;  %v1434_v33 = vsel %vm831_vm3, %v1432_v32, -inf }
 0x839   : > { %1435 = vmax.xlane.f32.xlu1 %v1434_v33 }
 0x84a   : > { %2336 = vrot.lane.b32.xlu1 %v2723_v12, %s2401_s24 }
 0x84e   : > { %2346 = vrot.lane.b32.xlu1 %v2345_v24, %s2400_s28 }
 0x8c5   : > { %v1439_v34 = vpop.xlane.xlu0 %1438 }
 0x8c6   : > { %v1441_v35 = vsub.f32 %v1433_v26, %v1439_v34  ;;  %v1436_v31 = vpop.xlane.xlu1 %1435 }
 0x8c7   : > { %v1440_v36 = vsub.f32 %v1432_v32, %v1436_v31 }
 0x8c8   : > { %v1444_v37 = vmul.f32 1.442695, %v1441_v35 }
 0x8c9   : > { %v1442_v38 = vmul.f32 1.442695, %v1440_v36 }
 0x8ca   : > { %v2337_v39 = vpop.permute.xlu1 %2336 }
 0x8cb   : > { %2379 = vpow2.f32 %v1442_v38  ;;  %v2339_v28 = vunpack.i.h.bf16 %v2337_v39  ;;  %v2338_v30 = vunpack.i.l.bf16 %v2337_v39 }
 0x8cc   : > { %2381 = vpow2.f32 %v1444_v37 }
 0x8cd   : > { %v2263_v40 = vpack.c.bf16 %v2339_v28, %v2338_v30 }
 0x8ce   : > { %v2347_v13 = vpop.permute.xlu1 %2346 }
 0x8cf   : > { %2264 = vmatprep.subr.bf16.mxu1 %v2263_v40  ;;  %v2349_v24 = vunpack.i.h.bf16 %v2347_v13  ;;  %v2348_v25 = vunpack.i.l.bf16 %v2347_v13 }
 0x8d0   : > { %2266 = vmatpush3.bf16.msra.mxu1 %v2263_v40 }
 0x8d5   : > { %v2380_v41 = vpop.eup %2379 }
 0x8d6   : > { %v1446_v42 = vsel %vm831_vm3, %v2380_v41, 0.0  ;;  %v2382_v12 = vpop.eup %2381 }
 0x8d7   : > { %1447 = vadd.xlane.f32.xlu0 %v1446_v42  ;;  %v1449_v43 = vsel %vm831_vm3, %v2382_v12, 0.0 }
 0x8db   : > { %1450 = vadd.xlane.f32.xlu0 %v1449_v43 }
 0x8f1   : > { %2341 = vrot.lane.b32.xlu0 %v2340_v48, %s2401_s24  ;;  %v2267_v48 = vpack.c.bf16 %v1576_v46, %v1575_v54  ;;  %v1824_v54 = vld [vmem:[%s2875_s10] ss:$0 sm:$0xff] }
 0x8f3   : > { %2268 = vmatprep.subr.bf16.mxu0 %v2267_v48 }
 0x8f4   : > { %2270 = vmatpush3.bf16.msra.mxu0 %v2267_v48 }
 0x8f5   : > { %2272 = vmatprep.subr.bf16.mxu0 %v2271_v56 }
 0x8f8   : > { %2274 = vmatpush3.bf16.msra.mxu0 %v2271_v56 }
 0x8f9   : > { %2276 = vmatprep.subr.bf16.mxu0 %v2275_v59 }
 0x8fc   : > { %2278 = vmatpush3.bf16.msra.mxu0 %v2275_v59 }
 0x8fd   : > { %2280 = vmatprep.subr.bf16.mxu0 %v2279_v62 }
 0x900   : > { %2282 = vmatpush3.bf16.msra.mxu0 %v2279_v62 }
 0x901   : > { %2284 = vmatprep.subr.bf16.mxu0 %v2283_v1 }
 0x904   : > { %2286 = vmatpush3.bf16.msra.mxu0 %v2283_v1 }
 0x905   : > { %2288 = vmatprep.subr.bf16.mxu0 %v2287_v5 }
 0x908   : > { %2290 = vmatpush3.bf16.msra.mxu0 %v2287_v5 }
 0x909   : > { %2292 = vmatprep.subr.bf16.mxu0 %v2291_v7 }
 0x90c   : > { %2294 = vmatpush3.bf16.msra.mxu0 %v2291_v7 }
 0x90d   : > { %2296 = vmatprep.subr.bf16.mxu0 %v2295_v11 }
 0x910   : > { %2298 = vmatpush3.bf16.msra.mxu0 %v2295_v11 }
 0x964   : > { %v1448_v44 = vpop.xlane.xlu0 %1447 }
 0x965   : > { %2383 = vrcp.f32 %v1448_v44 }
 0x968   : > { %v1451_v45 = vpop.xlane.xlu0 %1450 }
 0x969   : > { %2385 = vrcp.f32 %v1451_v45 }
 0x96c   : > { %v2342_v18 = vpop.permute.xlu0 %2341 }
 0x96d   : > { %v2344_v19 = vunpack.i.h.bf16 %v2342_v18  ;;  %v2343_v20 = vunpack.i.l.bf16 %v2342_v18 }
 0x96f   : > { %v2384_v49 = vpop.eup %2383  ;;  %v1568_v21 = vsel %vm734_vm0, %v2711_v3, %v2344_v19  ;;  %v1567_v23 = vsel %vm734_vm0, %v2713_v4, %v2343_v20  ;;  %v1823_v3 = vld [vmem:[%s2874_s9] ss:$0 sm:$0xff] }
 0x970   : > { %v1454_v50 = vmul.f32 %v2384_v49, %v2380_v41  ;;  %v1570_v8 = vsel %vm1569_vm5, %v1567_v23, %v2348_v25  ;;  %v1571_v33 = vsel %vm1569_vm5, %v1568_v21, %v2349_v24 }
 0x972   : > { %2093 = vmatprep.mubr.msk.f32.mxu1 %vm831_vm3, %v1454_v50 }
 0x973   : > { %v2386_v52 = vpop.eup %2385 }
 0x974   : > { %v1455_v53 = vmul.f32 %v2386_v52, %v2382_v12 }
 0x976   : > { %2094 = vmatmul.mubr.msk.f32.vlgmr.msra.gmra.mrb[16].mxu1 %vm831_vm3, %v1455_v53 }
 0xa49   : > { %v2095_v15 = vpop.f32.mrb[16].mxu1 }
 0xa4a   : > { %v1534_v16 = vpop.f32.mrb[17].mxu1 }
 0xa4b   : > { %v2350_v17 = vpack.i.bf16 %v2095_v15, %v1534_v16 }
 0xa4d   : > { %2351 = vrot.lane.b32.xlu1 %v2350_v17, %s2399_s23 }
 0xabf   : > { %v2352_v26 = vpop.permute.xlu1 %2351 }
 0xac0   : > { %v2354_v27 = vunpack.i.h.bf16 %v2352_v26  ;;  %v2353_v32 = vunpack.i.l.bf16 %v2352_v26 }
 0xac2   : > { %v1573_v34 = vsel %vm1572_vm6, %v1570_v8, %v2353_v32  ;;  %v1574_v35 = vsel %vm1572_vm6, %v1571_v33, %v2354_v27 }
 0xac3   : > { %2128 = vmatprep.mubr.f32.mxu0 %v1573_v34 }
 0xac4   : > { %2129 = vmatmul.mubr.f32.vlgmr.msra.gmra.mrb[4].mxu0 %v1574_v35 }
 0xb97   : > { %v2130_v31 = vpop.f32.mrb[4].mxu0 }
 0xb98   : > { %v1670_v36 = vadd.f32 %v2130_v31, %v1823_v3  ;;  %v1664_v4 = vpop.f32.mrb[5].mxu0 }
 0xb99   : > { %v1665_v37 = vadd.f32 %v1823_v3, %v1664_v4 }
 0xb9a   : > { %v1674_v38 = vadd.f32 %v1670_v36, %v2594_v51 }
 0xb9b   : > { %v1673_v39 = vadd.f32 %v1665_v37, %v2551_v29 }
 0xb9c   : > { %1677 = vadd.xlane.f32.xlu0 %v1674_v38 }
 0xb9d   : > { %1675 = vadd.xlane.f32.xlu1 %v1673_v39 }
 0xc29   : > { %v1678_v28 = vpop.xlane.xlu0 %1677 }
 0xc2a   : > { %v1676_v30 = vpop.xlane.xlu1 %1675  ;;  %v1681_v40 = vmul.f32 0.0078125, %v1678_v28 }
 0xc2b   : > { %v1680_v41 = vmul.f32 0.0078125, %v1676_v30 }
 0xc2c   : > { %v1683_v12 = vsub.f32 %v1674_v38, %v1681_v40 }
 0xc2d   : > { %v1682_v42 = vsub.f32 %v1673_v39, %v1680_v41 }
 0xc2e   : > { %v1685_v44 = vmul.f32 %v1683_v12, %v1683_v12 }
 0xc2f   : > { %v1684_v43 = vmul.f32 %v1682_v42, %v1682_v42 }
 0xc31   : > { %1686 = vadd.xlane.f32.xlu0 %v1684_v43 }
 0xc35   : > { %1688 = vadd.xlane.f32.xlu0 %v1685_v44 }
 0xcbe   : > { %v1687_v45 = vpop.xlane.xlu0 %1686 }
 0xcbf   : > { %v1690_v49 = vmul.f32 0.0078125, %v1687_v45 }
 0xcc1   : > { %v1692_v50 = vadd.f32 1e-05, %v1690_v49 }
 0xcc2   : > { %v1689_v52 = vpop.xlane.xlu0 %1688 }
 0xcc3   : > { %2387 = vrsqrt.f32 %v1692_v50  ;;  %v1691_v51 = vmul.f32 0.0078125, %v1689_v52 }
 0xcc5   : > { %v1693_v29 = vadd.f32 1e-05, %v1691_v51 }
 0xcc7   : > { %2389 = vrsqrt.f32 %v1693_v29 }
 0xccd   : > { %v2388_v53 = vpop.eup %2387 }
 0xcce   : > { %v1696_v46 = vmul.f32 %v2388_v53, %v1682_v42 }
 0xcd0   : > { %v1705_v48 = vmul.f32 %v1824_v54, %v1696_v46 }
 0xcd1   : > { %v2390_v55 = vpop.eup %2389 }
 0xcd2   : > { %v1714_v56 = vadd.f32 %v1825_v47, %v1705_v48  ;;  %v1697_v57 = vmul.f32 %v2390_v55, %v1683_v12 }
 0xcd4   : > { %1716 = vst [vmem:[%s433_s19] sm:$0xff] %v1714_v56  ;;  %v1706_v58 = vmul.f32 %v1824_v54, %v1697_v57 }
 0xcd6   : > { %v1715_v59 = vadd.f32 %v1825_v47, %v1706_v58 }
 0xcd8   : > { %1717 = vst [vmem:[%s433_s19 + $0x8] sm:$0xff] %v1715_v59 }
 0xcd9 PF: > { %s22_s21 = sadd.s32 1, %s2397_s21  }
 0xcda   : > { %p19_p4 = scmp.ge.s32.totalorder %s22_s21, 4  }
 0xcdc   :  { %21 = sbr.rel (!%p19_p4) target bundleno = 1 (0x1), region = 101 }

// kernel: transformer_forward.19
= control target key start
LH: loop header
LB: loop body
LE: loop exit
PB: predicated region body
PF: predicated region fallthrough
CT: control target
= control target key end

     0   :  { %v898_v7 = vmov 0.0   ;;  %s1390_s0 = inlined_call_operand.vmem [shape: f32[32,128], index: 0, kind: input, shape index: {}]   ;;  %s1391_s1 = inlined_call_operand.vmem [shape: f32[128,512], index: 1, kind: input, shape index: {}]   ;;  %s1392_s2 = inlined_call_operand.vmem [shape: f32[1,512], index: 2, kind: input, shape index: {}]   ;;  %s1393_s3 = inlined_call_operand.vmem [shape: f32[512,128], index: 3, kind: input, shape index: {}]   ;;  %s1394_s4 = inlined_call_operand.vmem [shape: f32[1,128], index: 4, kind: input, shape index: {}]   ;;  %s1395_s5 = inlined_call_operand.vmem [shape: f32[1,128], index: 5, kind: input, shape index: {}]   ;;  %s1396_s6 = inlined_call_operand.vmem [shape: f32[1,128], index: 6, kind: input, shape index: {}]   ;;  %s1397_s7 = inlined_call_operand.hbm [shape: f32[32,128], index: 7, kind: output, shape index: {}]  }
   0x1   :  { %v32_v0 = vld [vmem:[%s1391_s1 + $0x8] sm:$0xff]  ;;  %v34_v2 = vld [vmem:[%s1391_s1 + $0x18] sm:$0xff]  ;;  %v31_v5 = vld [vmem:[%s1391_s1] sm:$0xff]  ;;  %181 = vmatprep.mubr.f32.mxu0 %v898_v7  ;;  %270 = vmatprep.mubr.f32.mxu1 %v898_v7 }
   0x2   :  { %v36_v1 = vld [vmem:[%s1391_s1 + $0x28] sm:$0xff]  ;;  %v38_v4 = vld [vmem:[%s1391_s1 + $0x38] sm:$0xff]  ;;  %v35_v6 = vld [vmem:[%s1391_s1 + $0x20] sm:$0xff] }
   0x3   :  { %v734_v3 = vpack.c.bf16 %v36_v1, %v32_v0  ;;  %v766_v8 = vpack.c.bf16 %v38_v4, %v34_v2  ;;  %v736_v9 = vpack.c.bf16 %v35_v6, %v31_v5  ;;  %v33_v10 = vld [vmem:[%s1391_s1 + $0x10] sm:$0xff]  ;;  %v40_v12 = vld [vmem:[%s1391_s1 + $0x48] sm:$0xff]  ;;  %v42_v15 = vld [vmem:[%s1391_s1 + $0x58] sm:$0xff] }
   0x4   :  { %v37_v11 = vld [vmem:[%s1391_s1 + $0x30] sm:$0xff]  ;;  %v44_v14 = vld [vmem:[%s1391_s1 + $0x68] sm:$0xff]  ;;  %v46_v16 = vld [vmem:[%s1391_s1 + $0x78] sm:$0xff] }
   0x5   :  { %735 = vmatprep.subr.bf16.mxu0 %v734_v3  ;;  %v768_v13 = vpack.c.bf16 %v37_v11, %v33_v10  ;;  %767 = vmatprep.subr.bf16.mxu1 %v766_v8  ;;  %v738_v17 = vpack.c.bf16 %v44_v14, %v40_v12  ;;  %v770_v18 = vpack.c.bf16 %v46_v16, %v42_v15  ;;  %v39_v19 = vld [vmem:[%s1391_s1 + $0x40] sm:$0xff]  ;;  %v41_v21 = vld [vmem:[%s1391_s1 + $0x50] sm:$0xff]  ;;  %v48_v24 = vld [vmem:[%s1391_s1 + $0x88] sm:$0xff] }
   0x6   :  { %737 = vmatpush1.bf16.msra.mxu0 %v736_v9  ;;  %v43_v20 = vld [vmem:[%s1391_s1 + $0x60] sm:$0xff]  ;;  %v45_v23 = vld [vmem:[%s1391_s1 + $0x70] sm:$0xff]  ;;  %v52_v25 = vld [vmem:[%s1391_s1 + $0xa8] sm:$0xff] }
   0x7   :  { %769 = vmatpush1.bf16.msra.mxu1 %v768_v13  ;;  %v740_v22 = vpack.c.bf16 %v43_v20, %v39_v19  ;;  %739 = vmatprep.subr.bf16.mxu0 %v738_v17  ;;  %v772_v26 = vpack.c.bf16 %v45_v23, %v41_v21  ;;  %v742_v27 = vpack.c.bf16 %v52_v25, %v48_v24  ;;  %v50_v28 = vld [vmem:[%s1391_s1 + $0x98] sm:$0xff]  ;;  %v47_v30 = vld [vmem:[%s1391_s1 + $0x80] sm:$0xff]  ;;  %v49_v33 = vld [vmem:[%s1391_s1 + $0x90] sm:$0xff] }
   0x8   :  { %771 = vmatprep.subr.bf16.mxu1 %v770_v18  ;;  %v54_v29 = vld [vmem:[%s1391_s1 + $0xb8] sm:$0xff]  ;;  %v51_v32 = vld [vmem:[%s1391_s1 + $0xa0] sm:$0xff]  ;;  %v53_v34 = vld [vmem:[%s1391_s1 + $0xb0] sm:$0xff] }
   0x9   :  { %v774_v31 = vpack.c.bf16 %v54_v29, %v50_v28  ;;  %v744_v35 = vpack.c.bf16 %v51_v32, %v47_v30  ;;  %v56_v36 = vld [vmem:[%s1391_s1 + $0xc8] sm:$0xff]  ;;  %v58_v38 = vld [vmem:[%s1391_s1 + $0xd8] sm:$0xff]  ;;  %v776_v39 = vpack.c.bf16 %v53_v34, %v49_v33  ;;  %v55_v42 = vld [vmem:[%s1391_s1 + $0xc0] sm:$0xff] }
   0xa   :  { %741 = vmatpush1.bf16.msra.mxu0 %v740_v22  ;;  %v60_v37 = vld [vmem:[%s1391_s1 + $0xe8] sm:$0xff]  ;;  %v62_v41 = vld [vmem:[%s1391_s1 + $0xf8] sm:$0xff]  ;;  %v59_v43 = vld [vmem:[%s1391_s1 + $0xe0] sm:$0xff] }
   0xb   :  { %773 = vmatpush1.bf16.msra.mxu1 %v772_v26  ;;  %743 = vmatprep.subr.bf16.mxu0 %v742_v27  ;;  %v746_v40 = vpack.c.bf16 %v60_v37, %v56_v36  ;;  %v778_v44 = vpack.c.bf16 %v62_v41, %v58_v38  ;;  %v57_v45 = vld [vmem:[%s1391_s1 + $0xd0] sm:$0xff]  ;;  %v64_v47 = vld [vmem:[%s1391_s1 + $0x108] sm:$0xff]  ;;  %v66_v49 = vld [vmem:[%s1391_s1 + $0x118] sm:$0xff]  ;;  %v748_v51 = vpack.c.bf16 %v59_v43, %v55_v42 }
   0xc   :  { %775 = vmatprep.subr.bf16.mxu1 %v774_v31  ;;  %v61_v46 = vld [vmem:[%s1391_s1 + $0xf0] sm:$0xff]  ;;  %v68_v48 = vld [vmem:[%s1391_s1 + $0x128] sm:$0xff]  ;;  %v70_v50 = vld [vmem:[%s1391_s1 + $0x138] sm:$0xff] }
   0xd   :  { %v780_v52 = vpack.c.bf16 %v61_v46, %v57_v45  ;;  %v750_v53 = vpack.c.bf16 %v68_v48, %v64_v47  ;;  %v63_v54 = vld [vmem:[%s1391_s1 + $0x100] sm:$0xff]  ;;  %v65_v56 = vld [vmem:[%s1391_s1 + $0x110] sm:$0xff]  ;;  %v782_v57 = vpack.c.bf16 %v70_v50, %v66_v49  ;;  %v72_v59 = vld [vmem:[%s1391_s1 + $0x148] sm:$0xff] }
   0xe   :  { %745 = vmatpush1.bf16.msra.mxu0 %v744_v35  ;;  %v67_v55 = vld [vmem:[%s1391_s1 + $0x120] sm:$0xff]  ;;  %v69_v58 = vld [vmem:[%s1391_s1 + $0x130] sm:$0xff]  ;;  %v76_v60 = vld [vmem:[%s1391_s1 + $0x168] sm:$0xff] }
   0xf   :  { %777 = vmatpush1.bf16.msra.mxu1 %v776_v39  ;;  %747 = vmatprep.subr.bf16.mxu0 %v746_v40  ;;  %v74_v61 = vld [vmem:[%s1391_s1 + $0x158] sm:$0xff]  ;;  %v752_v63 = vpack.c.bf16 %v67_v55, %v63_v54  ;;  %v784_v0 = vpack.c.bf16 %v69_v58, %v65_v56  ;;  %v754_v1 = vpack.c.bf16 %v76_v60, %v72_v59  ;;  %v71_v2 = vld [vmem:[%s1391_s1 + $0x140] sm:$0xff]  ;;  %v73_v4 = vld [vmem:[%s1391_s1 + $0x150] sm:$0xff] }
  0x10   :  { %779 = vmatprep.subr.bf16.mxu1 %v778_v44  ;;  %v78_v62 = vld [vmem:[%s1391_s1 + $0x178] sm:$0xff]  ;;  %v75_v3 = vld [vmem:[%s1391_s1 + $0x160] sm:$0xff]  ;;  %v77_v6 = vld [vmem:[%s1391_s1 + $0x170] sm:$0xff] }
  0x11   :  { %v786_v5 = vpack.c.bf16 %v78_v62, %v74_v61  ;;  %v80_v8 = vld [vmem:[%s1391_s1 + $0x188] sm:$0xff]  ;;  %v82_v10 = vld [vmem:[%s1391_s1 + $0x198] sm:$0xff]  ;;  %v756_v12 = vpack.c.bf16 %v75_v3, %v71_v2  ;;  %v788_v13 = vpack.c.bf16 %v77_v6, %v73_v4  ;;  %v79_v15 = vld [vmem:[%s1391_s1 + $0x180] sm:$0xff] }
  0x12   :  { %749 = vmatpush1.bf16.msra.mxu0 %v748_v51  ;;  %v84_v9 = vld [vmem:[%s1391_s1 + $0x1a8] sm:$0xff]  ;;  %v86_v11 = vld [vmem:[%s1391_s1 + $0x1b8] sm:$0xff]  ;;  %v83_v16 = vld [vmem:[%s1391_s1 + $0x1a0] sm:$0xff] }
  0x13   :  { %781 = vmatpush1.bf16.msra.mxu1 %v780_v52  ;;  %751 = vmatprep.subr.bf16.mxu0 %v750_v53  ;;  %v758_v14 = vpack.c.bf16 %v84_v9, %v80_v8  ;;  %v81_v17 = vld [vmem:[%s1391_s1 + $0x190] sm:$0xff]  ;;  %v790_v18 = vpack.c.bf16 %v86_v11, %v82_v10  ;;  %v88_v20 = vld [vmem:[%s1391_s1 + $0x1c8] sm:$0xff]  ;;  %v90_v22 = vld [vmem:[%s1391_s1 + $0x1d8] sm:$0xff]  ;;  %v760_v24 = vpack.c.bf16 %v83_v16, %v79_v15 }
  0x14   :  { %783 = vmatprep.subr.bf16.mxu1 %v782_v57  ;;  %v85_v19 = vld [vmem:[%s1391_s1 + $0x1b0] sm:$0xff]  ;;  %v92_v21 = vld [vmem:[%s1391_s1 + $0x1e8] sm:$0xff]  ;;  %v94_v23 = vld [vmem:[%s1391_s1 + $0x1f8] sm:$0xff] }
  0x15   :  { %v792_v25 = vpack.c.bf16 %v85_v19, %v81_v17  ;;  %v762_v26 = vpack.c.bf16 %v92_v21, %v88_v20  ;;  %v87_v27 = vld [vmem:[%s1391_s1 + $0x1c0] sm:$0xff]  ;;  %v89_v29 = vld [vmem:[%s1391_s1 + $0x1d0] sm:$0xff]  ;;  %v794_v30 = vpack.c.bf16 %v94_v23, %v90_v22  ;;  %v328_v33 = vld [vmem:[%s1393_s3 + $0x88] sm:$0xff] }
  0x16   :  { %753 = vmatpush1.bf16.msra.mxu0 %v752_v63  ;;  %v91_v28 = vld [vmem:[%s1391_s1 + $0x1e0] sm:$0xff]  ;;  %v93_v31 = vld [vmem:[%s1391_s1 + $0x1f0] sm:$0xff]  ;;  %v360_v35 = vld [vmem:[%s1393_s3 + $0x188] sm:$0xff] }
  0x17   :  { %785 = vmatpush1.bf16.msra.mxu1 %v784_v0  ;;  %755 = vmatprep.subr.bf16.mxu0 %v754_v1  ;;  %v327_v32 = vld [vmem:[%s1393_s3 + $0x80] sm:$0xff]  ;;  %v764_v36 = vpack.c.bf16 %v91_v28, %v87_v27  ;;  %v796_v37 = vpack.c.bf16 %v93_v31, %v89_v29  ;;  %v312_v41 = vld [vmem:[%s1393_s3 + $0x8] sm:$0xff]  ;;  %v329_v44 = vld [vmem:[%s1393_s3 + $0x90] sm:$0xff] }
  0x18   :  { %787 = vmatprep.subr.bf16.mxu1 %v786_v5  ;;  %v359_v34 = vld [vmem:[%s1393_s3 + $0x180] sm:$0xff]  ;;  %v798_v38 = vpack.c.bf16 %v328_v33, %v327_v32  ;;  %v344_v43 = vld [vmem:[%s1393_s3 + $0x108] sm:$0xff]  ;;  %v330_v45 = vld [vmem:[%s1393_s3 + $0x98] sm:$0xff] }
  0x19   :  { %v830_v39 = vpack.c.bf16 %v360_v35, %v359_v34  ;;  %v311_v40 = vld [vmem:[%s1393_s3] sm:$0xff]  ;;  %v361_v47 = vld [vmem:[%s1393_s3 + $0x190] sm:$0xff]  ;;  %v362_v48 = vld [vmem:[%s1393_s3 + $0x198] sm:$0xff]  ;;  %v802_v51 = vpack.c.bf16 %v330_v45, %v329_v44 }
  0x1a   :  { %757 = vmatpush1.bf16.msra.mxu0 %v756_v12  ;;  %v343_v42 = vld [vmem:[%s1393_s3 + $0x100] sm:$0xff]  ;;  %v800_v49 = vpack.c.bf16 %v312_v41, %v311_v40  ;;  %v313_v52 = vld [vmem:[%s1393_s3 + $0x10] sm:$0xff]  ;;  %v314_v53 = vld [vmem:[%s1393_s3 + $0x18] sm:$0xff]  ;;  %v834_v55 = vpack.c.bf16 %v362_v48, %v361_v47 }
  0x1b   :  { %789 = vmatpush1.bf16.msra.mxu1 %v788_v13  ;;  %759 = vmatprep.subr.bf16.mxu0 %v758_v14  ;;  %v1169_v46 = vld [vmem:[%s1390_s0] sm:$0xff]  ;;  %v832_v50 = vpack.c.bf16 %v344_v43, %v343_v42  ;;  %v345_v54 = vld [vmem:[%s1393_s3 + $0x110] sm:$0xff]  ;;  %v346_v56 = vld [vmem:[%s1393_s3 + $0x118] sm:$0xff]  ;;  %v804_v62 = vpack.c.bf16 %v314_v53, %v313_v52 }
  0x1c   :  { %791 = vmatprep.subr.bf16.mxu1 %v790_v18  ;;  %v331_v57 = vld [vmem:[%s1393_s3 + $0xa0] sm:$0xff]  ;;  %v332_v58 = vld [vmem:[%s1393_s3 + $0xa8] sm:$0xff]  ;;  %v1213_v63 = vld [vmem:[%s1390_s0 + $0x10] sm:$0xff]  ;;  %v836_v0 = vpack.c.bf16 %v346_v56, %v345_v54 }
  0x1d   :  { %v1201_v59 = vld [vmem:[%s1390_s0 + $0x8] sm:$0xff]  ;;  %v363_v60 = vld [vmem:[%s1393_s3 + $0x1a0] sm:$0xff]  ;;  %v806_v1 = vpack.c.bf16 %v332_v58, %v331_v57  ;;  %v333_v8 = vld [vmem:[%s1393_s3 + $0xb0] sm:$0xff] }
  0x1e   :  { %761 = vmatpush1.bf16.msra.mxu0 %v760_v24  ;;  %v364_v61 = vld [vmem:[%s1393_s3 + $0x1a8] sm:$0xff]  ;;  %v315_v2 = vld [vmem:[%s1393_s3 + $0x20] sm:$0xff]  ;;  %v334_v9 = vld [vmem:[%s1393_s3 + $0xb8] sm:$0xff] }
  0x1f   :  { %793 = vmatpush1.bf16.msra.mxu1 %v792_v25  ;;  %763 = vmatprep.subr.bf16.mxu0 %v762_v26  ;;  %v316_v3 = vld [vmem:[%s1393_s3 + $0x28] sm:$0xff]  ;;  %v347_v4 = vld [vmem:[%s1393_s3 + $0x120] sm:$0xff]  ;;  %v838_v5 = vpack.c.bf16 %v364_v61, %v363_v60  ;;  %v365_v10 = vld [vmem:[%s1393_s3 + $0x1b0] sm:$0xff] }
  0x20   :  { %795 = vmatprep.subr.bf16.mxu1 %v794_v30  ;;  %v348_v6 = vld [vmem:[%s1393_s3 + $0x128] sm:$0xff]  ;;  %v366_v11 = vld [vmem:[%s1393_s3 + $0x1b8] sm:$0xff] }
  0x22   :  { %765 = vmatpush1.bf16.msra.mxu0 %v764_v36 }
  0x23   :  { %797 = vmatpush1.bf16.msra.mxu1 %v796_v37  ;;  %799 = vmatprep.subr.bf16.mxu0 %v798_v38 }
  0x24   :  { %831 = vmatprep.subr.bf16.mxu1 %v830_v39 }
  0x25   :  { %182 = vmatmul.mubr.f32.vlgmr.msra.gmra.mrb[0].mxu0 %v1169_v46 }
  0x26   :  { %271 = vmatmul.mubr.f32.vlgmr.msra.gmra.mrb[0].mxu1 %v1169_v46  ;;  %187 = vmatprep.mubr.f32.mxu0 %v898_v7 }
  0x27   :  { %276 = vmatprep.mubr.f32.mxu1 %v898_v7  ;;  %801 = vmatpush3.bf16.msra.mxu0 %v800_v49 }
  0x28   :  { %833 = vmatpush3.bf16.msra.mxu1 %v832_v50  ;;  %803 = vmatprep.subr.bf16.mxu0 %v802_v51 }
  0x29   :  { %188 = vmatmul.mubr.f32.gmra.mrb[2].mxu0 %v1201_v59  ;;  %835 = vmatprep.subr.bf16.mxu1 %v834_v55 }
  0x2a   :  { %277 = vmatmul.mubr.f32.gmra.mrb[2].mxu1 %v1201_v59  ;;  %193 = vmatprep.mubr.f32.mxu0 %v898_v7 }
  0x2b   :  { %12 = vsyncpa [#allocation3], 0  ;;  %282 = vmatprep.mubr.f32.mxu1 %v898_v7  ;;  %805 = vmatpush3.bf16.msra.mxu0 %v804_v62  ;;  %v808_v12 = vpack.c.bf16 %v316_v3, %v315_v2  ;;  %v840_v13 = vpack.c.bf16 %v348_v6, %v347_v4  ;;  %v810_v14 = vpack.c.bf16 %v334_v9, %v333_v8  ;;  %v317_v15 = vld [vmem:[%s1393_s3 + $0x30] sm:$0xff]  ;;  %v318_v16 = vld [vmem:[%s1393_s3 + $0x38] sm:$0xff] }
  0x2c   :  { %837 = vmatpush3.bf16.msra.mxu1 %v836_v0  ;;  %807 = vmatprep.subr.bf16.mxu0 %v806_v1  ;;  %v349_v17 = vld [vmem:[%s1393_s3 + $0x130] sm:$0xff]  ;;  %v842_v18 = vpack.c.bf16 %v366_v11, %v365_v10  ;;  %v350_v19 = vld [vmem:[%s1393_s3 + $0x138] sm:$0xff]  ;;  %v335_v20 = vld [vmem:[%s1393_s3 + $0xc0] sm:$0xff]  ;;  %v812_v25 = vpack.c.bf16 %v318_v16, %v317_v15  ;;  %v97_v10 = vlaneseq }
  0x2d   :  { %194 = vmatmul.mubr.f32.gmra.mrb[4].mxu0 %v1213_v63  ;;  %839 = vmatprep.subr.bf16.mxu1 %v838_v5  ;;  %v336_v21 = vld [vmem:[%s1393_s3 + $0xc8] sm:$0xff]  ;;  %v1267_v22 = vld [vmem:[%s1390_s0 + $0x18] sm:$0xff]  ;;  %v367_v23 = vld [vmem:[%s1393_s3 + $0x1c0] sm:$0xff]  ;;  %v844_v26 = vpack.c.bf16 %v350_v19, %v349_v17 }
  0x2e   :  { %283 = vmatmul.mubr.f32.gmra.mrb[4].mxu1 %v1213_v63  ;;  %199 = vmatprep.mubr.f32.mxu0 %v898_v7  ;;  %v368_v24 = vld [vmem:[%s1393_s3 + $0x1c8] sm:$0xff]  ;;  %v814_v27 = vpack.c.bf16 %v336_v21, %v335_v20  ;;  %v319_v28 = vld [vmem:[%s1393_s3 + $0x40] sm:$0xff]  ;;  %v337_v32 = vld [vmem:[%s1393_s3 + $0xd0] sm:$0xff]  ;;  %v98_v11 = vshrl.u32 %v97_v10, 7 }
  0x2f   :  { %288 = vmatprep.mubr.f32.mxu1 %v898_v7  ;;  %809 = vmatpush3.bf16.msra.mxu0 %v808_v12  ;;  %v320_v29 = vld [vmem:[%s1393_s3 + $0x48] sm:$0xff]  ;;  %v351_v30 = vld [vmem:[%s1393_s3 + $0x140] sm:$0xff]  ;;  %v846_v7 = vpack.c.bf16 %v368_v24, %v367_v23  ;;  %v338_v33 = vld [vmem:[%s1393_s3 + $0xd8] sm:$0xff] }
  0x30   :  { %841 = vmatpush3.bf16.msra.mxu1 %v840_v13  ;;  %811 = vmatprep.subr.bf16.mxu0 %v810_v14  ;;  %v352_v31 = vld [vmem:[%s1393_s3 + $0x148] sm:$0xff]  ;;  %v369_v34 = vld [vmem:[%s1393_s3 + $0x1d0] sm:$0xff]  ;;  %v370_v35 = vld [vmem:[%s1393_s3 + $0x1d8] sm:$0xff]  ;;  %v816_v36 = vpack.c.bf16 %v320_v29, %v319_v28  ;;  %v818_v38 = vpack.c.bf16 %v338_v33, %v337_v32  ;;  %v99_v12 = vsub.s32 0, %v98_v11  ;;  %v107_v14 = vsub.s32 2, %v98_v11 }
  0x31   :  { %200 = vmatmul.mubr.f32.gmra.mrb[6].mxu0 %v1267_v22  ;;  %843 = vmatprep.subr.bf16.mxu1 %v842_v18  ;;  %v848_v37 = vpack.c.bf16 %v352_v31, %v351_v30  ;;  %v321_v39 = vld [vmem:[%s1393_s3 + $0x50] sm:$0xff]  ;;  %v322_v40 = vld [vmem:[%s1393_s3 + $0x58] sm:$0xff]  ;;  %v850_v42 = vpack.c.bf16 %v370_v35, %v369_v34  ;;  %v339_v44 = vld [vmem:[%s1393_s3 + $0xe0] sm:$0xff]  ;;  %v103_v15 = vsub.s32 1, %v98_v11  ;;  %v111_v16 = vsub.s32 3, %v98_v11 }
  0x32   :  { %289 = vmatmul.mubr.f32.gmra.mrb[6].mxu1 %v1267_v22  ;;  %v353_v41 = vld [vmem:[%s1393_s3 + $0x150] sm:$0xff]  ;;  %v354_v43 = vld [vmem:[%s1393_s3 + $0x158] sm:$0xff]  ;;  %v340_v45 = vld [vmem:[%s1393_s3 + $0xe8] sm:$0xff]  ;;  %v820_v49 = vpack.c.bf16 %v322_v40, %v321_v39 }
  0x33   :  { %813 = vmatpush3.bf16.msra.mxu0 %v812_v25  ;;  %v371_v47 = vld [vmem:[%s1393_s3 + $0x1e0] sm:$0xff]  ;;  %v372_v48 = vld [vmem:[%s1393_s3 + $0x1e8] sm:$0xff]  ;;  %v852_v50 = vpack.c.bf16 %v354_v43, %v353_v41  ;;  %v822_v51 = vpack.c.bf16 %v340_v45, %v339_v44  ;;  %v341_v60 = vld [vmem:[%s1393_s3 + $0xf0] sm:$0xff] }
  0x34   :  { %845 = vmatpush3.bf16.msra.mxu1 %v844_v26  ;;  %815 = vmatprep.subr.bf16.mxu0 %v814_v27  ;;  %v854_v52 = vpack.c.bf16 %v372_v48, %v371_v47  ;;  %v323_v53 = vld [vmem:[%s1393_s3 + $0x60] sm:$0xff]  ;;  %v324_v54 = vld [vmem:[%s1393_s3 + $0x68] sm:$0xff]  ;;  %v342_v61 = vld [vmem:[%s1393_s3 + $0xf8] sm:$0xff] }
  0x35   :  { %847 = vmatprep.subr.bf16.mxu1 %v846_v7  ;;  %v355_v55 = vld [vmem:[%s1393_s3 + $0x160] sm:$0xff]  ;;  %v824_v56 = vpack.c.bf16 %v324_v54, %v323_v53  ;;  %v356_v57 = vld [vmem:[%s1393_s3 + $0x168] sm:$0xff]  ;;  %v373_v62 = vld [vmem:[%s1393_s3 + $0x1f0] sm:$0xff]  ;;  %v826_v0 = vpack.c.bf16 %v342_v61, %v341_v60 }
  0x36   :  { %v856_v58 = vpack.c.bf16 %v356_v57, %v355_v55  ;;  %v374_v1 = vld [vmem:[%s1393_s3 + $0x1f8] sm:$0xff]  ;;  %v325_v2 = vld [vmem:[%s1393_s3 + $0x70] sm:$0xff]  ;;  %v95_v13 = vld [vmem:[%s1392_s2] sm:$0xf] }
  0x37   :  { %817 = vmatpush3.bf16.msra.mxu0 %v816_v36  ;;  %v326_v3 = vld [vmem:[%s1393_s3 + $0x78] sm:$0xff]  ;;  %v858_v4 = vpack.c.bf16 %v374_v1, %v373_v62  ;;  %v357_v6 = vld [vmem:[%s1393_s3 + $0x170] sm:$0xff]  ;;  %v100_v17 = vrot.slane %v95_v13, %v99_v12  ;;  %v108_v18 = vrot.slane %v95_v13, %v107_v14  ;;  %v104_v19 = vrot.slane %v95_v13, %v103_v15  ;;  %v643_v11 = vld [vmem:[%s1394_s4] ss:$0 sm:$0xff] }
  0x38   :  { %849 = vmatpush3.bf16.msra.mxu1 %v848_v37  ;;  %819 = vmatprep.subr.bf16.mxu0 %v818_v38  ;;  %v828_v5 = vpack.c.bf16 %v326_v3, %v325_v2  ;;  %v358_v8 = vld [vmem:[%s1393_s3 + $0x178] sm:$0xff]  ;;  %v112_v20 = vrot.slane %v95_v13, %v111_v16 }
  0x39   :  { %851 = vmatprep.subr.bf16.mxu1 %v850_v42  ;;  %v860_v9 = vpack.c.bf16 %v358_v8, %v357_v6 }
  0x3b   :  { %821 = vmatpush3.bf16.msra.mxu0 %v820_v49 }
  0x3c   :  { %853 = vmatpush3.bf16.msra.mxu1 %v852_v50  ;;  %823 = vmatprep.subr.bf16.mxu0 %v822_v51 }
  0x3d   :  { %855 = vmatprep.subr.bf16.mxu1 %v854_v52 }
  0x3f   :  { %825 = vmatpush3.bf16.msra.mxu0 %v824_v56 }
  0x40   :  { %857 = vmatpush3.bf16.msra.mxu1 %v856_v58  ;;  %827 = vmatprep.subr.bf16.mxu0 %v826_v0 }
  0x41   :  { %859 = vmatprep.subr.bf16.mxu1 %v858_v4 }
  0x43   :  { %829 = vmatpush3.bf16.msra.mxu0 %v828_v5 }
  0x44   :  { %861 = vmatpush3.bf16.msra.mxu1 %v860_v9 }
  0xf8   :  { %v183_v21 = vpop.f32.mrb[0].mxu0 }
  0xf9   :  { %v184_v23 = vadd.f32 %v183_v21, %v100_v17  ;;  %v272_v24 = vpop.f32.mrb[0].mxu1  ;;  %v185_v25 = vpop.f32.mrb[1].mxu0 }
  0xfa   :  { %v273_v26 = vadd.f32 %v272_v24, %v108_v18  ;;  %v186_v27 = vadd.f32 %v185_v25, %v104_v19  ;;  %v274_v28 = vpop.f32.mrb[1].mxu1 }
  0xfb   :  { %v275_v29 = vadd.f32 %v274_v28, %v112_v20  ;;  %v295_v32 = vmax.f32 %v184_v23, 0.0 }
  0xfc   :  { %v297_v30 = vmax.f32 %v273_v26, 0.0  ;;  %v296_v7 = vmax.f32 %v186_v27, 0.0  ;;  %v189_v31 = vpop.f32.mrb[2].mxu0 }
  0xfd   :  { %v298_v33 = vmax.f32 %v275_v29, 0.0  ;;  %v190_v34 = vadd.f32 %v189_v31, %v100_v17  ;;  %v278_v35 = vpop.f32.mrb[2].mxu1  ;;  %v191_v36 = vpop.f32.mrb[3].mxu0 }
  0xfe   :  { %v279_v37 = vadd.f32 %v278_v35, %v108_v18  ;;  %v192_v38 = vadd.f32 %v191_v36, %v104_v19  ;;  %v280_v39 = vpop.f32.mrb[3].mxu1  ;;  %446 = vmatprep.mubr.f32.mxu0 %v296_v7 }
  0xff   :  { %v281_v40 = vadd.f32 %v280_v39, %v112_v20  ;;  %531 = vmatprep.mubr.f32.mxu1 %v298_v33  ;;  %447 = vmatmul.mubr.f32.vlgmr.msra.gmra.mrb[8].mxu0 %v295_v32  ;;  %v299_v44 = vmax.f32 %v190_v34, 0.0 }
 0x100   :  { %v301_v41 = vmax.f32 %v279_v37, 0.0  ;;  %v300_v42 = vmax.f32 %v192_v38, 0.0  ;;  %532 = vmatmul.mubr.f32.vlgmr.msra.gmra.mrb[8].mxu1 %v297_v30  ;;  %v195_v43 = vpop.f32.mrb[4].mxu0 }
 0x101   :  { %v302_v45 = vmax.f32 %v281_v40, 0.0  ;;  %v196_v47 = vadd.f32 %v195_v43, %v100_v17  ;;  %v284_v48 = vpop.f32.mrb[4].mxu1  ;;  %v197_v49 = vpop.f32.mrb[5].mxu0 }
 0x102   :  { %v285_v50 = vadd.f32 %v284_v48, %v108_v18  ;;  %v198_v51 = vadd.f32 %v197_v49, %v104_v19  ;;  %v286_v52 = vpop.f32.mrb[5].mxu1  ;;  %451 = vmatprep.mubr.f32.mxu0 %v300_v42 }
 0x103   :  { %v287_v53 = vadd.f32 %v286_v52, %v112_v20  ;;  %536 = vmatprep.mubr.f32.mxu1 %v302_v45  ;;  %452 = vmatmul.mubr.f32.gmra.mrb[10].mxu0 %v299_v44  ;;  %v303_v57 = vmax.f32 %v196_v47, 0.0 }
 0x104   :  { %v305_v54 = vmax.f32 %v285_v50, 0.0  ;;  %v304_v55 = vmax.f32 %v198_v51, 0.0  ;;  %537 = vmatmul.mubr.f32.gmra.mrb[10].mxu1 %v301_v41  ;;  %v201_v56 = vpop.f32.mrb[6].mxu0 }
 0x105   :  { %v306_v58 = vmax.f32 %v287_v53, 0.0  ;;  %v202_v60 = vadd.f32 %v201_v56, %v100_v17  ;;  %v290_v61 = vpop.f32.mrb[6].mxu1  ;;  %v203_v62 = vpop.f32.mrb[7].mxu0 }
 0x106   :  { %v291_v0 = vadd.f32 %v290_v61, %v108_v18  ;;  %v204_v1 = vadd.f32 %v203_v62, %v104_v19  ;;  %v292_v2 = vpop.f32.mrb[7].mxu1  ;;  %456 = vmatprep.mubr.f32.mxu0 %v304_v55 }
 0x107   :  { %v293_v3 = vadd.f32 %v292_v2, %v112_v20  ;;  %541 = vmatprep.mubr.f32.mxu1 %v306_v58  ;;  %457 = vmatmul.mubr.f32.gmra.mrb[12].mxu0 %v303_v57  ;;  %v307_v6 = vmax.f32 %v202_v60, 0.0 }
 0x108   :  { %v309_v4 = vmax.f32 %v291_v0, 0.0  ;;  %v308_v5 = vmax.f32 %v204_v1, 0.0  ;;  %542 = vmatmul.mubr.f32.gmra.mrb[12].mxu1 %v305_v54 }
 0x109   :  { %v310_v8 = vmax.f32 %v293_v3, 0.0 }
 0x10a   :  { %461 = vmatprep.mubr.f32.mxu0 %v308_v5 }
 0x10b   :  { %546 = vmatprep.mubr.f32.mxu1 %v310_v8  ;;  %462 = vmatmul.mubr.f32.gmra.mrb[14].mxu0 %v307_v6 }
 0x10c   :  { %547 = vmatmul.mubr.f32.gmra.mrb[14].mxu1 %v309_v4 }
 0x1d2   :  { %v678_v9 = vpop.f32.mrb[8].mxu0 }
 0x1d3   :  { %v722_v10 = vpop.f32.mrb[8].mxu1  ;;  %v679_v12 = vpop.f32.mrb[9].mxu0 }
 0x1d4   :  { %v680_v13 = vadd.f32 %v679_v12, %v678_v9  ;;  %v723_v14 = vpop.f32.mrb[9].mxu1 }
 0x1d5   :  { %v724_v15 = vadd.f32 %v723_v14, %v722_v10  ;;  %v644_v10 = vld [vmem:[%s1395_s5] ss:$0 sm:$0xff]  ;;  %s899_s5 = smov [#allocation2]  }
 0x1d6   :  { %v449_v16 = vadd.f32 %v680_v13, %v643_v11  ;;  %v681_v17 = vpop.f32.mrb[10].mxu0  ;;  %v645_v13 = vld [vmem:[%s1396_s6] ss:$0 sm:$0xff]  ;;  %s632_s8 = sshll.u32 %s899_s5, 4  ;;  %s633_s8 = int_to_ptr.vmem [resolvable:$true] %s632_s8 }
 0x1d7   :  { %v725_v18 = vpop.f32.mrb[10].mxu1  ;;  %v682_v19 = vpop.f32.mrb[11].mxu0  ;;  %s874_s6 = scalar_lea.vmem %s633_s8, 512  ;;  %p879_p1 = scmp.lt.s32.totalorder %s633_s8, %s633_s8 }
 0x1d8   :  { %v534_v20 = vadd.f32 %v724_v15, %v449_v16  ;;  %v683_v21 = vadd.f32 %v682_v19, %v681_v17  ;;  %v726_v23 = vpop.f32.mrb[11].mxu1  ;;  %p875_p0 = scmp.ne.s32.totalorder %s633_s8, %s874_s6  ;;  %p880_p2 = scmp.lt.s32.totalorder %s874_s6, %s874_s6 }
 0x1d9   :  { %v727_v24 = vadd.f32 %v726_v23, %v725_v18 }
 0x1da   :  { %v454_v25 = vadd.f32 %v683_v21, %v643_v11  ;;  %v684_v26 = vpop.f32.mrb[12].mxu0  ;;  %v552_v27 = vadd.f32 %v534_v20, %v1169_v46  ;;  %p881_p3 = por %p880_p2, %p879_p1 }
 0x1db   :  { %v728_v28 = vpop.f32.mrb[12].mxu1  ;;  %v685_v29 = vpop.f32.mrb[13].mxu0 }
 0x1dc   :  { %v539_v30 = vadd.f32 %v727_v24, %v454_v25  ;;  %v686_v7 = vadd.f32 %v685_v29, %v684_v26  ;;  %v729_v31 = vpop.f32.mrb[13].mxu1  ;;  %556 = vadd.xlane.f32.xlu0 %v552_v27  ;;  %p882_p4 = pnand %p881_p3, %p875_p0 }
 0x1dd   :  { %v730_v32 = vadd.f32 %v729_v31, %v728_v28 }
 0x1de   :  { %v459_v33 = vadd.f32 %v686_v7, %v643_v11  ;;  %v687_v34 = vpop.f32.mrb[14].mxu0  ;;  %v553_v35 = vadd.f32 %v539_v30, %v1201_v59 }
 0x1df   :  { %v731_v36 = vpop.f32.mrb[14].mxu1  ;;  %v688_v37 = vpop.f32.mrb[15].mxu0 }
 0x1e0   :  { %v544_v38 = vadd.f32 %v730_v32, %v459_v33  ;;  %v689_v39 = vadd.f32 %v688_v37, %v687_v34  ;;  %v732_v40 = vpop.f32.mrb[15].mxu1  ;;  %558 = vadd.xlane.f32.xlu0 %v553_v35 }
 0x1e1   :  { %v733_v41 = vadd.f32 %v732_v40, %v731_v36 }
 0x1e2   :  { %v464_v42 = vadd.f32 %v689_v39, %v643_v11  ;;  %v554_v46 = vadd.f32 %v544_v38, %v1213_v63 }
 0x1e4   :  { %v549_v43 = vadd.f32 %v733_v41, %v464_v42  ;;  %560 = vadd.xlane.f32.xlu1 %v554_v46 }
 0x1e6   :  { %v555_v44 = vadd.f32 %v549_v43, %v1267_v22 }
 0x1e8   :  { %562 = vadd.xlane.f32.xlu1 %v555_v44 }
 0x269   :  { %v557_v45 = vpop.xlane.xlu0 %556 }
 0x26a   :  { %v565_v47 = vmul.f32 0.0078125, %v557_v45 }
 0x26c   :  { %v569_v48 = vsub.f32 %v552_v27, %v565_v47 }
 0x26d   :  { %v559_v49 = vpop.xlane.xlu0 %558 }
 0x26e   :  { %v566_v59 = vmul.f32 0.0078125, %v559_v49  ;;  %v573_v50 = vmul.f32 %v569_v48, %v569_v48 }
 0x270   :  { %v570_v51 = vsub.f32 %v553_v35, %v566_v59  ;;  %577 = vadd.xlane.f32.xlu0 %v573_v50 }
 0x271   :  { %v561_v52 = vpop.xlane.xlu1 %560 }
 0x272   :  { %v567_v53 = vmul.f32 0.0078125, %v561_v52  ;;  %v574_v54 = vmul.f32 %v570_v51, %v570_v51 }
 0x274   :  { %v571_v55 = vsub.f32 %v554_v46, %v567_v53  ;;  %579 = vadd.xlane.f32.xlu1 %v574_v54 }
 0x275   :  { %v563_v56 = vpop.xlane.xlu1 %562 }
 0x276   :  { %v568_v63 = vmul.f32 0.0078125, %v563_v56  ;;  %v575_v57 = vmul.f32 %v571_v55, %v571_v55 }
 0x278   :  { %v572_v58 = vsub.f32 %v555_v44, %v568_v63  ;;  %581 = vadd.xlane.f32.xlu0 %v575_v57 }
 0x27a   :  { %v576_v22 = vmul.f32 %v572_v58, %v572_v58 }
 0x27c   :  { %583 = vadd.xlane.f32.xlu1 %v576_v22 }
 0x2fd   :  { %v578_v60 = vpop.xlane.xlu0 %577 }
 0x2fe   :  { %v585_v61 = vmul.f32 0.0078125, %v578_v60 }
 0x300   :  { %v589_v62 = vadd.f32 1e-05, %v585_v61 }
 0x301   :  { %v580_v0 = vpop.xlane.xlu1 %579 }
 0x302   :  { %866 = vrsqrt.f32 %v589_v62  ;;  %v586_v1 = vmul.f32 0.0078125, %v580_v0 }
 0x304   :  { %v590_v2 = vadd.f32 1e-05, %v586_v1 }
 0x305   :  { %v582_v3 = vpop.xlane.xlu0 %581 }
 0x306   :  { %868 = vrsqrt.f32 %v590_v2  ;;  %v587_v4 = vmul.f32 0.0078125, %v582_v3 }
 0x308   :  { %v591_v5 = vadd.f32 1e-05, %v587_v4 }
 0x309   :  { %v584_v6 = vpop.xlane.xlu1 %583 }
 0x30a   :  { %870 = vrsqrt.f32 %v591_v5  ;;  %v588_v8 = vmul.f32 0.0078125, %v584_v6 }
 0x30c   :  { %v867_v9 = vpop.eup %866  ;;  %v592_v11 = vadd.f32 1e-05, %v588_v8 }
 0x30d   :  { %v597_v12 = vmul.f32 %v867_v9, %v569_v48 }
 0x30e   :  { %872 = vrsqrt.f32 %v592_v11 }
 0x30f   :  { %v608_v14 = vmul.f32 %v644_v10, %v597_v12 }
 0x310   :  { %v869_v15 = vpop.eup %868 }
 0x311   :  { %v598_v16 = vmul.f32 %v869_v15, %v570_v51  ;;  %v619_v17 = vadd.f32 %v645_v13, %v608_v14 }
 0x313   :  { %v609_v18 = vmul.f32 %v644_v10, %v598_v16  ;;  %623 = vst [vmem:[#allocation2] sm:$0xff] %v619_v17 }
 0x314   :  { %v871_v19 = vpop.eup %870 }
 0x315   :  { %v599_v20 = vmul.f32 %v871_v19, %v571_v55  ;;  %v620_v21 = vadd.f32 %v645_v13, %v609_v18 }
 0x317   :  { %v610_v23 = vmul.f32 %v644_v10, %v599_v20  ;;  %624 = vst [vmem:[#allocation2 + $0x8] sm:$0xff] %v620_v21 }
 0x318   :  { %v873_v24 = vpop.eup %872 }
 0x319   :  { %v621_v25 = vadd.f32 %v645_v13, %v610_v23  ;;  %v600_v26 = vmul.f32 %v873_v24, %v572_v58 }
 0x31b   :  { %625 = vst [vmem:[#allocation2 + $0x10] sm:$0xff] %v621_v25  ;;  %v611_v27 = vmul.f32 %v644_v10, %v600_v26 }
 0x31d   :  { %v622_v28 = vadd.f32 %v645_v13, %v611_v27 }
 0x31f   :  { %626 = vst [vmem:[#allocation2 + $0x18] sm:$0xff] %v622_v28 }
 0x320   :  { %885 = shalt.err (!%p882_p4)
}
 0x321   :  { %s886_s11 = scalar_lea.hbm %s1397_s7, 512 }
 0x322   :  { %p887_p5 = scmp.ne.s32.totalorder %s1397_s7, %s886_s11  ;;  %p890_p6 = scmp.lt.u32.totalorder %s886_s11, %s1397_s7 }
 0x324   :  { %p892_p7 = pnand %p890_p6, %p887_p5 }
 0x326   :  { %895 = shalt.err (!%p892_p7)
}
 0x327   :  { %s900_s16 = smov 128   ;;  %s901_s17 = smov 8  }
 0x328   :  { %638 = dma.vmem_to_hbm [thread:$0]  %s633_s8, 512, %s1397_s7, [#allocation3], %s900_s16, %s900_s16, %s901_s17  }
 0x329   :  { %896 = dma.done.wait [#allocation3], 512  }
 0x32a   :  { %897 = vsyncadd [#allocation3], 4294966784 }
 0x32b   :  { %642 = vsyncpa [#allocation3], 1 }

</bundles_post_ra>
